<compile_context>
chip_gen: v6e
topology: v6e:2x2x1
jax: 0.10.0
libtpu: 0.0.40
codegen_flags: <defaults>
</compile_context>

<pallas_src>
import jax
import jax.numpy as jnp
from jax.experimental import pallas as pl
from jax.experimental.pallas import tpu as pltpu

NUM_CLASSES = 2
PAD_CLASSES = 128  # lane-dense padded output width
HIDDEN = 768
FC1 = 512


# ------------------------------ Pallas kernel ------------------------------ #
def fused_head_kernel(emb_ref, mask_ref, pw_ref, pb_ref,
                      w1_ref, b1_ref, w2_ref, b2_ref, o_ref):
    # emb: [B, S, H] f32     mask: [B, S] f32
    # pw : [H, H]    bf16    pb : [1, H]   f32
    # w1 : [H, 512]  bf16    b1 : [1, 512] f32
    # w2 : [512,128] bf16 (cols >= 2 are zero)   b2: [1, 128] f32
    # o  : [B, 128]  f32 (cols >= 2 are junk; wrapper slices [:, :2])
    emb = emb_ref[...]
    mask = mask_ref[...]

    # masked mean pool over the sequence axis (stand-in for bert pooling)
    summed = jnp.sum(emb * mask[..., None], axis=1)                    # [B, H]
    denom = jnp.maximum(jnp.sum(mask, axis=1, keepdims=True), 1.0)     # [B, 1]
    mean_hidden = summed / denom                                       # [B, H]

    # pooler: dense(768 -> 768) + tanh   -> pooler_output
    pooled = jnp.tanh(
        jnp.dot(mean_hidden.astype(jnp.bfloat16), pw_ref[...],
                preferred_element_type=jnp.float32) + pb_ref[...])     # [B, H]

    # fc1: Linear(768 -> 512) + ReLU   (dropout(0.1) is identity in eval)
    h = jnp.maximum(
        jnp.dot(pooled.astype(jnp.bfloat16), w1_ref[...],
                preferred_element_type=jnp.float32) + b1_ref[...], 0.0)

    # fc2: Linear(512 -> 2), padded to 128 output lanes (lane-dense store)
    logits = jnp.dot(h.astype(jnp.bfloat16), w2_ref[...],
                     preferred_element_type=jnp.float32) + b2_ref[...]  # [B,128]

    # LogSoftmax(dim=1) over the 2 real classes, closed form (no XLU reduce):
    #   lse = max(l0, l1) + log1p(exp(-|l1 - l0|))
    l0 = logits[:, 0:1]
    l1 = logits[:, 1:2]
    m = jnp.maximum(l0, l1)
    lse = m + jnp.log1p(jnp.exp(-jnp.abs(l1 - l0)))                     # [B, 1]
    o_ref[...] = logits - lse


# --------------------------------- wrapper --------------------------------- #
def spam_classifier_forward(input_ids, attention_mask, params):
    embed_tbl, pw_bf16, pb, w1_bf16, b1, w2p_bf16, b2p = params

    emb = embed_tbl[input_ids]                        # [B, S, H] f32 (XLA gather)
    mask = attention_mask.astype(jnp.float32)         # [B, S]
    B, S, H = emb.shape

    flops = 2 * B * (H * H + H * FC1 + FC1 * PAD_CLASSES) + 4 * B * S * H
    transcendentals = B * H + 2 * B                   # tanh + exp/log
    bytes_accessed = (emb.nbytes + mask.nbytes + pw_bf16.nbytes + pb.nbytes
                      + w1_bf16.nbytes + b1.nbytes + w2p_bf16.nbytes
                      + b2p.nbytes + B * PAD_CLASSES * 4)

    vmem = pl.BlockSpec(memory_space=pltpu.MemorySpace.VMEM)
    out_padded = pl.pallas_call(
        fused_head_kernel,
        out_shape=jax.ShapeDtypeStruct((B, PAD_CLASSES), jnp.float32),
        in_specs=[vmem] * 8,
        out_specs=vmem,
        cost_estimate=pl.CostEstimate(flops=flops,
                                      transcendentals=transcendentals,
                                      bytes_accessed=bytes_accessed),
    )(emb, mask, pw_bf16, pb, w1_bf16, b1, w2p_bf16, b2p)
    return out_padded[:, :NUM_CLASSES]


# ---------------------------------- driver --------------------------------- #
if __name__ == "__main__":
    key = jax.random.PRNGKey(0)
    (k_emb, k_pw, k_pb, k_w1, k_b1, k_w2, k_b2,
     k_ids, k_mask) = jax.random.split(key, 9)

    B, S = 8, 16
    H, HID, NCLS = HIDDEN, FC1, NUM_CLASSES
    VOCAB = 100

    # synthetic "bert" parameters
    embed_tbl = jax.random.normal(k_emb, (VOCAB, H), jnp.float32) * 0.02
    pooler_w = jax.random.normal(k_pw, (H, H), jnp.float32) * 0.02
    pooler_b = jax.random.normal(k_pb, (H,), jnp.float32) * 0.02

    # classifier head parameters (PyTorch Linear: W [out, in]; store transposed)
    w1_t = (jax.random.normal(k_w1, (HID, H), jnp.float32) * (1.0 / H) ** 0.5).T
    b1 = (jax.random.normal(k_b1, (HID,), jnp.float32) * 0.01).reshape(1, HID)
    w2_t = (jax.random.normal(k_w2, (NCLS, HID), jnp.float32) * (1.0 / HID) ** 0.5).T
    b2 = (jax.random.normal(k_b2, (NCLS,), jnp.float32) * 0.01).reshape(1, NCLS)

    # one-time weight prep: bf16 MXU inputs, lane-dense padded fc2
    pw_bf16 = pooler_w.astype(jnp.bfloat16)
    pb_row = pooler_b.reshape(1, H).astype(jnp.float32)
    w1_bf16 = w1_t.astype(jnp.bfloat16)
    w2p = jnp.zeros((HID, PAD_CLASSES), jnp.float32).at[:, :NCLS].set(w2_t)
    w2p_bf16 = w2p.astype(jnp.bfloat16)
    b2p = jnp.zeros((1, PAD_CLASSES), jnp.float32).at[:, :NCLS].set(b2)

    params = (embed_tbl, pw_bf16, pb_row, w1_bf16, b1, w2p_bf16, b2p)

    # example inputs
    input_ids = jax.random.randint(k_ids, (B, S), 0, VOCAB, jnp.int32)
    attention_mask = (jax.random.uniform(k_mask, (B, S)) > 0.2).astype(jnp.int32)

    # fused Pallas forward
    log_probs = spam_classifier_forward(input_ids, attention_mask, params)
    jax.block_until_ready(log_probs)

    # reference in plain JAX (mirrors the bf16 matmul-input casts)
    emb = embed_tbl[input_ids]
    mask = attention_mask.astype(jnp.float32)
    summed = jnp.sum(emb * mask[..., None], axis=1)
    denom = jnp.maximum(jnp.sum(mask, axis=1, keepdims=True), 1.0)
    mean_hidden = summed / denom
    pooled_ref = jnp.tanh(
        jnp.dot(mean_hidden.astype(jnp.bfloat16), pw_bf16,
                preferred_element_type=jnp.float32) + pb_row)
    h_ref = jnp.maximum(
        jnp.dot(pooled_ref.astype(jnp.bfloat16), w1_bf16,
                preferred_element_type=jnp.float32) + b1, 0.0)
    logits_ref = jnp.dot(h_ref.astype(jnp.bfloat16), w2_t.astype(jnp.bfloat16),
                         preferred_element_type=jnp.float32) + b2
    ref = jax.nn.log_softmax(logits_ref, axis=1)

    assert log_probs.shape == (B, NCLS)
    assert jnp.allclose(log_probs, ref, atol=2e-2, rtol=0.0), (
        float(jnp.max(jnp.abs(log_probs - ref))))

    print("KERNEL_OK")
</pallas_src>

<mosaic_0001>
module attributes {stable_mosaic.version = 11 : i64} {
  func.func @fused_head_kernel(%arg0: memref<8x16x768xf32, #tpu.memory_space<vmem>>, %arg1: memref<8x16xf32, #tpu.memory_space<vmem>>, %arg2: memref<768x768xbf16, #tpu.memory_space<vmem>>, %arg3: memref<1x768xf32, #tpu.memory_space<vmem>>, %arg4: memref<768x512xbf16, #tpu.memory_space<vmem>>, %arg5: memref<1x512xf32, #tpu.memory_space<vmem>>, %arg6: memref<512x128xbf16, #tpu.memory_space<vmem>>, %arg7: memref<1x128xf32, #tpu.memory_space<vmem>>, %arg8: memref<8x128xf32, #tpu.memory_space<vmem>>) attributes {dimension_semantics = [], scalar_prefetch = 0 : i64, scratch_operands = 0 : i64, tpu.core_type = #tpu.core_type<tc>} {
    %c0 = arith.constant 0 : index
    %c0_0 = arith.constant 0 : index
    %c0_1 = arith.constant 0 : index
    %0 = vector.load %arg0[%c0, %c0_0, %c0_1] : memref<8x16x768xf32, #tpu.memory_space<vmem>>, vector<8x16x768xf32>
    %c0_2 = arith.constant 0 : index
    %c0_3 = arith.constant 0 : index
    %1 = vector.load %arg1[%c0_2, %c0_3] : memref<8x16xf32, #tpu.memory_space<vmem>>, vector<8x16xf32>
    %2 = vector.shape_cast %1 : vector<8x16xf32> to vector<8x16x1xf32>
    %3 = vector.broadcast %2 : vector<8x16x1xf32> to vector<8x16x768xf32>
    %4 = arith.mulf %0, %3 : vector<8x16x768xf32>
    %cst = arith.constant dense<0.000000e+00> : vector<8x768xf32>
    %5 = vector.multi_reduction <add>, %4, %cst [1] : vector<8x16x768xf32> to vector<8x768xf32>
    %cst_4 = arith.constant dense<0.000000e+00> : vector<8xf32>
    %6 = vector.multi_reduction <add>, %1, %cst_4 [1] : vector<8x16xf32> to vector<8xf32>
    %7 = vector.shape_cast %6 : vector<8xf32> to vector<8x1xf32>
    %cst_5 = arith.constant 1.000000e+00 : f32
    %8 = vector.broadcast %cst_5 : f32 to vector<8x1xf32>
    %9 = arith.maximumf %7, %8 : vector<8x1xf32>
    %10 = vector.broadcast %9 : vector<8x1xf32> to vector<8x768xf32>
    %11 = arith.divf %5, %10 : vector<8x768xf32>
    %12 = arith.truncf %11 : vector<8x768xf32> to vector<8x768xbf16>
    %c0_6 = arith.constant 0 : index
    %c0_7 = arith.constant 0 : index
    %13 = vector.load %arg2[%c0_6, %c0_7] : memref<768x768xbf16, #tpu.memory_space<vmem>>, vector<768x768xbf16>
    %cst_8 = arith.constant dense<0.000000e+00> : vector<8x768xf32>
    %14 = tpu.matmul %12, %13, %cst_8 {dimension_numbers = #tpu.dot_dimension_numbers<[1], [0], [0], [1], [0, 0, 1, 1], [], []>} : vector<8x768xbf16>, vector<768x768xbf16>, vector<8x768xf32> -> vector<8x768xf32>
    %c0_9 = arith.constant 0 : index
    %c0_10 = arith.constant 0 : index
    %15 = vector.load %arg3[%c0_9, %c0_10] : memref<1x768xf32, #tpu.memory_space<vmem>>, vector<1x768xf32>
    %16 = vector.broadcast %15 : vector<1x768xf32> to vector<8x768xf32>
    %17 = arith.addf %14, %16 : vector<8x768xf32>
    %18 = math.tanh %17 : vector<8x768xf32>
    %19 = arith.truncf %18 : vector<8x768xf32> to vector<8x768xbf16>
    %c0_11 = arith.constant 0 : index
    %c0_12 = arith.constant 0 : index
    %20 = vector.load %arg4[%c0_11, %c0_12] : memref<768x512xbf16, #tpu.memory_space<vmem>>, vector<768x512xbf16>
    %cst_13 = arith.constant dense<0.000000e+00> : vector<8x512xf32>
    %21 = tpu.matmul %19, %20, %cst_13 {dimension_numbers = #tpu.dot_dimension_numbers<[1], [0], [0], [1], [0, 0, 1, 1], [], []>} : vector<8x768xbf16>, vector<768x512xbf16>, vector<8x512xf32> -> vector<8x512xf32>
    %c0_14 = arith.constant 0 : index
    %c0_15 = arith.constant 0 : index
    %22 = vector.load %arg5[%c0_14, %c0_15] : memref<1x512xf32, #tpu.memory_space<vmem>>, vector<1x512xf32>
    %23 = vector.broadcast %22 : vector<1x512xf32> to vector<8x512xf32>
    %24 = arith.addf %21, %23 : vector<8x512xf32>
    %cst_16 = arith.constant 0.000000e+00 : f32
    %25 = vector.broadcast %cst_16 : f32 to vector<8x512xf32>
    %26 = arith.maximumf %24, %25 : vector<8x512xf32>
    %27 = arith.truncf %26 : vector<8x512xf32> to vector<8x512xbf16>
    %c0_17 = arith.constant 0 : index
    %c0_18 = arith.constant 0 : index
    %28 = vector.load %arg6[%c0_17, %c0_18] : memref<512x128xbf16, #tpu.memory_space<vmem>>, vector<512x128xbf16>
    %cst_19 = arith.constant dense<0.000000e+00> : vector<8x128xf32>
    %29 = tpu.matmul %27, %28, %cst_19 {dimension_numbers = #tpu.dot_dimension_numbers<[1], [0], [0], [1], [0, 0, 1, 1], [], []>} : vector<8x512xbf16>, vector<512x128xbf16>, vector<8x128xf32> -> vector<8x128xf32>
    %c0_20 = arith.constant 0 : index
    %c0_21 = arith.constant 0 : index
    %30 = vector.load %arg7[%c0_20, %c0_21] : memref<1x128xf32, #tpu.memory_space<vmem>>, vector<1x128xf32>
    %31 = vector.broadcast %30 : vector<1x128xf32> to vector<8x128xf32>
    %32 = arith.addf %29, %31 : vector<8x128xf32>
    %33 = vector.extract_strided_slice %32 {offsets = [0, 0], sizes = [8, 1], strides = [1, 1]} : vector<8x128xf32> to vector<8x1xf32>
    %34 = vector.extract_strided_slice %32 {offsets = [0, 1], sizes = [8, 1], strides = [1, 1]} : vector<8x128xf32> to vector<8x1xf32>
    %35 = arith.maximumf %33, %34 : vector<8x1xf32>
    %36 = arith.subf %34, %33 : vector<8x1xf32>
    %37 = math.absf %36 : vector<8x1xf32>
    %cst_22 = arith.constant 0.000000e+00 : f32
    %38 = vector.broadcast %cst_22 : f32 to vector<8x1xf32>
    %39 = arith.subf %38, %37 : vector<8x1xf32>
    %40 = math.exp %39 : vector<8x1xf32>
    %41 = math.log1p %40 : vector<8x1xf32>
    %42 = arith.addf %35, %41 : vector<8x1xf32>
    %43 = vector.broadcast %42 : vector<8x1xf32> to vector<8x128xf32>
    %44 = arith.subf %32, %43 : vector<8x128xf32>
    %c0_23 = arith.constant 0 : index
    %c0_24 = arith.constant 0 : index
    %45 = vector.load %arg8[%c0_23, %c0_24] : memref<8x128xf32, #tpu.memory_space<vmem>>, vector<8x128xf32>
    tpu.vector_store %arg8[%c0_23, %c0_24], %44 {strides = array<i32>} : memref<8x128xf32, #tpu.memory_space<vmem>>, vector<8x128xf32>,
    return
  }
}

</mosaic_0001>

<bundles_post_ra>
// kernel: tpu_custom_call.1
= control target key start
LH: loop header
LB: loop body
LE: loop exit
PB: predicated region body
PF: predicated region fallthrough
CT: control target
= control target key end

     0   :  { %13 = vsyncpa [#allocation3], 0  ;;  %s7162_s0 = inlined_call_operand.hbm [shape: f32[8,16,768], index: 0, kind: input, shape index: {}]   ;;  %s7163_s1 = inlined_call_operand.hbm [shape: f32[8,16], index: 1, kind: input, shape index: {}]   ;;  %s7164_s2 = inlined_call_operand.hbm [shape: bf16[768,768], index: 2, kind: input, shape index: {}]   ;;  %s7165_s3 = inlined_call_operand.hbm [shape: f32[1,768], index: 3, kind: input, shape index: {}]   ;;  %s7166_s4 = inlined_call_operand.hbm [shape: bf16[768,512], index: 4, kind: input, shape index: {}]   ;;  %s7167_s5 = inlined_call_operand.hbm [shape: f32[1,512], index: 5, kind: input, shape index: {}]   ;;  %s7168_s6 = inlined_call_operand.hbm [shape: bf16[512,128], index: 6, kind: input, shape index: {}]   ;;  %s7169_s7 = inlined_call_operand.hbm [shape: f32[1,128], index: 7, kind: input, shape index: {}]   ;;  %s7170_s8 = inlined_call_operand.hbm [shape: f32[8,128], index: 8, kind: output, shape index: {}]  }
   0x1   :  { %14 = vsyncpa [#allocation6], 0 }
   0x2   :  { %15 = vsyncpa [#allocation9], 0 }
   0x3   :  { %16 = vsyncpa [#allocation12], 0 }
   0x4   :  { %17 = vsyncpa [#allocation15], 0 }
   0x5   :  { %18 = vsyncpa [#allocation4], 0  ;;  %s6593_s27 = smov [#allocation5]   ;;  %s6594_s29 = smov [#allocation8]  }
   0x6   :  { %s37_s28 = sshll.u32 %s6593_s27, 4  ;;  %s59_s30 = sshll.u32 %s6594_s29, 4  ;;  %s38_s28 = int_to_ptr.vmem [resolvable:$true] %s37_s28  ;;  %s60_s30 = int_to_ptr.vmem [resolvable:$true] %s59_s30 }
   0x7   :  { %s6409_s9 = scalar_lea.vmem %s38_s28, 128  ;;  %p6414_p1 = scmp.lt.s32.totalorder %s38_s28, %s38_s28 }
   0x8   :  { %p6410_p0 = scmp.ne.s32.totalorder %s38_s28, %s6409_s9  ;;  %p6415_p2 = scmp.lt.s32.totalorder %s6409_s9, %s6409_s9 }
   0xa   :  { %p6416_p3 = por %p6415_p2, %p6414_p1 }
   0xc   :  { %p6417_p4 = pnand %p6416_p3, %p6410_p0 }
   0xe   :  { %6420 = shalt.err (!%p6417_p4)
}
   0xf   :  { %40 = dma.hbm_to_vmem [thread:$0]  %s7163_s1, 128, %s38_s28, [#allocation6]  }
  0x10   :  { %s6429_s12 = scalar_lea.vmem %s60_s30, 96  ;;  %p6434_p6 = scmp.lt.s32.totalorder %s60_s30, %s60_s30 }
  0x11   :  { %p6430_p5 = scmp.ne.s32.totalorder %s60_s30, %s6429_s12  ;;  %p6435_p7 = scmp.lt.s32.totalorder %s6429_s12, %s6429_s12 }
  0x13   :  { %p6436_p8 = por %p6435_p7, %p6434_p6 }
  0x15   :  { %p6437_p9 = pnand %p6436_p8, %p6430_p5 }
  0x17   :  { %6440 = shalt.err (!%p6437_p9)
}
  0x18   :  { %62 = dma.hbm_to_vmem [thread:$0]  %s7165_s3, 96, %s60_s30, [#allocation9]  }
  0x19   :  { %s6595_s15 = smov [#allocation11]   ;;  %s6596_s17 = smov [#allocation2]  }
  0x1a   :  { %s81_s16 = sshll.u32 %s6595_s15, 4  ;;  %s24_s18 = sshll.u32 %s6596_s17, 4  ;;  %s82_s16 = int_to_ptr.vmem [resolvable:$true] %s81_s16  ;;  %s25_s18 = int_to_ptr.vmem [resolvable:$true] %s24_s18 }
  0x1b   :  { %s6449_s19 = scalar_lea.vmem %s82_s16, 64  ;;  %p6454_p11 = scmp.lt.s32.totalorder %s82_s16, %s82_s16 }
  0x1c   :  { %p6450_p10 = scmp.ne.s32.totalorder %s82_s16, %s6449_s19  ;;  %p6455_p12 = scmp.lt.s32.totalorder %s6449_s19, %s6449_s19 }
  0x1e   :  { %p6456_p13 = por %p6455_p12, %p6454_p11 }
  0x20   :  { %p6457_p0 = pnand %p6456_p13, %p6450_p10 }
  0x22   :  { %6460 = shalt.err (!%p6457_p0)
}
  0x23   :  { %84 = dma.hbm_to_vmem [thread:$0]  %s7167_s5, 64, %s82_s16, [#allocation12]  }
  0x24   :  { %s6469_s21 = scalar_lea.vmem %s25_s18, 12288  ;;  %p6474_p2 = scmp.lt.s32.totalorder %s25_s18, %s25_s18 }
  0x25   :  { %p6470_p1 = scmp.ne.s32.totalorder %s25_s18, %s6469_s21  ;;  %p6475_p3 = scmp.lt.s32.totalorder %s6469_s21, %s6469_s21 }
  0x27   :  { %p6476_p4 = por %p6475_p3, %p6474_p2 }
  0x29   :  { %p6477_p5 = pnand %p6476_p4, %p6470_p1 }
  0x2b   :  { %6480 = shalt.err (!%p6477_p5)
}
  0x2c   :  { %s6597_s3 = smov 768   ;;  %s6598_s22 = smov 48  }
  0x2d   :  { %30 = dma.hbm_to_vmem [thread:$0]  %s7162_s0, 12288, %s25_s18, [#allocation3], %s6597_s3, %s6597_s3, %s6598_s22  }
  0x2e   :  { %s6599_s25 = smov [#allocation7]  }
  0x2f   :  { %s46_s26 = sshll.u32 %s6599_s25, 4  ;;  %s47_s26 = int_to_ptr.vmem [resolvable:$true] %s46_s26 }
  0x30   :  { %s6489_s27 = scalar_lea.vmem %s47_s26, 36864  ;;  %p6494_p7 = scmp.lt.s32.totalorder %s47_s26, %s47_s26 }
  0x31   :  { %p6490_p6 = scmp.ne.s32.totalorder %s47_s26, %s6489_s27  ;;  %p6495_p8 = scmp.lt.s32.totalorder %s6489_s27, %s6489_s27 }
  0x33   :  { %p6496_p9 = por %p6495_p8, %p6494_p7 }
  0x35   :  { %p6497_p10 = pnand %p6496_p9, %p6490_p6 }
  0x37   :  { %6500 = shalt.err (!%p6497_p10)
}
  0x38   :  { %s6600_s5 = smov 384   ;;  %s6601_s28 = smov 24  }
  0x39   :  { %52 = dma.hbm_to_vmem [thread:$0]  %s7164_s2, 36864, %s47_s26, [#allocation6], %s6600_s5, %s6600_s5, %s6601_s28  }
  0x3a   :  { %s6602_s9 = smov [#allocation10]  }
  0x3b   :  { %s68_s10 = sshll.u32 %s6602_s9, 4  ;;  %s69_s10 = int_to_ptr.vmem [resolvable:$true] %s68_s10 }
  0x3c   :  { %s6509_s0 = scalar_lea.vmem %s69_s10, 24576  ;;  %p6514_p12 = scmp.lt.s32.totalorder %s69_s10, %s69_s10 }
  0x3d   :  { %p6510_p11 = scmp.ne.s32.totalorder %s69_s10, %s6509_s0  ;;  %p6515_p13 = scmp.lt.s32.totalorder %s6509_s0, %s6509_s0 }
  0x3f   :  { %p6516_p0 = por %p6515_p13, %p6514_p12 }
  0x41   :  { %p6517_p1 = pnand %p6516_p0, %p6510_p11 }
  0x43   :  { %6520 = shalt.err (!%p6517_p1)
}
  0x44   :  { %s6603_s11 = smov 256   ;;  %s6604_s12 = smov 16  }
  0x45   :  { %74 = dma.hbm_to_vmem [thread:$0]  %s7166_s4, 24576, %s69_s10, [#allocation9], %s6603_s11, %s6603_s11, %s6604_s12  }
  0x46   :  { %s6605_s15 = smov [#allocation13]  }
  0x47   :  { %s90_s16 = sshll.u32 %s6605_s15, 4  ;;  %s91_s16 = int_to_ptr.vmem [resolvable:$true] %s90_s16 }
  0x48   :  { %s6529_s2 = scalar_lea.vmem %s91_s16, 4096  ;;  %p6534_p3 = scmp.lt.s32.totalorder %s91_s16, %s91_s16 }
  0x49   :  { %p6530_p2 = scmp.ne.s32.totalorder %s91_s16, %s6529_s2  ;;  %p6535_p4 = scmp.lt.s32.totalorder %s6529_s2, %s6529_s2 }
  0x4b   :  { %p6536_p5 = por %p6535_p4, %p6534_p3 }
  0x4d   :  { %p6537_p6 = pnand %p6536_p5, %p6530_p2 }
  0x4f   :  { %6540 = shalt.err (!%p6537_p6)
}
  0x50   :  { %s6606_s17 = smov 64   ;;  %s6607_s18 = smov 4  }
  0x51   :  { %96 = dma.hbm_to_vmem [thread:$0]  %s7168_s6, 4096, %s91_s16, [#allocation12], %s6606_s17, %s6606_s17, %s6607_s18  }
  0x52   :  { %s6608_s20 = smov [#allocation14]  }
  0x53   :  { %s103_s21 = sshll.u32 %s6608_s20, 4  ;;  %s104_s21 = int_to_ptr.vmem [resolvable:$true] %s103_s21 }
  0x54   :  { %s6549_s4 = scalar_lea.vmem %s104_s21, 16  ;;  %s6553_s3 = scalar_lea.vmem %s104_s21, 32 }
  0x55   :  { %p6550_p7 = scmp.ne.s32.totalorder %s104_s21, %s6549_s4  ;;  %p6554_p8 = scmp.lt.s32.totalorder %s104_s21, %s104_s21 }
  0x56   :  { %p6555_p9 = scmp.lt.s32.totalorder %s6553_s3, %s6549_s4 }
  0x58   :  { %p6556_p10 = por %p6555_p9, %p6554_p8 }
  0x5a   :  { %p6557_p11 = pnand %p6556_p10, %p6550_p7 }
  0x5c   :  { %6560 = shalt.err (!%p6557_p11)
}
  0x5d   :  { %106 = dma.hbm_to_vmem [thread:$0]  %s7169_s7, 16, %s104_s21, [#allocation15]  }
  0x5e   :  { %6581 = dma.done.wait [#allocation3], 12288  }
  0x5f   :  { %6582 = vsyncadd [#allocation3], 4294955008 }
  0x60   :  { %6583 = dma.done.wait [#allocation6], 36992  }
  0x61   :  { %6584 = vsyncadd [#allocation6], 4294930304 }
  0x62   :  { %6585 = dma.done.wait [#allocation9], 24672  }
  0x63   :  { %6586 = vsyncadd [#allocation9], 4294942624 }
  0x64   :  { %6587 = dma.done.wait [#allocation12], 4160  }
  0x65   :  { %6588 = vsyncadd [#allocation12], 4294963136 }
  0x66   :  { %6589 = dma.done.wait [#allocation15], 16  }
  0x67   :  { %6590 = vsyncadd [#allocation15], 4294967280  ;;  %v229_v0 = vlaneseq  ;;  %vm749_vm0 = vcmask 130048   ;;  %v6690_v4 = vld [vmem:[#allocation5] sm:$0xff]  ;;  %v5617_v8 = vld [vmem:[#allocation7 + $0x154] ss:$24 sps:$4 sm:$0xff]  }
  0x68   :  { %v750_v5 = vsel %vm749_vm0, %v6690_v4, 0.0  ;;  %v5619_v9 = vld [vmem:[#allocation7 + $0x454] ss:$24 sps:$4 sm:$0xff]   ;;  %v5621_v10 = vld [vmem:[#allocation7 + $0x150] ss:$24 sps:$4 sm:$0xff]   ;;  %2833 = vmatprep.subr.bf16.mxu0 %v5617_v8  ;;  %vm1291_vm1 = vcmask 1041409  }
  0x69   :  { %v6682_v1 = vshrl.u32 %v229_v0, 7  ;;  %751 = vadd.xlane.f32.xlu0 %v750_v5  ;;  %v5622_v11 = vld [vmem:[#allocation7 + $0x450] ss:$24 sps:$4 sm:$0xff]   ;;  %2874 = vmatprep.subr.bf16.mxu1 %v5619_v9  ;;  %v5623_v13 = vld [vmem:[#allocation7 + $0x124] ss:$24 sps:$4 sm:$0xff]   ;;  %vm1294_vm2 = vcmask 1042434  }
  0x6a   :  { %2834 = vmatpush1.bf16.msra.mxu0 %v5621_v10  ;;  %2875 = vmatpush1.bf16.msra.mxu1 %v5622_v11  ;;  %v5625_v14 = vld [vmem:[#allocation7 + $0x424] ss:$24 sps:$4 sm:$0xff]   ;;  %v5627_v16 = vld [vmem:[#allocation7 + $0x120] ss:$24 sps:$4 sm:$0xff]   ;;  %v5629_v19 = vld [vmem:[#allocation7 + $0xf4] ss:$24 sps:$4 sm:$0xff]  }
  0x6b   :  { %7191 = vst [vmem:[#allocation23_spill] sm:$0xff] %v6682_v1  ;;  %v6685_v2 = vsub.s32 1, %v6682_v1  ;;  %v6688_v3 = vsub.s32 2, %v6682_v1  ;;  %v6698_v12 = vsub.s32 0, %v6682_v1  ;;  %2835 = vmatprep.subr.bf16.mxu0 %v5623_v13  ;;  %v5628_v17 = vld [vmem:[#allocation7 + $0x420] ss:$24 sps:$4 sm:$0xff]   ;;  %2876 = vmatprep.subr.bf16.mxu1 %v5625_v14 }
  0x6c   :  { %v6703_v18 = vsub.s32 3, %v6682_v1  ;;  %v5631_v20 = vld [vmem:[#allocation7 + $0x3f4] ss:$24 sps:$4 sm:$0xff]   ;;  %v5633_v21 = vld [vmem:[#allocation7 + $0xf0] ss:$24 sps:$4 sm:$0xff]   ;;  %v7172_v24 = vsub.s32 4, %v6682_v1 }
  0x6d   :  { %7192 = vst [vmem:[#allocation24_spill] sm:$0xff] %v6685_v2  ;;  %7193 = vst [vmem:[#allocation25_spill] sm:$0xff] %v6688_v3  ;;  %v243_v6 = vrot.slane %v6690_v4, %v6685_v2  ;;  %v254_v7 = vrot.slane %v6690_v4, %v6688_v3  ;;  %v232_v15 = vrot.slane %v6690_v4, %v6698_v12  ;;  %v5634_v22 = vld [vmem:[#allocation7 + $0x3f0] ss:$24 sps:$4 sm:$0xff]   ;;  %v5635_v25 = vld [vmem:[#allocation7 + $0xc4] ss:$24 sps:$4 sm:$0xff]  }
  0x6e   :  { %7194 = vst [vmem:[#allocation26_spill] sm:$0xff] %v6698_v12  ;;  %2836 = vmatpush1.bf16.msra.mxu0 %v5627_v16  ;;  %2877 = vmatpush1.bf16.msra.mxu1 %v5628_v17  ;;  %7195 = vst [vmem:[#allocation27_spill] sm:$0xff] %v6703_v18  ;;  %v265_v23 = vrot.slane %v6690_v4, %v6703_v18  ;;  %v5637_v26 = vld [vmem:[#allocation7 + $0x3c4] ss:$24 sps:$4 sm:$0xff]   ;;  %v5639_v27 = vld [vmem:[#allocation7 + $0xc0] ss:$24 sps:$4 sm:$0xff]   ;;  %v276_v30 = vrot.slane %v6690_v4, %v7172_v24 }
  0x6f   :  { %249 = vbcast.lane.b32.xlu1 %v243_v6, 264  ;;  %2837 = vmatprep.subr.bf16.mxu0 %v5629_v19  ;;  %v5640_v28 = vld [vmem:[#allocation7 + $0x3c0] ss:$24 sps:$4 sm:$0xff]   ;;  %v5641_v29 = vld [vmem:[#allocation7 + $0x94] ss:$24 sps:$4 sm:$0xff]   ;;  %v7171_v31 = vsub.s32 5, %v6682_v1 }
  0x70   :  { %2878 = vmatprep.subr.bf16.mxu1 %v5631_v20  ;;  %v5643_v32 = vld [vmem:[#allocation7 + $0x394] ss:$24 sps:$4 sm:$0xff]   ;;  %v297_v34 = vsub.s32 6, %v6682_v1  ;;  %v5645_v35 = vld [vmem:[#allocation7 + $0x90] ss:$24 sps:$4 sm:$0xff]   ;;  %v308_v38 = vsub.s32 7, %v6682_v1 }
  0x71   :  { %v287_v33 = vrot.slane %v6690_v4, %v7171_v31  ;;  %v5646_v36 = vld [vmem:[#allocation7 + $0x390] ss:$24 sps:$4 sm:$0xff]   ;;  %v5647_v39 = vld [vmem:[#allocation7 + $0x64] ss:$24 sps:$4 sm:$0xff]   ;;  %v5651_v42 = vld [vmem:[#allocation7 + $0x60] ss:$24 sps:$4 sm:$0xff]  }
  0x72   :  { %2838 = vmatpush1.bf16.msra.mxu0 %v5633_v21  ;;  %2879 = vmatpush1.bf16.msra.mxu1 %v5634_v22  ;;  %v298_v37 = vrot.slane %v6690_v4, %v297_v34  ;;  %v5649_v40 = vld [vmem:[#allocation7 + $0x364] ss:$24 sps:$4 sm:$0xff]   ;;  %v309_v41 = vrot.slane %v6690_v4, %v308_v38  ;;  %v5652_v43 = vld [vmem:[#allocation7 + $0x360] ss:$24 sps:$4 sm:$0xff]   ;;  %v5653_v44 = vld [vmem:[#allocation7 + $0x34] ss:$24 sps:$4 sm:$0xff]  }
  0x73   :  { %256 = vbcast.lane.b32.xlu1 %v254_v7, 256  ;;  %2839 = vmatprep.subr.bf16.mxu0 %v5635_v25  ;;  %v5655_v45 = vld [vmem:[#allocation7 + $0x334] ss:$24 sps:$4 sm:$0xff]   ;;  %v5657_v46 = vld [vmem:[#allocation7 + $0x30] ss:$24 sps:$4 sm:$0xff]   ;;  %v164_v38 = vld [vmem:[#allocation2 + $0x100] sm:$0xff] }
  0x74   :  { %2880 = vmatprep.subr.bf16.mxu1 %v5637_v26  ;;  %v5658_v47 = vld [vmem:[#allocation7 + $0x330] ss:$24 sps:$4 sm:$0xff]   ;;  %v5659_v48 = vld [vmem:[#allocation7 + $0x4] ss:$24 sps:$4 sm:$0xff]   ;;  %v5663_v50 = vld [vmem:[#allocation7] ss:$24 sps:$4 sm:$0xff]  }
  0x75   :  { %v5661_v49 = vld [vmem:[#allocation7 + $0x304] ss:$24 sps:$4 sm:$0xff]   ;;  %v5664_v51 = vld [vmem:[#allocation7 + $0x300] ss:$24 sps:$4 sm:$0xff]   ;;  %v5665_v52 = vld [vmem:[#allocation7 + $0x2d4] ss:$24 sps:$4 sm:$0xff]  }
  0x76   :  { %2840 = vmatpush1.bf16.msra.mxu0 %v5639_v27  ;;  %2881 = vmatpush1.bf16.msra.mxu1 %v5640_v28  ;;  %v5667_v53 = vld [vmem:[#allocation7 + $0x5d4] ss:$24 sps:$4 sm:$0xff]   ;;  %v5669_v54 = vld [vmem:[#allocation7 + $0x2d0] ss:$24 sps:$4 sm:$0xff]   ;;  %v5671_v56 = vld [vmem:[#allocation7 + $0x2a4] ss:$24 sps:$4 sm:$0xff]  }
  0x77   :  { %260 = vbcast.lane.b32.xlu1 %v254_v7, 264  ;;  %2841 = vmatprep.subr.bf16.mxu0 %v5641_v29  ;;  %v5670_v55 = vld [vmem:[#allocation7 + $0x5d0] ss:$24 sps:$4 sm:$0xff]   ;;  %v5673_v57 = vld [vmem:[#allocation7 + $0x5a4] ss:$24 sps:$4 sm:$0xff]   ;;  %vm1297_vm3 = vcmask 1043459  }
  0x78   :  { %2882 = vmatprep.subr.bf16.mxu1 %v5643_v32  ;;  %v5675_v58 = vld [vmem:[#allocation7 + $0x2a0] ss:$24 sps:$4 sm:$0xff]   ;;  %v5677_v60 = vld [vmem:[#allocation7 + $0x274] ss:$24 sps:$4 sm:$0xff]   ;;  %v5681_v62 = vld [vmem:[#allocation7 + $0x270] ss:$24 sps:$4 sm:$0xff]  }
  0x79   :  { %v5676_v59 = vld [vmem:[#allocation7 + $0x5a0] ss:$24 sps:$4 sm:$0xff]   ;;  %v5679_v61 = vld [vmem:[#allocation7 + $0x574] ss:$24 sps:$4 sm:$0xff]   ;;  %v5682_v63 = vld [vmem:[#allocation7 + $0x570] ss:$24 sps:$4 sm:$0xff]  }
  0x7a   :  { %2842 = vmatpush1.bf16.msra.mxu0 %v5645_v35  ;;  %2883 = vmatpush1.bf16.msra.mxu1 %v5646_v36  ;;  %v5683_v0 = vld [vmem:[#allocation7 + $0x244] ss:$24 sps:$4 sm:$0xff]   ;;  %v5687_v5 = vld [vmem:[#allocation7 + $0x240] ss:$24 sps:$4 sm:$0xff]   ;;  %v5689_v7 = vld [vmem:[#allocation7 + $0x214] ss:$24 sps:$4 sm:$0xff]  }
  0x7b   :  { %234 = vbcast.lane.b32.xlu1 %v232_v15, 256  ;;  %2843 = vmatprep.subr.bf16.mxu0 %v5647_v39  ;;  %v5685_v4 = vld [vmem:[#allocation7 + $0x544] ss:$24 sps:$4 sm:$0xff]   ;;  %v5691_v8 = vld [vmem:[#allocation7 + $0x514] ss:$24 sps:$4 sm:$0xff]   ;;  %vm1300_vm4 = vcmask 1044484  }
  0x7c   :  { %2884 = vmatprep.subr.bf16.mxu1 %v5649_v40  ;;  %v5693_v9 = vld [vmem:[#allocation7 + $0x210] ss:$24 sps:$4 sm:$0xff]   ;;  %v5695_v11 = vld [vmem:[#allocation7 + $0x1e4] ss:$24 sps:$4 sm:$0xff]   ;;  %v5699_v14 = vld [vmem:[#allocation7 + $0x1e0] ss:$24 sps:$4 sm:$0xff]  }
  0x7d   :  { %v5694_v10 = vld [vmem:[#allocation7 + $0x510] ss:$24 sps:$4 sm:$0xff]   ;;  %v5697_v13 = vld [vmem:[#allocation7 + $0x4e4] ss:$24 sps:$4 sm:$0xff]   ;;  %v5701_v16 = vld [vmem:[#allocation7 + $0x1b4] ss:$24 sps:$4 sm:$0xff]  }
  0x7e   :  { %2844 = vmatpush1.bf16.msra.mxu0 %v5651_v42  ;;  %2885 = vmatpush1.bf16.msra.mxu1 %v5652_v43  ;;  %v5703_v17 = vld [vmem:[#allocation7 + $0x4b4] ss:$24 sps:$4 sm:$0xff]   ;;  %v5705_v19 = vld [vmem:[#allocation7 + $0x1b0] ss:$24 sps:$4 sm:$0xff]   ;;  %v5707_v21 = vld [vmem:[#allocation7 + $0x184] ss:$24 sps:$4 sm:$0xff]  }
  0x7f   :  { %238 = vbcast.lane.b32.xlu1 %v232_v15, 264  ;;  %245 = vbcast.lane.b32.xlu0 %v243_v6, 256  ;;  %v5688_v6 = vld [vmem:[#allocation7 + $0x540] ss:$24 sps:$4 sm:$0xff]   ;;  %v5706_v20 = vld [vmem:[#allocation7 + $0x4b0] ss:$24 sps:$4 sm:$0xff]  }
  0x80   :  { %2845 = vmatprep.subr.bf16.mxu0 %v5653_v44  ;;  %2886 = vmatprep.subr.bf16.mxu1 %v5655_v45  ;;  %v5700_v15 = vld [vmem:[#allocation7 + $0x4e0] ss:$24 sps:$4 sm:$0xff]   ;;  %v5709_v22 = vld [vmem:[#allocation7 + $0x484] ss:$24 sps:$4 sm:$0xff]   ;;  %v150_v27 = vld [vmem:[#allocation2 + $0x90] sm:$0xff]  ;;  %vm1303_vm5 = vcmask 1045509  }
  0x81   :  { %v5712_v25 = vld [vmem:[#allocation7 + $0x480] ss:$24 sps:$4 sm:$0xff]   ;;  %v151_v28 = vld [vmem:[#allocation2 + $0x98] sm:$0xff]  ;;  %v162_v36 = vld [vmem:[#allocation2 + $0xf0] sm:$0xff]  ;;  %vm1306_vm6 = vcmask 1046534   ;;  %vm1309_vm7 = vcmask 1047559  }
  0x82   :  { %2846 = vmatpush1.bf16.msra.mxu0 %v5657_v46  ;;  %2887 = vmatpush1.bf16.msra.mxu1 %v5658_v47  ;;  %v152_v29 = vld [vmem:[#allocation2 + $0xa0] sm:$0xff]  ;;  %v157_v32 = vld [vmem:[#allocation2 + $0xc8] sm:$0xff]  ;;  %v159_v34 = vld [vmem:[#allocation2 + $0xd8] sm:$0xff]  ;;  %s6609_s6 = smov 127   ;;  %s6610_s7 = smov 1  }
  0x83   :  { %267 = vbcast.lane.b32.xlu1 %v265_v23, 256  ;;  %278 = vbcast.lane.b32.xlu0 %v276_v30, 256  ;;  %v165_v39 = vld [vmem:[#allocation2 + $0x108] sm:$0xff]  ;;  %v160_v40 = vld [vmem:[#allocation2 + $0xe0] sm:$0xff]  ;;  %v166_v42 = vld [vmem:[#allocation2 + $0x110] sm:$0xff]  ;;  %s6612_s24 = smov [#allocation16]  }
  0x84   :  { %2847 = vmatprep.subr.bf16.mxu0 %v5659_v48  ;;  %2888 = vmatprep.subr.bf16.mxu1 %v5661_v49  ;;  %v167_v43 = vld [vmem:[#allocation2 + $0x118] sm:$0xff]  ;;  %v153_v44 = vld [vmem:[#allocation2 + $0xa8] sm:$0xff]  ;;  %v154_v45 = vld [vmem:[#allocation2 + $0xb0] sm:$0xff]  ;;  %s5025_s25 = sshll.u32 %s6612_s24, 4  ;;  %s5026_s25 = int_to_ptr.vmem [resolvable:$true] %s5025_s25 }
  0x85   :  { %v188_v1 = vld [vmem:[#allocation2 + $0x1c0] sm:$0xff]  ;;  %v189_v2 = vld [vmem:[#allocation2 + $0x1c8] sm:$0xff]  ;;  %v190_v12 = vld [vmem:[#allocation2 + $0x1d0] sm:$0xff]  ;;  %s6561_s26 = scalar_lea.vmem %s5026_s25, 128  ;;  %p6566_p13 = scmp.lt.s32.totalorder %s5026_s25, %s5026_s25 }
  0x86   :  { %2848 = vmatpush1.bf16.msra.mxu0 %v5663_v50  ;;  %2889 = vmatpush1.bf16.msra.mxu1 %v5664_v51  ;;  %p6562_p12 = scmp.ne.s32.totalorder %s5026_s25, %s6561_s26  ;;  %p6567_p0 = scmp.lt.s32.totalorder %s6561_s26, %s6561_s26 }
  0x87   :  { %271 = vbcast.lane.b32.xlu1 %v265_v23, 264  ;;  %289 = vbcast.lane.b32.xlu0 %v287_v33, 256  ;;  %v5711_v23 = vld [vmem:[#allocation7 + $0x180] ss:$24 sps:$4 sm:$0xff]  }
  0x88   :  { %2849 = vmatprep.subr.bf16.mxu0 %v5665_v52  ;;  %2890 = vmatprep.subr.bf16.mxu1 %v5667_v53  ;;  %p6568_p1 = por %p6567_p0, %p6566_p13 }
  0x8a   :  { %2850 = vmatpush2.bf16.msra.mxu0 %v5669_v54  ;;  %2891 = vmatpush2.bf16.msra.mxu1 %v5670_v55  ;;  %v155_v54 = vld [vmem:[#allocation2 + $0xb8] sm:$0xff]  ;;  %p6569_p2 = pnand %p6568_p1, %p6562_p12 }
  0x8b   :  { %282 = vbcast.lane.b32.xlu1 %v276_v30, 264  ;;  %300 = vbcast.lane.b32.xlu0 %v298_v37, 256  ;;  %v156_v30 = vld [vmem:[#allocation2 + $0xc0] sm:$0xff] }
  0x8c   :  { %2851 = vmatprep.subr.bf16.mxu0 %v5671_v56  ;;  %2892 = vmatprep.subr.bf16.mxu1 %v5673_v57 }
  0x8e   :  { %2852 = vmatpush2.bf16.msra.mxu0 %v5675_v58  ;;  %2893 = vmatpush2.bf16.msra.mxu1 %v5676_v59  ;;  %v132_v59 = vld [vmem:[#allocation2] sm:$0xff] }
  0x8f   :  { %293 = vbcast.lane.b32.xlu1 %v287_v33, 264  ;;  %311 = vbcast.lane.b32.xlu0 %v309_v41, 256  ;;  %v158_v33 = vld [vmem:[#allocation2 + $0xd0] sm:$0xff] }
  0x90   :  { %2853 = vmatprep.subr.bf16.mxu0 %v5677_v60  ;;  %2894 = vmatprep.subr.bf16.mxu1 %v5679_v61 }
  0x92   :  { %2854 = vmatpush2.bf16.msra.mxu0 %v5681_v62  ;;  %2895 = vmatpush2.bf16.msra.mxu1 %v5682_v63 }
  0x93   :  { %304 = vbcast.lane.b32.xlu1 %v298_v37, 264  ;;  %2855 = vmatprep.subr.bf16.mxu0 %v5683_v0  ;;  %v163_v37 = vld [vmem:[#allocation2 + $0xf8] sm:$0xff] }
  0x94   :  { %2896 = vmatprep.subr.bf16.mxu1 %v5685_v4 }
  0x96   :  { %2856 = vmatpush2.bf16.msra.mxu0 %v5687_v5  ;;  %2897 = vmatpush2.bf16.msra.mxu1 %v5688_v6 }
  0x97   :  { %315 = vbcast.lane.b32.xlu1 %v309_v41, 264  ;;  %2857 = vmatprep.subr.bf16.mxu0 %v5689_v7  ;;  %v161_v41 = vld [vmem:[#allocation2 + $0xe8] sm:$0xff] }
  0x98   :  { %2898 = vmatprep.subr.bf16.mxu1 %v5691_v8  ;;  %v133_v7 = vld [vmem:[#allocation2 + $0x8] sm:$0xff]  ;;  %v134_v8 = vld [vmem:[#allocation2 + $0x10] sm:$0xff] }
  0x9a   :  { %2858 = vmatpush2.bf16.msra.mxu0 %v5693_v9  ;;  %2899 = vmatpush2.bf16.msra.mxu1 %v5694_v10  ;;  %v5715_v9 = vld [vmem:[#allocation7 + $0x754] ss:$24 sps:$4 sm:$0xff]  }
  0x9b   :  { %2859 = vmatprep.subr.bf16.mxu0 %v5695_v11  ;;  %2900 = vmatprep.subr.bf16.mxu1 %v5697_v13 }
  0x9e   :  { %2860 = vmatpush2.bf16.msra.mxu0 %v5699_v14  ;;  %2901 = vmatpush2.bf16.msra.mxu1 %v5700_v15 }
  0x9f   :  { %2861 = vmatprep.subr.bf16.mxu0 %v5701_v16  ;;  %2902 = vmatprep.subr.bf16.mxu1 %v5703_v17  ;;  %v5718_v16 = vld [vmem:[#allocation7 + $0x15c] ss:$24 sps:$4 sm:$0xff]  }
  0xa2   :  { %2862 = vmatpush2.bf16.msra.mxu0 %v5705_v19  ;;  %2903 = vmatpush2.bf16.msra.mxu1 %v5706_v20 }
  0xa3   :  { %2863 = vmatprep.subr.bf16.mxu0 %v5707_v21  ;;  %2904 = vmatprep.subr.bf16.mxu1 %v5709_v22  ;;  %v135_v22 = vld [vmem:[#allocation2 + $0x18] sm:$0xff] }
  0xa6   :  { %2864 = vmatpush2.bf16.msra.mxu0 %v5711_v23  ;;  %2905 = vmatpush2.bf16.msra.mxu1 %v5712_v25  ;;  %v136_v23 = vld [vmem:[#allocation2 + $0x20] sm:$0xff] }
  0xa7   :  { %2915 = vmatprep.subr.bf16.mxu0 %v5715_v9  ;;  %2956 = vmatprep.subr.bf16.mxu1 %v5718_v16 }
  0xe1   :  { %v250_v26 = vpop.permute.xlu1 %249 }
  0xe2   :  { %v6719_v46 = vmul.f32 %v250_v26, %v150_v27  ;;  %v6721_v47 = vmul.f32 %v250_v26, %v151_v28  ;;  %v6723_v48 = vmul.f32 %v250_v26, %v152_v29  ;;  %v6725_v10 = vmul.f32 %v250_v26, %v153_v44 }
  0xe3   :  { %v6727_v11 = vmul.f32 %v250_v26, %v154_v45  ;;  %v6729_v25 = vmul.f32 %v250_v26, %v155_v54  ;;  %v140_v45 = vld [vmem:[#allocation2 + $0x40] sm:$0xff] }
  0xe5   :  { %v257_v35 = vpop.permute.xlu1 %256 }
  0xe6   :  { %v341_v49 = vmul.f32 %v257_v35, %v156_v30  ;;  %v342_v50 = vmul.f32 %v257_v35, %v157_v32  ;;  %v343_v51 = vmul.f32 %v257_v35, %v158_v33  ;;  %v344_v52 = vmul.f32 %v257_v35, %v159_v34 }
  0xe7   :  { %v345_v60 = vmul.f32 %v257_v35, %v160_v40  ;;  %v346_v61 = vmul.f32 %v257_v35, %v161_v41  ;;  %v138_v35 = vld [vmem:[#allocation2 + $0x30] sm:$0xff] }
  0xe9   :  { %v261_v53 = vpop.permute.xlu1 %260 }
  0xea   :  { %v347_v55 = vmul.f32 %v261_v53, %v162_v36  ;;  %v348_v56 = vmul.f32 %v261_v53, %v163_v37  ;;  %v349_v57 = vmul.f32 %v261_v53, %v164_v38  ;;  %v350_v58 = vmul.f32 %v261_v53, %v165_v39  ;;  %v139_v36 = vld [vmem:[#allocation2 + $0x38] sm:$0xff] }
  0xeb   :  { %v351_v62 = vmul.f32 %v261_v53, %v166_v42  ;;  %v352_v63 = vmul.f32 %v261_v53, %v167_v43 }
  0xec   :  { %v497_v0 = vadd.f32 %v347_v55, %v341_v49  ;;  %v504_v4 = vadd.f32 %v348_v56, %v342_v50  ;;  %v511_v5 = vadd.f32 %v349_v57, %v343_v51  ;;  %v518_v6 = vadd.f32 %v350_v58, %v344_v52  ;;  %v141_v49 = vld [vmem:[#allocation2 + $0x48] sm:$0xff] }
  0xed   :  { %v525_v13 = vadd.f32 %v351_v62, %v345_v60  ;;  %v532_v14 = vadd.f32 %v352_v63, %v346_v61  ;;  %v235_v15 = vpop.permute.xlu1 %234  ;;  %v137_v52 = vld [vmem:[#allocation2 + $0x28] sm:$0xff]  ;;  %v143_v60 = vld [vmem:[#allocation2 + $0x58] sm:$0xff] }
  0xee   :  { %v498_v17 = vrot.slane %v497_v0, 4  ;;  %v505_v19 = vrot.slane %v504_v4, 4  ;;  %v512_v20 = vrot.slane %v511_v5, 4  ;;  %v519_v21 = vrot.slane %v518_v6, 4 }
  0xef   :  { %v526_v27 = vrot.slane %v525_v13, 4  ;;  %v533_v28 = vrot.slane %v532_v14, 4  ;;  %v317_v29 = vmul.f32 %v235_v15, %v132_v59  ;;  %v318_v39 = vmul.f32 %v235_v15, %v133_v7  ;;  %v142_v59 = vld [vmem:[#allocation2 + $0x50] sm:$0xff] }
  0xf0   :  { %v499_v30 = vadd.f32 %v498_v17, %v497_v0  ;;  %v506_v32 = vadd.f32 %v505_v19, %v504_v4  ;;  %v513_v33 = vadd.f32 %v512_v20, %v511_v5  ;;  %v520_v34 = vadd.f32 %v519_v21, %v518_v6 }
  0xf1   :  { %v527_v37 = vadd.f32 %v526_v27, %v525_v13  ;;  %v534_v38 = vadd.f32 %v533_v28, %v532_v14  ;;  %v319_v40 = vmul.f32 %v235_v15, %v134_v8  ;;  %v239_v26 = vpop.permute.xlu1 %238  ;;  %v320_v53 = vmul.f32 %v235_v15, %v135_v22  ;;  %v168_v8 = vld [vmem:[#allocation2 + $0x120] sm:$0xff]  ;;  %v169_v22 = vld [vmem:[#allocation2 + $0x128] sm:$0xff] }
  0xf2   :  { %v500_v41 = vrot.slane %v499_v30, 2  ;;  %v507_v42 = vrot.slane %v506_v32, 2  ;;  %v514_v43 = vrot.slane %v513_v33, 2  ;;  %v521_v44 = vrot.slane %v520_v34, 2 }
  0xf3   :  { %v528_v50 = vrot.slane %v527_v37, 2  ;;  %v535_v51 = vrot.slane %v534_v38, 2  ;;  %v321_v54 = vmul.f32 %v235_v15, %v136_v23  ;;  %v323_v63 = vmul.f32 %v239_v26, %v138_v35  ;;  %v170_v23 = vld [vmem:[#allocation2 + $0x130] sm:$0xff] }
  0xf4   :  { %v501_v55 = vadd.f32 %v500_v41, %v499_v30  ;;  %v508_v56 = vadd.f32 %v507_v42, %v506_v32  ;;  %v515_v57 = vadd.f32 %v514_v43, %v513_v33  ;;  %v522_v58 = vadd.f32 %v521_v44, %v520_v34  ;;  %v172_v41 = vld [vmem:[#allocation2 + $0x140] sm:$0xff] }
  0xf5   :  { %v529_v61 = vadd.f32 %v528_v50, %v527_v37  ;;  %v536_v62 = vadd.f32 %v535_v51, %v534_v38  ;;  %v324_v0 = vmul.f32 %v239_v26, %v139_v36  ;;  %v325_v14 = vmul.f32 %v239_v26, %v140_v45  ;;  %v268_v37 = vpop.permute.xlu1 %267  ;;  %v171_v38 = vld [vmem:[#allocation2 + $0x138] sm:$0xff] }
  0xf6   :  { %v502_v4 = vrot.slane %v501_v55, 1  ;;  %v509_v5 = vrot.slane %v508_v56, 1  ;;  %v516_v6 = vrot.slane %v515_v57, 1  ;;  %v523_v7 = vrot.slane %v522_v58, 1 }
  0xf7   :  { %v530_v9 = vrot.slane %v529_v61, 1  ;;  %v537_v13 = vrot.slane %v536_v62, 1  ;;  %v326_v16 = vmul.f32 %v239_v26, %v141_v49  ;;  %v322_v21 = vmul.f32 %v235_v15, %v137_v52  ;;  %v173_v52 = vld [vmem:[#allocation2 + $0x148] sm:$0xff] }
  0xf8   :  { %v6731_v17 = vadd.f32 %v502_v4, %v501_v55  ;;  %v6733_v19 = vadd.f32 %v509_v5, %v508_v56  ;;  %v6735_v20 = vadd.f32 %v516_v6, %v515_v57  ;;  %v6737_v27 = vadd.f32 %v523_v7, %v522_v58  ;;  %v752_v58 = vpop.xlane.xlu0 %751 }
  0xf9   :  { %v6739_v28 = vadd.f32 %v530_v9, %v529_v61  ;;  %v327_v30 = vmul.f32 %v239_v26, %v142_v59  ;;  %v328_v32 = vmul.f32 %v239_v26, %v143_v60  ;;  %v413_v33 = vadd.f32 %v323_v63, %v317_v29  ;;  %v174_v59 = vld [vmem:[#allocation2 + $0x150] sm:$0xff]  ;;  %v272_v6 = vpop.permute.xlu1 %271 }
  0xfa   :  { %7196 = vst [vmem:[#allocation28_spill] sm:$0xff] %v6735_v20  ;;  %v420_v34 = vadd.f32 %v324_v0, %v318_v39  ;;  %v427_v35 = vadd.f32 %v325_v14, %v319_v40  ;;  %v434_v36 = vadd.f32 %v326_v16, %v320_v53  ;;  %v6741_v42 = vadd.f32 %v537_v13, %v536_v62 }
  0xfb   :  { %7197 = vst [vmem:[#allocation29_spill] sm:$0xff] %v6739_v28  ;;  %v441_v43 = vadd.f32 %v327_v30, %v321_v54  ;;  %v448_v44 = vadd.f32 %v328_v32, %v322_v21  ;;  %v6743_v15 = vmul.f32 %v268_v37, %v168_v8  ;;  %v414_v45 = vrot.slane %v413_v33, 4 }
  0xfc   :  { %7198 = vst [vmem:[#allocation30_spill] sm:$0xff] %v6741_v42  ;;  %v421_v49 = vrot.slane %v420_v34, 4  ;;  %v428_v50 = vrot.slane %v427_v35, 4  ;;  %v435_v51 = vrot.slane %v434_v36, 4  ;;  %v354_v29 = vmul.f32 %v268_v37, %v169_v22 }
  0xfd   :  { %v442_v55 = vrot.slane %v441_v43, 4  ;;  %v449_v26 = vrot.slane %v448_v44, 4  ;;  %v355_v39 = vmul.f32 %v268_v37, %v170_v23  ;;  %v415_v40 = vadd.f32 %v414_v45, %v413_v33  ;;  %v175_v33 = vld [vmem:[#allocation2 + $0x158] sm:$0xff]  ;;  %v178_v45 = vld [vmem:[#allocation2 + $0x170] sm:$0xff] }
  0xfe   :  { %v422_v53 = vadd.f32 %v421_v49, %v420_v34  ;;  %v429_v56 = vadd.f32 %v428_v50, %v427_v35  ;;  %v436_v57 = vadd.f32 %v435_v51, %v434_v36  ;;  %v356_v61 = vmul.f32 %v268_v37, %v171_v38  ;;  %v176_v34 = vld [vmem:[#allocation2 + $0x160] sm:$0xff] }
  0xff   :  { %v443_v60 = vadd.f32 %v442_v55, %v441_v43  ;;  %v450_v54 = vadd.f32 %v449_v26, %v448_v44  ;;  %v357_v62 = vmul.f32 %v268_v37, %v172_v41  ;;  %v416_v63 = vrot.slane %v415_v40, 2  ;;  %v177_v44 = vld [vmem:[#allocation2 + $0x168] sm:$0xff] }
 0x100   :  { %v423_v0 = vrot.slane %v422_v53, 2  ;;  %v430_v4 = vrot.slane %v429_v56, 2  ;;  %v437_v5 = vrot.slane %v436_v57, 2  ;;  %v358_v9 = vmul.f32 %v268_v37, %v173_v52  ;;  %v179_v37 = vld [vmem:[#allocation2 + $0x178] sm:$0xff] }
 0x101   :  { %v444_v7 = vrot.slane %v443_v60, 2  ;;  %v451_v8 = vrot.slane %v450_v54, 2  ;;  %v6745_v13 = vmax.f32 %v752_v58, 1.0  ;;  %v417_v14 = vadd.f32 %v416_v63, %v415_v40 }
 0x102   :  { %v424_v16 = vadd.f32 %v423_v0, %v422_v53  ;;  %v431_v21 = vadd.f32 %v430_v4, %v429_v56  ;;  %v438_v22 = vadd.f32 %v437_v5, %v436_v57  ;;  %v359_v35 = vmul.f32 %v272_v6, %v174_v59 }
 0x103   :  { %v445_v23 = vadd.f32 %v444_v7, %v443_v60  ;;  %v452_v30 = vadd.f32 %v451_v8, %v450_v54  ;;  %v755_v32 = vrot.slane %v6745_v13, 1  ;;  %v418_v36 = vrot.slane %v417_v14, 1 }
 0x104   :  { %v425_v38 = vrot.slane %v424_v16, 1  ;;  %v432_v41 = vrot.slane %v431_v21, 1  ;;  %v439_v43 = vrot.slane %v438_v22, 1  ;;  %v756_v51 = vrot.slane %v6745_v13, 2 }
 0x105   :  { %v446_v49 = vrot.slane %v445_v23, 1  ;;  %v453_v50 = vrot.slane %v452_v30, 1  ;;  %v757_v52 = vrot.slane %v6745_v13, 3  ;;  %v6750_v55 = vadd.f32 %v418_v36, %v417_v14 }
 0x106   :  { %v6752_v26 = vadd.f32 %v425_v38, %v424_v16  ;;  %v6754_v40 = vadd.f32 %v432_v41, %v431_v21  ;;  %v758_v53 = vrot.slane %v6745_v13, 4  ;;  %v6757_v56 = vadd.f32 %v439_v43, %v438_v22 }
 0x107   :  { %v6759_v57 = vadd.f32 %v446_v49, %v445_v23  ;;  %v6761_v58 = vadd.f32 %v453_v50, %v452_v30  ;;  %v759_v59 = vrot.slane %v6745_v13, 5  ;;  %v760_v60 = vrot.slane %v6745_v13, 6  ;;  %v144_v30 = vld [vmem:[#allocation2 + $0x60] sm:$0xff] }
 0x108   :  { %7199 = vst [vmem:[#allocation31_spill] sm:$0xff] %v6754_v40  ;;  %v761_v54 = vrot.slane %v6745_v13, 7  ;;  %v360_v63 = vmul.f32 %v272_v6, %v175_v33  ;;  %v361_v0 = vmul.f32 %v272_v6, %v176_v34  ;;  %6369 = vrcp.f32 %v6745_v13  ;;  %v145_v34 = vld [vmem:[#allocation2 + $0x68] sm:$0xff] }
 0x109   :  { %7200 = vst [vmem:[#allocation32_spill] sm:$0xff] %v6759_v57  ;;  %7201 = vst [vmem:[#allocation33_spill] sm:$0xff] %v6761_v58  ;;  %v362_v4 = vmul.f32 %v272_v6, %v177_v44  ;;  %v363_v5 = vmul.f32 %v272_v6, %v178_v45  ;;  %v364_v7 = vmul.f32 %v272_v6, %v179_v37  ;;  %6371 = vrcp.f32 %v755_v32  ;;  %v246_v6 = vpop.permute.xlu0 %245  ;;  %v147_v37 = vld [vmem:[#allocation2 + $0x78] sm:$0xff] }
 0x10a   :  { %v539_v8 = vadd.f32 %v359_v35, %v6743_v15  ;;  %v546_v14 = vadd.f32 %v360_v63, %v354_v29  ;;  %v553_v16 = vadd.f32 %v361_v0, %v355_v39  ;;  %6373 = vrcp.f32 %v757_v52 }
 0x10b   :  { %v560_v21 = vadd.f32 %v362_v4, %v356_v61  ;;  %v567_v22 = vadd.f32 %v363_v5, %v357_v62  ;;  %v574_v23 = vadd.f32 %v364_v7, %v358_v9  ;;  %6375 = vrcp.f32 %v756_v51  ;;  %v146_v9 = vld [vmem:[#allocation2 + $0x70] sm:$0xff]  ;;  %v149_v5 = vld [vmem:[#allocation2 + $0x88] sm:$0xff] }
 0x10c   :  { %v540_v36 = vrot.slane %v539_v8, 4  ;;  %v547_v38 = vrot.slane %v546_v14, 4  ;;  %v554_v33 = vrot.slane %v553_v16, 4  ;;  %6377 = vrcp.f32 %v758_v53  ;;  %v148_v53 = vld [vmem:[#allocation2 + $0x80] sm:$0xff] }
 0x10d   :  { %v561_v13 = vrot.slane %v560_v21, 4  ;;  %v568_v41 = vrot.slane %v567_v22, 4  ;;  %v575_v43 = vrot.slane %v574_v23, 4  ;;  %6379 = vrcp.f32 %v759_v59 }
 0x10e   :  { %v541_v32 = vadd.f32 %v540_v36, %v539_v8  ;;  %v548_v15 = vadd.f32 %v547_v38, %v546_v14  ;;  %v555_v29 = vadd.f32 %v554_v33, %v553_v16  ;;  %6381 = vrcp.f32 %v760_v60 }
 0x10f   :  { %v562_v39 = vadd.f32 %v561_v13, %v560_v21  ;;  %v569_v61 = vadd.f32 %v568_v41, %v567_v22  ;;  %v576_v62 = vadd.f32 %v575_v43, %v574_v23  ;;  %v329_v49 = vmul.f32 %v246_v6, %v144_v30 }
 0x110   :  { %v542_v35 = vrot.slane %v541_v32, 2  ;;  %v549_v44 = vrot.slane %v548_v15, 2  ;;  %v556_v45 = vrot.slane %v555_v29, 2  ;;  %v330_v63 = vmul.f32 %v246_v6, %v145_v34 }
 0x111   :  { %v563_v50 = vrot.slane %v562_v39, 2  ;;  %v570_v51 = vrot.slane %v569_v61, 2  ;;  %v577_v52 = vrot.slane %v576_v62, 2  ;;  %v331_v7 = vmul.f32 %v246_v6, %v146_v9  ;;  %v180_v9 = vld [vmem:[#allocation2 + $0x180] sm:$0xff] }
 0x112   :  { %v543_v0 = vadd.f32 %v542_v35, %v541_v32  ;;  %v550_v59 = vadd.f32 %v549_v44, %v548_v15  ;;  %v557_v4 = vadd.f32 %v556_v45, %v555_v29  ;;  %v332_v16 = vmul.f32 %v246_v6, %v147_v37  ;;  %v181_v37 = vld [vmem:[#allocation2 + $0x188] sm:$0xff] }
 0x113   :  { %v564_v60 = vadd.f32 %v563_v50, %v562_v39  ;;  %v571_v8 = vadd.f32 %v570_v51, %v569_v61  ;;  %v578_v14 = vadd.f32 %v577_v52, %v576_v62  ;;  %v333_v36 = vmul.f32 %v246_v6, %v148_v53  ;;  %v182_v53 = vld [vmem:[#allocation2 + $0x190] sm:$0xff] }
 0x114   :  { %v544_v21 = vrot.slane %v543_v0, 1  ;;  %v551_v22 = vrot.slane %v550_v59, 1  ;;  %v558_v23 = vrot.slane %v557_v4, 1  ;;  %v334_v13 = vmul.f32 %v246_v6, %v149_v5 }
 0x115   :  { %v565_v38 = vrot.slane %v564_v60, 1  ;;  %v572_v30 = vrot.slane %v571_v8, 1  ;;  %v579_v33 = vrot.slane %v578_v14, 1  ;;  %v6768_v41 = vpop.eup %6369  ;;  %6383 = vrcp.f32 %v761_v54 }
 0x116   :  { %v6770_v34 = vadd.f32 %v544_v21, %v543_v0  ;;  %v6772_v43 = vadd.f32 %v551_v22, %v550_v59  ;;  %v455_v32 = vadd.f32 %v6719_v46, %v329_v49  ;;  %v6775_v15 = vpop.eup %6371  ;;  %v6777_v29 = vadd.f32 %v558_v23, %v557_v4  ;;  %v279_v46 = vpop.permute.xlu0 %278  ;;  %v184_v4 = vld [vmem:[#allocation2 + $0x1a0] sm:$0xff] }
 0x117   :  { %v6779_v39 = vadd.f32 %v565_v38, %v564_v60  ;;  %v573_v61 = vadd.f32 %v572_v30, %v571_v8  ;;  %v462_v62 = vadd.f32 %v6721_v47, %v330_v63  ;;  %v6782_v6 = vpop.eup %6373  ;;  %v469_v54 = vadd.f32 %v6723_v48, %v331_v7  ;;  %v185_v8 = vld [vmem:[#allocation2 + $0x1a8] sm:$0xff] }
 0x118   :  { %7202 = vst [vmem:[#allocation34_spill] sm:$0xff] %v6777_v29  ;;  %v456_v35 = vrot.slane %v455_v32, 4  ;;  %v476_v44 = vadd.f32 %v6725_v10, %v332_v16  ;;  %v483_v45 = vadd.f32 %v6727_v11, %v333_v36  ;;  %v6787_v49 = vpop.eup %6375  ;;  %v6789_v50 = vadd.f32 %v579_v33, %v578_v14  ;;  %v183_v11 = vld [vmem:[#allocation2 + $0x198] sm:$0xff] }
 0x119   :  { %v6792_v51 = vmul.f32 %v6782_v6, %v573_v61  ;;  %v463_v47 = vrot.slane %v462_v62, 4  ;;  %v490_v52 = vadd.f32 %v6729_v25, %v334_v13  ;;  %v6795_v63 = vpop.eup %6377  ;;  %v470_v0 = vrot.slane %v469_v54, 4 }
 0x11a   :  { %7203 = vst [vmem:[#allocation35_spill] sm:$0xff] %v6789_v50  ;;  %v457_v48 = vadd.f32 %v456_v35, %v455_v32  ;;  %v477_v10 = vrot.slane %v476_v44, 4  ;;  %v484_v59 = vrot.slane %v483_v45, 4  ;;  %v6797_v5 = vpop.eup %6379  ;;  %v365_v14 = vmul.f32 %v279_v46, %v180_v9  ;;  %v186_v32 = vld [vmem:[#allocation2 + $0x1b0] sm:$0xff] }
 0x11b   :  { %7204 = vst [vmem:[#allocation36_spill] sm:$0xff] %v6792_v51  ;;  %v464_v7 = vadd.f32 %v463_v47, %v462_v62  ;;  %v491_v60 = vrot.slane %v490_v52, 4  ;;  %v366_v16 = vmul.f32 %v279_v46, %v181_v37  ;;  %v6799_v21 = vpop.eup %6381  ;;  %v471_v25 = vadd.f32 %v470_v0, %v469_v54  ;;  %v283_v62 = vpop.permute.xlu1 %282  ;;  %v187_v47 = vld [vmem:[#allocation2 + $0x1b8] sm:$0xff] }
 0x11c   :  { %v458_v22 = vrot.slane %v457_v48, 2  ;;  %v478_v23 = vadd.f32 %v477_v10, %v476_v44  ;;  %v485_v36 = vadd.f32 %v484_v59, %v483_v45  ;;  %v367_v33 = vmul.f32 %v279_v46, %v182_v53 }
 0x11d   :  { %v465_v38 = vrot.slane %v464_v7, 2  ;;  %v492_v30 = vadd.f32 %v491_v60, %v490_v52  ;;  %v368_v13 = vmul.f32 %v279_v46, %v183_v11  ;;  %v472_v35 = vrot.slane %v471_v25, 2 }
 0x11e   :  { %v459_v61 = vadd.f32 %v458_v22, %v457_v48  ;;  %v479_v31 = vrot.slane %v478_v23, 2  ;;  %v486_v24 = vrot.slane %v485_v36, 2  ;;  %v369_v18 = vmul.f32 %v279_v46, %v184_v4  ;;  %v191_v4 = vld [vmem:[#allocation2 + $0x1d8] sm:$0xff] }
 0x11f   :  { %v466_v9 = vadd.f32 %v465_v38, %v464_v7  ;;  %v493_v37 = vrot.slane %v492_v30, 2  ;;  %v370_v3 = vmul.f32 %v279_v46, %v185_v8  ;;  %v473_v44 = vadd.f32 %v472_v35, %v471_v25 }
 0x120   :  { %v460_v54 = vrot.slane %v459_v61, 1  ;;  %v480_v45 = vadd.f32 %v479_v31, %v478_v23  ;;  %v487_v0 = vadd.f32 %v486_v24, %v485_v36  ;;  %v371_v10 = vmul.f32 %v283_v62, %v186_v32 }
 0x121   :  { %v467_v52 = vrot.slane %v466_v9, 1  ;;  %v494_v53 = vadd.f32 %v493_v37, %v492_v30  ;;  %v372_v59 = vmul.f32 %v283_v62, %v187_v47  ;;  %v474_v11 = vrot.slane %v473_v44, 1 }
 0x122   :  { %v461_v48 = vadd.f32 %v460_v54, %v459_v61  ;;  %v481_v60 = vrot.slane %v480_v45, 1  ;;  %v488_v22 = vrot.slane %v487_v0, 1  ;;  %v6801_v51 = vpop.eup %6383  ;;  %v373_v46 = vmul.f32 %v283_v62, %v188_v1 }
 0x123   :  { %v468_v7 = vadd.f32 %v467_v52, %v466_v9  ;;  %v495_v38 = vrot.slane %v494_v53, 1  ;;  %v374_v8 = vmul.f32 %v283_v62, %v189_v2  ;;  %v475_v28 = vadd.f32 %v474_v11, %v473_v44  ;;  %v290_v52 = vpop.permute.xlu0 %289  ;;  %v294_v9 = vpop.permute.xlu1 %293 }
 0x124   :  { %v482_v25 = vadd.f32 %v481_v60, %v480_v45  ;;  %v489_v31 = vadd.f32 %v488_v22, %v487_v0  ;;  %v6804_v24 = vmul.f32 %v6775_v15, %v461_v48  ;;  %v375_v30 = vmul.f32 %v283_v62, %v190_v12  ;;  %v194_v60 = vld [vmem:[#allocation2 + $0x1f0] sm:$0xff]  ;;  %v195_v22 = vld [vmem:[#allocation2 + $0x1f8] sm:$0xff] }
 0x125   :  { %v496_v23 = vadd.f32 %v495_v38, %v494_v53  ;;  %v6807_v36 = vmul.f32 %v6775_v15, %v468_v7  ;;  %v581_v32 = vadd.f32 %v371_v10, %v365_v14  ;;  %v6810_v61 = vmul.f32 %v6775_v15, %v475_v28  ;;  %v192_v53 = vld [vmem:[#allocation2 + $0x1e0] sm:$0xff]  ;;  %v193_v10 = vld [vmem:[#allocation2 + $0x1e8] sm:$0xff]  ;;  %v202_v45 = vld [vmem:[#allocation2 + $0x230] sm:$0xff] }
 0x126   :  { %v6813_v35 = vmul.f32 %v6775_v15, %v482_v25  ;;  %v782_v1 = vmul.f32 %v6775_v15, %v489_v31  ;;  %v376_v2 = vmul.f32 %v283_v62, %v191_v4  ;;  %v588_v54 = vadd.f32 %v372_v59, %v366_v16 }
 0x127   :  { %7205 = vst [vmem:[#allocation37_spill] sm:$0xff] %v6810_v61  ;;  %v6817_v47 = vmul.f32 %v6775_v15, %v496_v23  ;;  %v582_v37 = vrot.slane %v581_v32, 4  ;;  %v595_v44 = vadd.f32 %v373_v46, %v367_v33  ;;  %v602_v15 = vadd.f32 %v374_v8, %v368_v13  ;;  %v196_v46 = vld [vmem:[#allocation2 + $0x200] sm:$0xff]  ;;  %v197_v8 = vld [vmem:[#allocation2 + $0x208] sm:$0xff] }
 0x128   :  { %v836_v14 = vpack.c.bf16 %v782_v1, %v782_v1  ;;  %v589_v0 = vrot.slane %v588_v54, 4  ;;  %v609_v48 = vadd.f32 %v375_v30, %v369_v18  ;;  %v616_v11 = vadd.f32 %v376_v2, %v370_v3  ;;  %v198_v18 = vld [vmem:[#allocation2 + $0x210] sm:$0xff]  ;;  %v199_v3 = vld [vmem:[#allocation2 + $0x218] sm:$0xff] }
 0x129   :  { %7206 = vst [vmem:[#allocation38_spill] sm:$0xff] %v6817_v47  ;;  %v583_v62 = vadd.f32 %v582_v37, %v581_v32  ;;  %v596_v59 = vrot.slane %v595_v44, 4  ;;  %v603_v4 = vrot.slane %v602_v15, 4  ;;  %v377_v23 = vmul.f32 %v290_v52, %v192_v53 }
 0x12a   :  { %v6829_v7 = vunpack.c.l.b16 %v836_v14  ;;  %v590_v38 = vadd.f32 %v589_v0, %v588_v54  ;;  %v610_v31 = vrot.slane %v609_v48, 4  ;;  %v617_v13 = vrot.slane %v616_v11, 4  ;;  %v200_v54 = vld [vmem:[#allocation2 + $0x220] sm:$0xff]  ;;  %v201_v0 = vld [vmem:[#allocation2 + $0x228] sm:$0xff] }
 0x12b   :  { %v584_v33 = vrot.slane %v583_v62, 2  ;;  %v597_v25 = vadd.f32 %v596_v59, %v595_v44  ;;  %v604_v37 = vadd.f32 %v603_v4, %v602_v15  ;;  %v378_v16 = vmul.f32 %v290_v52, %v193_v10 }
 0x12c   :  { %7207 = vst [vmem:[#allocation39_spill] sm:$0xff] %v6829_v7  ;;  %v591_v1 = vrot.slane %v590_v38, 2  ;;  %v611_v2 = vadd.f32 %v610_v31, %v609_v48  ;;  %v618_v14 = vadd.f32 %v617_v13, %v616_v11  ;;  %v379_v28 = vmul.f32 %v290_v52, %v194_v60  ;;  %v203_v60 = vld [vmem:[#allocation2 + $0x238] sm:$0xff] }
 0x12d   :  { %v6831_v32 = vadd.f32 %v584_v33, %v583_v62  ;;  %v598_v30 = vrot.slane %v597_v25, 2  ;;  %v605_v53 = vrot.slane %v604_v37, 2  ;;  %v380_v62 = vmul.f32 %v290_v52, %v195_v22 }
 0x12e   :  { %v6834_v59 = vadd.f32 %v591_v1, %v590_v38  ;;  %v612_v15 = vrot.slane %v611_v2, 2  ;;  %v619_v10 = vrot.slane %v618_v14, 2  ;;  %v381_v4 = vmul.f32 %v290_v52, %v196_v46  ;;  %v204_v1 = vld [vmem:[#allocation2 + $0x240] sm:$0xff]  ;;  %v301_v46 = vpop.permute.xlu0 %300 }
 0x12f   :  { %v6836_v33 = vadd.f32 %v598_v30, %v597_v25  ;;  %v6839_v48 = vadd.f32 %v605_v53, %v604_v37  ;;  %v382_v11 = vmul.f32 %v290_v52, %v197_v8  ;;  %v383_v31 = vmul.f32 %v294_v9, %v198_v18  ;;  %v209_v37 = vld [vmem:[#allocation2 + $0x268] sm:$0xff] }
 0x130   :  { %v613_v7 = vadd.f32 %v612_v15, %v611_v2  ;;  %v6842_v44 = vadd.f32 %v619_v10, %v618_v14  ;;  %v384_v38 = vmul.f32 %v294_v9, %v199_v3  ;;  %v385_v25 = vmul.f32 %v294_v9, %v200_v54  ;;  %v205_v2 = vld [vmem:[#allocation2 + $0x248] sm:$0xff]  ;;  %v206_v14 = vld [vmem:[#allocation2 + $0x250] sm:$0xff]  ;;  %v207_v15 = vld [vmem:[#allocation2 + $0x258] sm:$0xff] }
 0x131   :  { %v386_v30 = vmul.f32 %v294_v9, %v201_v0  ;;  %v387_v57 = vmul.f32 %v294_v9, %v202_v45  ;;  %v388_v53 = vmul.f32 %v294_v9, %v203_v60  ;;  %v623_v52 = vadd.f32 %v383_v31, %v377_v23  ;;  %v208_v54 = vld [vmem:[#allocation2 + $0x260] sm:$0xff]  ;;  %v210_v9 = vld [vmem:[#allocation2 + $0x270] sm:$0xff] }
 0x132   :  { %7208 = vst [vmem:[#allocation40_spill] sm:$0xff] %v6842_v44  ;;  %v614_v47 = vrot.slane %v613_v7, 1  ;;  %v630_v8 = vadd.f32 %v384_v38, %v378_v16  ;;  %v637_v18 = vadd.f32 %v385_v25, %v379_v28  ;;  %v389_v0 = vmul.f32 %v301_v46, %v204_v1  ;;  %v212_v38 = vld [vmem:[#allocation2 + $0x280] sm:$0xff]  ;;  %v215_v44 = vld [vmem:[#allocation2 + $0x298] sm:$0xff] }
 0x133   :  { %v644_v12 = vadd.f32 %v386_v30, %v380_v62  ;;  %v651_v13 = vadd.f32 %v387_v57, %v381_v4  ;;  %v624_v10 = vrot.slane %v623_v52, 4  ;;  %v658_v22 = vadd.f32 %v388_v53, %v382_v11  ;;  %v213_v11 = vld [vmem:[#allocation2 + $0x288] sm:$0xff] }
 0x134   :  { %v6846_v3 = vadd.f32 %v614_v47, %v613_v7  ;;  %v631_v45 = vrot.slane %v630_v8, 4  ;;  %v638_v50 = vrot.slane %v637_v18, 4  ;;  %v390_v28 = vmul.f32 %v301_v46, %v205_v2  ;;  %v305_v47 = vpop.permute.xlu1 %304  ;;  %v211_v7 = vld [vmem:[#allocation2 + $0x278] sm:$0xff] }
 0x135   :  { %v645_v42 = vrot.slane %v644_v12, 4  ;;  %v652_v58 = vrot.slane %v651_v13, 4  ;;  %v625_v23 = vadd.f32 %v624_v10, %v623_v52  ;;  %v659_v16 = vrot.slane %v658_v22, 4 }
 0x136   :  { %7209 = vst [vmem:[#allocation41_spill] sm:$0xff] %v6846_v3  ;;  %v391_v62 = vmul.f32 %v301_v46, %v206_v14  ;;  %v632_v57 = vadd.f32 %v631_v45, %v630_v8  ;;  %v639_v4 = vadd.f32 %v638_v50, %v637_v18  ;;  %v392_v30 = vmul.f32 %v301_v46, %v207_v15  ;;  %v214_v3 = vld [vmem:[#allocation2 + $0x290] sm:$0xff]  ;;  %v312_v18 = vpop.permute.xlu0 %311  ;;  %v216_v14 = vld [vmem:[#allocation2 + $0x2a0] sm:$0xff]  ;;  %v217_v15 = vld [vmem:[#allocation2 + $0x2a8] sm:$0xff] }
 0x137   :  { %v646_v60 = vadd.f32 %v645_v42, %v644_v12  ;;  %v653_v31 = vadd.f32 %v652_v58, %v651_v13  ;;  %v626_v25 = vrot.slane %v625_v23, 2  ;;  %v660_v1 = vadd.f32 %v659_v16, %v658_v22 }
 0x138   :  { %v393_v53 = vmul.f32 %v301_v46, %v208_v54  ;;  %v633_v61 = vrot.slane %v632_v57, 2  ;;  %v640_v29 = vrot.slane %v639_v4, 2  ;;  %v394_v50 = vmul.f32 %v301_v46, %v209_v37 }
 0x139   :  { %v647_v52 = vrot.slane %v646_v60, 2  ;;  %v654_v10 = vrot.slane %v653_v31, 2  ;;  %v6848_v2 = vadd.f32 %v626_v25, %v625_v23  ;;  %v661_v8 = vrot.slane %v660_v1, 2  ;;  %v218_v23 = vld [vmem:[#allocation2 + $0x2b0] sm:$0xff] }
 0x13a   :  { %v395_v42 = vmul.f32 %v305_v47, %v210_v9  ;;  %v6850_v58 = vadd.f32 %v633_v61, %v632_v57  ;;  %v6852_v12 = vadd.f32 %v640_v29, %v639_v4  ;;  %v396_v45 = vmul.f32 %v305_v47, %v211_v7  ;;  %v219_v61 = vld [vmem:[#allocation2 + $0x2b8] sm:$0xff]  ;;  %v220_v4 = vld [vmem:[#allocation2 + $0x2c0] sm:$0xff] }
 0x13b   :  { %v6854_v13 = vadd.f32 %v647_v52, %v646_v60  ;;  %v655_v22 = vadd.f32 %v654_v10, %v653_v31  ;;  %v6856_v54 = vadd.f32 %v661_v8, %v660_v1  ;;  %v397_v16 = vmul.f32 %v305_v47, %v212_v38  ;;  %v221_v8 = vld [vmem:[#allocation2 + $0x2c8] sm:$0xff] }
 0x13c   :  { %7210 = vst [vmem:[#allocation42_spill] sm:$0xff] %v6852_v12  ;;  %v398_v20 = vmul.f32 %v305_v47, %v213_v11  ;;  %v399_v40 = vmul.f32 %v305_v47, %v214_v3  ;;  %v400_v46 = vmul.f32 %v305_v47, %v215_v44  ;;  %v665_v37 = vadd.f32 %v395_v42, %v389_v0  ;;  %v222_v12 = vld [vmem:[#allocation2 + $0x2d0] sm:$0xff]  ;;  %v316_v42 = vpop.permute.xlu1 %315 }
 0x13d   :  { %7211 = vst [vmem:[#allocation43_spill] sm:$0xff] %v6856_v54  ;;  %v656_v25 = vrot.slane %v655_v22, 1  ;;  %v672_v9 = vadd.f32 %v396_v45, %v390_v28  ;;  %v679_v29 = vadd.f32 %v397_v16, %v391_v62  ;;  %v401_v60 = vmul.f32 %v312_v18, %v216_v14  ;;  %v226_v16 = vld [vmem:[#allocation2 + $0x2f0] sm:$0xff] }
 0x13e   :  { %v686_v57 = vadd.f32 %v398_v20, %v392_v30  ;;  %v666_v52 = vrot.slane %v665_v37, 4  ;;  %v693_v10 = vadd.f32 %v399_v40, %v393_v53  ;;  %v700_v1 = vadd.f32 %v400_v46, %v394_v50  ;;  %v223_v40 = vld [vmem:[#allocation2 + $0x2d8] sm:$0xff]  ;;  %v224_v53 = vld [vmem:[#allocation2 + $0x2e0] sm:$0xff]  ;;  %v225_v50 = vld [vmem:[#allocation2 + $0x2e8] sm:$0xff] }
 0x13f   :  { %v6858_v31 = vadd.f32 %v656_v25, %v655_v22  ;;  %v673_v7 = vrot.slane %v672_v9, 4  ;;  %v680_v38 = vrot.slane %v679_v29, 4  ;;  %v402_v54 = vmul.f32 %v312_v18, %v217_v15  ;;  %v227_v25 = vld [vmem:[#allocation2 + $0x2f8] sm:$0xff] }
 0x140   :  { %v687_v11 = vrot.slane %v686_v57, 4  ;;  %v6860_v3 = vadd.f32 %v666_v52, %v665_v37  ;;  %v694_v44 = vrot.slane %v693_v10, 4  ;;  %v701_v0 = vrot.slane %v700_v1, 4 }
 0x141   :  { %v403_v28 = vmul.f32 %v312_v18, %v218_v23  ;;  %v674_v62 = vadd.f32 %v673_v7, %v672_v9  ;;  %v6862_v20 = vadd.f32 %v680_v38, %v679_v29  ;;  %v404_v30 = vmul.f32 %v312_v18, %v219_v61 }
 0x142   :  { %v6864_v47 = vadd.f32 %v687_v11, %v686_v57  ;;  %v695_v14 = vadd.f32 %v694_v44, %v693_v10  ;;  %v6867_v15 = vadd.f32 %v701_v0, %v700_v1  ;;  %v405_v45 = vmul.f32 %v312_v18, %v220_v4 }
 0x143   :  { %v675_v46 = vrot.slane %v674_v62, 2  ;;  %v406_v9 = vmul.f32 %v312_v18, %v221_v8  ;;  %v407_v57 = vmul.f32 %v316_v42, %v222_v12  ;;  %v408_v52 = vmul.f32 %v316_v42, %v223_v40 }
 0x144   :  { %v696_v29 = vrot.slane %v695_v14, 2  ;;  %v409_v7 = vmul.f32 %v316_v42, %v224_v53  ;;  %v410_v38 = vmul.f32 %v316_v42, %v225_v50  ;;  %v411_v11 = vmul.f32 %v316_v42, %v226_v16 }
 0x145   :  { %v412_v10 = vmul.f32 %v316_v42, %v227_v25  ;;  %v707_v4 = vadd.f32 %v407_v57, %v401_v60  ;;  %v714_v44 = vadd.f32 %v408_v52, %v402_v54  ;;  %v7212_v0 = vrot.slane %v6834_v59, 1 }
 0x146   :  { %v6872_v1 = vadd.f32 %v696_v29, %v695_v14  ;;  %v721_v22 = vadd.f32 %v409_v7, %v403_v28  ;;  %v728_v37 = vadd.f32 %v410_v38, %v404_v30  ;;  %v735_v18 = vadd.f32 %v411_v11, %v405_v45 }
 0x147   :  { %v594_v23 = vadd.f32 %v7212_v0, %v6834_v59  ;;  %v742_v8 = vadd.f32 %v412_v10, %v406_v9  ;;  %v708_v12 = vrot.slane %v707_v4, 4  ;;  %v715_v40 = vrot.slane %v714_v44, 4 }
 0x148   :  { %v698_v61 = vrot.slane %v6872_v1, 1  ;;  %v635_v53 = vrot.slane %v6850_v58, 1  ;;  %v722_v42 = vrot.slane %v721_v22, 4  ;;  %v729_v50 = vrot.slane %v728_v37, 4 }
 0x149   :  { %v736_v14 = vrot.slane %v735_v18, 4  ;;  %v743_v60 = vrot.slane %v742_v8, 4  ;;  %v6879_v54 = vadd.f32 %v708_v12, %v707_v4  ;;  %v716_v16 = vadd.f32 %v715_v40, %v714_v44 }
 0x14a   :  { %v636_v59 = vadd.f32 %v635_v53, %v6850_v58  ;;  %v676_v28 = vadd.f32 %v675_v46, %v674_v62  ;;  %v6882_v30 = vadd.f32 %v722_v42, %v721_v22  ;;  %v730_v45 = vadd.f32 %v729_v50, %v728_v37 }
 0x14b   :  { %v6884_v25 = vadd.f32 %v736_v14, %v735_v18  ;;  %v6886_v9 = vadd.f32 %v743_v60, %v742_v8  ;;  %v717_v57 = vrot.slane %v716_v16, 2  ;;  %v772_v52 = vmul.f32 %v6768_v41, %v6752_v26 }
 0x14c   :  { %v677_v29 = vrot.slane %v676_v28, 1  ;;  %v786_v7 = vmul.f32 %v6787_v49, %v6733_v19  ;;  %v793_v62 = vmul.f32 %v6782_v6, %v6772_v43  ;;  %v800_v22 = vmul.f32 %v6795_v63, %v594_v23 }
 0x14d   :  { %v738_v58 = vrot.slane %v6884_v25, 2  ;;  %v807_v46 = vmul.f32 %v6797_v5, %v636_v59  ;;  %v718_v38 = vadd.f32 %v717_v57, %v716_v16  ;;  %v827_v11 = vpack.c.bf16 %v772_v52, %v772_v52 }
 0x14e   :  { %v678_v37 = vadd.f32 %v677_v29, %v676_v28  ;;  %v839_v10 = vpack.c.bf16 %v786_v7, %v786_v7  ;;  %v845_v4 = vpack.c.bf16 %v793_v62, %v793_v62  ;;  %v851_v26 = vpack.c.bf16 %v800_v22, %v800_v22 }
 0x14f   :  { %v857_v44 = vpack.c.bf16 %v807_v46, %v807_v46  ;;  %v7213_v19 = vpack.c.bf16 %v6807_v36, %v6807_v36  ;;  %v719_v18 = vrot.slane %v718_v38, 1  ;;  %v1243_v43 = vunpack.c.l.b16 %v827_v11 }
 0x150   :  { %v814_v8 = vmul.f32 %v6799_v21, %v678_v37  ;;  %v1255_v12 = vunpack.c.l.b16 %v839_v10  ;;  %v1261_v23 = vunpack.c.l.b16 %v845_v4  ;;  %v1267_v40 = vunpack.c.l.b16 %v851_v26 }
 0x151   :  { %v1249_v0 = vunpack.c.l.b16 %v7213_v19  ;;  %v1273_v53 = vunpack.c.l.b16 %v857_v44  ;;  %v720_v50 = vadd.f32 %v719_v18, %v718_v38  ;;  %v7214_v16 = vrot.slane %v6839_v48, 1 }
 0x152   :  { %v863_v14 = vpack.c.bf16 %v814_v8, %v814_v8  ;;  %v1313_v60 = vrot.slane %v1255_v12, 6  ;;  %v1315_v28 = vrot.slane %v1261_v23, 5  ;;  %v1317_v29 = vrot.slane %v1267_v40, 4 }
 0x153   :  { %v1311_v42 = vrot.slane %v1249_v0, 7  ;;  %v608_v59 = vadd.f32 %v7214_v16, %v6839_v48  ;;  %v1319_v57 = vrot.slane %v1273_v53, 3  ;;  %v821_v52 = vmul.f32 %v6801_v51, %v720_v50 }
 0x154   :  { %v1279_v7 = vunpack.c.l.b16 %v863_v14  ;;  %v649_v22 = vrot.slane %v6854_v13, 1  ;;  %v7215_v37 = vrot.slane %v6864_v47, 2  ;;  %v731_v11 = vrot.slane %v730_v45, 2 }
 0x155   :  { %v1312_v36 = vsel %vm1291_vm1, %v1311_v42, %v1243_v43  ;;  %v774_v48 = vmul.f32 %v6768_v41, %v6757_v56  ;;  %v869_v10 = vpack.c.bf16 %v821_v52, %v821_v52  ;;  %v788_v8 = vmul.f32 %v6787_v49, %v6737_v27 }
 0x156   :  { %v1314_v62 = vsel %vm1294_vm2, %v1313_v60, %v1312_v36  ;;  %v690_v38 = vadd.f32 %v7215_v37, %v6864_v47  ;;  %v1321_v26 = vrot.slane %v1279_v7, 2  ;;  %v650_v44 = vadd.f32 %v649_v22, %v6854_v13 }
 0x157   :  { %v1316_v46 = vsel %vm1297_vm3, %v1315_v28, %v1314_v62  ;;  %v732_v18 = vadd.f32 %v731_v11, %v730_v45  ;;  %v1285_v43 = vunpack.c.l.b16 %v869_v10  ;;  %v795_v12 = vmul.f32 %v6782_v6, %v6779_v39 }
 0x158   :  { %v1318_v4 = vsel %vm1300_vm4, %v1317_v29, %v1316_v46  ;;  %v691_v0 = vrot.slane %v690_v38, 1  ;;  %v802_v56 = vmul.f32 %v6795_v63, %v608_v59  ;;  %v809_v53 = vmul.f32 %v6797_v5, %v650_v44 }
 0x159   :  { %v1320_v19 = vsel %vm1303_vm5, %v1319_v57, %v1318_v4  ;;  %v733_v40 = vrot.slane %v732_v18, 1  ;;  %v829_v13 = vpack.c.bf16 %v774_v48, %v774_v48  ;;  %v1323_v42 = vrot.slane %v1285_v43, 1 }
 0x15a   :  { %v1322_v47 = vsel %vm1306_vm6, %v1321_v26, %v1320_v19  ;;  %v692_v23 = vadd.f32 %v691_v0, %v690_v38  ;;  %v841_v50 = vpack.c.bf16 %v788_v8, %v788_v8  ;;  %v847_v14 = vpack.c.bf16 %v795_v12, %v795_v12 }
 0x15b   :  { %v853_v45 = vpack.c.bf16 %v802_v56, %v802_v56  ;;  %v734_v60 = vadd.f32 %v733_v40, %v732_v18  ;;  %v859_v16 = vpack.c.bf16 %v809_v53, %v809_v53  ;;  %v1245_v36 = vunpack.c.l.b16 %v829_v13 }
 0x15c   :  { %v816_v27 = vmul.f32 %v6799_v21, %v692_v23  ;;  %v1324_v28 = vsel %vm1309_vm7, %v1323_v42, %v1322_v47  ;;  %v7216_v39 = vpack.c.bf16 %v6813_v35, %v6813_v35  ;;  %v1257_v29 = vunpack.c.l.b16 %v841_v50 }
 0x15d   :  { %v1263_v57 = vunpack.c.l.b16 %v847_v14  ;;  %v6929_v52 = vpack.c.b16 %v1324_v28, %v1324_v28  ;;  %v823_v7 = vmul.f32 %v6801_v51, %v734_v60  ;;  %v1269_v22 = vunpack.c.l.b16 %v853_v45 }
 0x15e   :  { %v1251_v59 = vunpack.c.l.b16 %v7216_v39  ;;  %v865_v62 = vpack.c.bf16 %v816_v27, %v816_v27  ;;  %v1275_v46 = vunpack.c.l.b16 %v859_v16  ;;  %v1341_v38 = vrot.slane %v1257_v29, 6 }
 0x15f   :  { %v1343_v11 = vrot.slane %v1263_v57, 5  ;;  %2865 = vmatprep.mubr.bf16.mxu0 %v6929_v52  ;;  %v871_v48 = vpack.c.bf16 %v823_v7, %v823_v7  ;;  %v1345_v4 = vrot.slane %v1269_v22, 4  ;;  %v7217_v35 = vrot.slane %v6831_v32, 1 }
 0x160   :  { %v1339_v37 = vrot.slane %v1251_v59, 7  ;;  %v1281_v10 = vunpack.c.l.b16 %v865_v62  ;;  %v1347_v19 = vrot.slane %v1275_v46, 3  ;;  %v628_v0 = vrot.slane %v6848_v2, 1 }
 0x161   :  { %v587_v26 = vadd.f32 %v7217_v35, %v6831_v32  ;;  %v7218_v18 = vrot.slane %v6860_v3, 2  ;;  %v1287_v43 = vunpack.c.l.b16 %v871_v48  ;;  %v710_v56 = vrot.slane %v6879_v54, 2 }
 0x162   :  { %v1340_v44 = vsel %vm1291_vm1, %v1339_v37, %v1245_v36  ;;  %v1349_v12 = vrot.slane %v1281_v10, 2  ;;  %v629_v40 = vadd.f32 %v628_v0, %v6848_v2  ;;  %v771_v53 = vmul.f32 %v6768_v41, %v6750_v55 }
 0x163   :  { %v669_v8 = vadd.f32 %v7218_v18, %v6860_v3  ;;  %v1342_v47 = vsel %vm1294_vm2, %v1341_v38, %v1340_v44  ;;  %v1351_v42 = vrot.slane %v1287_v43, 1  ;;  %v711_v50 = vadd.f32 %v710_v56, %v6879_v54 }
 0x164   :  { %v1344_v23 = vsel %vm1297_vm3, %v1343_v11, %v1342_v47  ;;  %v785_v3 = vmul.f32 %v6787_v49, %v6731_v17  ;;  %v792_v60 = vmul.f32 %v6782_v6, %v6770_v34  ;;  %v799_v2 = vmul.f32 %v6795_v63, %v587_v26 }
 0x165   :  { %v670_v32 = vrot.slane %v669_v8, 1  ;;  %v1346_v13 = vsel %vm1300_vm4, %v1345_v4, %v1344_v23  ;;  %v712_v16 = vrot.slane %v711_v50, 1  ;;  %v806_v55 = vmul.f32 %v6797_v5, %v629_v40 }
 0x166   :  { %v1348_v14 = vsel %vm1303_vm5, %v1347_v19, %v1346_v13  ;;  %v826_v36 = vpack.c.bf16 %v771_v53, %v771_v53  ;;  %v838_v39 = vpack.c.bf16 %v785_v3, %v785_v3  ;;  %v844_v17 = vpack.c.bf16 %v792_v60, %v792_v60 }
 0x167   :  { %v671_v45 = vadd.f32 %v670_v32, %v669_v8  ;;  %v1350_v27 = vsel %vm1306_vm6, %v1349_v12, %v1348_v14  ;;  %v713_v29 = vadd.f32 %v712_v16, %v711_v50  ;;  %v850_v57 = vpack.c.bf16 %v799_v2, %v799_v2  ;;  %v7221_v12 = vld [vmem:[#allocation42_spill] sm:$0xff] }
 0x168   :  { %v1352_v28 = vsel %vm1309_vm7, %v1351_v42, %v1350_v27  ;;  %v856_v7 = vpack.c.bf16 %v806_v55, %v806_v55  ;;  %v1242_v62 = vunpack.c.l.b16 %v826_v36  ;;  %v7219_v22 = vpack.c.bf16 %v6804_v24, %v6804_v24  ;;  %v7223_v42 = vld [vmem:[#allocation31_spill] sm:$0xff]  ;;  %v7225_v16 = vld [vmem:[#allocation34_spill] sm:$0xff] }
 0x169   :  { %v813_v54 = vmul.f32 %v6799_v21, %v671_v45  ;;  %v6959_v59 = vpack.c.b16 %v1352_v28, %v1352_v28  ;;  %v1254_v37 = vunpack.c.l.b16 %v838_v39  ;;  %v820_v38 = vmul.f32 %v6801_v51, %v713_v29  ;;  %v7224_v45 = vld [vmem:[#allocation28_spill] sm:$0xff] }
 0x16a   :  { %v1248_v46 = vunpack.c.l.b16 %v7219_v22  ;;  %v1260_v11 = vunpack.c.l.b16 %v844_v17  ;;  %v1266_v48 = vunpack.c.l.b16 %v850_v57  ;;  %v1272_v10 = vunpack.c.l.b16 %v856_v7 }
 0x16b   :  { %v862_v34 = vpack.c.bf16 %v813_v54, %v813_v54  ;;  %2906 = vmatprep.mubr.bf16.mxu1 %v6959_v59  ;;  %v1293_v26 = vrot.slane %v1254_v37, 6  ;;  %v7220_v44 = vrot.slane %v6836_v33, 1  ;;  %v868_v0 = vpack.c.bf16 %v820_v38, %v820_v38 }
 0x16c   :  { %v1290_v35 = vrot.slane %v1248_v46, 7  ;;  %v1296_v18 = vrot.slane %v1260_v11, 5  ;;  %v1299_v8 = vrot.slane %v1266_v48, 4  ;;  %v1302_v24 = vrot.slane %v1272_v10, 3  ;;  %v5721_v10 = vld [vmem:[#allocation7 + $0x724] ss:$24 sps:$4 sm:$0xff]  }
 0x16d   :  { %v1278_v4 = vunpack.c.l.b16 %v862_v34  ;;  %v601_v19 = vadd.f32 %v7220_v44, %v6836_v33  ;;  %v642_v56 = vrot.slane %v7221_v12, 1  ;;  %v7222_v23 = vrot.slane %v6862_v20, 2  ;;  %v5713_v34 = vld [vmem:[#allocation7 + $0x750] ss:$24 sps:$4 sm:$0xff]  }
 0x16e   :  { %v1292_v43 = vsel %vm1291_vm1, %v1290_v35, %v1242_v62  ;;  %v1284_v32 = vunpack.c.l.b16 %v868_v0  ;;  %v724_v13 = vrot.slane %v6882_v30, 2  ;;  %v773_v33 = vmul.f32 %v6768_v41, %v7223_v42  ;;  %v7226_v35 = vld [vmem:[#allocation37_spill] sm:$0xff] }
 0x16f   :  { %v1305_v47 = vrot.slane %v1278_v4, 2  ;;  %v683_v40 = vadd.f32 %v7222_v23, %v6862_v20  ;;  %v1295_v53 = vsel %vm1294_vm2, %v1293_v26, %v1292_v43  ;;  %v643_v3 = vadd.f32 %v642_v56, %v7221_v12  ;;  %v7228_v43 = vld [vmem:[#allocation40_spill] sm:$0xff] }
 0x170   :  { %v1298_v50 = vsel %vm1297_vm3, %v1296_v18, %v1295_v53  ;;  %v787_v60 = vmul.f32 %v6787_v49, %v7224_v45  ;;  %v1308_v27 = vrot.slane %v1284_v32, 1  ;;  %v725_v20 = vadd.f32 %v724_v13, %v6882_v30  ;;  %v5719_v53 = vld [vmem:[#allocation7 + $0x720] ss:$24 sps:$4 sm:$0xff]  }
 0x171   :  { %v684_v14 = vrot.slane %v683_v40, 1  ;;  %v1301_v2 = vsel %vm1300_vm4, %v1299_v8, %v1298_v50  ;;  %v794_v55 = vmul.f32 %v6782_v6, %v7225_v16  ;;  %v801_v54 = vmul.f32 %v6795_v63, %v601_v19  ;;  %v7230_v50 = vld [vmem:[#allocation43_spill] sm:$0xff] }
 0x172   :  { %v1304_v36 = vsel %vm1303_vm5, %v1302_v24, %v1301_v2  ;;  %v808_v39 = vmul.f32 %v6797_v5, %v643_v3  ;;  %v726_v29 = vrot.slane %v725_v20, 1  ;;  %v828_v57 = vpack.c.bf16 %v773_v33, %v773_v33 }
 0x173   :  { %v685_v28 = vadd.f32 %v684_v14, %v683_v40  ;;  %v1307_v17 = vsel %vm1306_vm6, %v1305_v47, %v1304_v36  ;;  %v840_v7 = vpack.c.bf16 %v787_v60, %v787_v60  ;;  %v846_v22 = vpack.c.bf16 %v794_v55, %v794_v55  ;;  %v5727_v14 = vld [vmem:[#allocation7 + $0x6f4] ss:$24 sps:$4 sm:$0xff]  }
 0x174   :  { %v1310_v62 = vsel %vm1309_vm7, %v1308_v27, %v1307_v17  ;;  %v852_v46 = vpack.c.bf16 %v801_v54, %v801_v54  ;;  %v727_v38 = vadd.f32 %v726_v29, %v725_v20  ;;  %v858_v11 = vpack.c.bf16 %v808_v39, %v808_v39 }
 0x175   :  { %v815_v30 = vmul.f32 %v6799_v21, %v685_v28  ;;  %v6992_v37 = vpack.c.b16 %v1310_v62, %v1310_v62  ;;  %v1244_v48 = vunpack.c.l.b16 %v828_v57  ;;  %v7227_v26 = vpack.c.bf16 %v7226_v35, %v7226_v35  ;;  %v7232_v28 = vld [vmem:[#allocation33_spill] sm:$0xff]  ;;  %v7233_v57 = vld [vmem:[#allocation30_spill] sm:$0xff] }
 0x176   :  { %v1256_v19 = vunpack.c.l.b16 %v840_v7  ;;  %v1262_v0 = vunpack.c.l.b16 %v846_v22  ;;  %v822_v18 = vmul.f32 %v6801_v51, %v727_v38  ;;  %v1268_v8 = vunpack.c.l.b16 %v852_v46  ;;  %v5733_v38 = vld [vmem:[#allocation7 + $0x6c4] ss:$24 sps:$4 sm:$0xff]  }
 0x177   :  { %v864_v4 = vpack.c.bf16 %v815_v30, %v815_v30  ;;  %v1250_v44 = vunpack.c.l.b16 %v7227_v26  ;;  %2866 = vmatmul.mubr.bf16.vlgmr.msra.gmra.mxu0 %v6992_v37  ;;  %v1274_v24 = vunpack.c.l.b16 %v858_v11  ;;  %v7229_v47 = vrot.slane %v7228_v43, 1  ;;  %v7234_v30 = vld [vmem:[#allocation35_spill] sm:$0xff] }
 0x178   :  { %v1327_v40 = vrot.slane %v1256_v19, 6  ;;  %v1329_v32 = vrot.slane %v1262_v0, 5  ;;  %2916 = vmatpush1.bf16.msra.mxu0 %v5713_v34  ;;  %v870_v13 = vpack.c.bf16 %v822_v18, %v822_v18  ;;  %v1331_v42 = vrot.slane %v1268_v8, 4  ;;  %v5716_v11 = vld [vmem:[#allocation7 + $0x158] ss:$24 sps:$4 sm:$0xff]  }
 0x179   :  { %v622_v12 = vadd.f32 %v7229_v47, %v7228_v43  ;;  %v1280_v56 = vunpack.c.l.b16 %v864_v4  ;;  %v1325_v23 = vrot.slane %v1250_v44, 7  ;;  %v1333_v33 = vrot.slane %v1274_v24, 3  ;;  %2917 = vmatprep.subr.bf16.mxu0 %v5721_v10  ;;  %v5724_v0 = vld [vmem:[#allocation7 + $0x12c] ss:$24 sps:$4 sm:$0xff]   ;;  %v5731_v18 = vld [vmem:[#allocation7 + $0x6c0] ss:$24 sps:$4 sm:$0xff]  }
 0x17a   :  { %v663_v3 = vrot.slane %v7230_v50, 1  ;;  %v7231_v2 = vrot.slane %v6867_v15, 2  ;;  %v745_v20 = vrot.slane %v6886_v9, 2  ;;  %v1286_v16 = vunpack.c.l.b16 %v870_v13  ;;  %v5739_v47 = vld [vmem:[#allocation7 + $0x694] ss:$24 sps:$4 sm:$0xff]  }
 0x17b   :  { %v1326_v45 = vsel %vm1291_vm1, %v1325_v23, %v1244_v48  ;;  %v1335_v60 = vrot.slane %v1280_v56, 2  ;;  %v776_v54 = vmul.f32 %v6768_v41, %v7232_v28  ;;  %v790_v7 = vmul.f32 %v6787_v49, %v7233_v57 }
 0x17c   :  { %v704_v27 = vadd.f32 %v7231_v2, %v6867_v15  ;;  %v1328_v55 = vsel %vm1294_vm2, %v1327_v40, %v1326_v45  ;;  %v664_v36 = vadd.f32 %v663_v3, %v7230_v50  ;;  %v746_v29 = vadd.f32 %v745_v20, %v6886_v9  ;;  %2918 = vmatpush1.bf16.msra.mxu0 %v5719_v53  ;;  %v5725_v15 = vld [vmem:[#allocation7 + $0x6f0] ss:$24 sps:$4 sm:$0xff]  }
 0x17d   :  { %v1330_v39 = vsel %vm1297_vm3, %v1329_v32, %v1328_v55  ;;  %v1337_v62 = vrot.slane %v1286_v16, 1  ;;  %v797_v22 = vmul.f32 %v6782_v6, %v7234_v30  ;;  %v804_v46 = vmul.f32 %v6795_v63, %v622_v12  ;;  %2919 = vmatprep.subr.bf16.mxu0 %v5727_v14  ;;  %v7235_v40 = vld [vmem:[#allocation38_spill] sm:$0xff]  ;;  %v5722_v55 = vld [vmem:[#allocation7 + $0x128] ss:$24 sps:$4 sm:$0xff]  }
 0x17e   :  { %v705_v17 = vrot.slane %v704_v27, 1  ;;  %v1332_v34 = vsel %vm1300_vm4, %v1331_v42, %v1330_v39  ;;  %v747_v9 = vrot.slane %v746_v29, 1  ;;  %v811_v4 = vmul.f32 %v6797_v5, %v664_v36  ;;  %v5730_v39 = vld [vmem:[#allocation7 + $0xfc] ss:$24 sps:$4 sm:$0xff]  }
 0x17f   :  { %v1334_v48 = vsel %vm1303_vm5, %v1333_v33, %v1332_v34  ;;  %v831_v26 = vpack.c.bf16 %v776_v54, %v776_v54  ;;  %v843_v44 = vpack.c.bf16 %v790_v7, %v790_v7  ;;  %v849_v19 = vpack.c.bf16 %v797_v22, %v797_v22  ;;  %v5728_v7 = vld [vmem:[#allocation7 + $0xf8] ss:$24 sps:$4 sm:$0xff]   ;;  %v7237_v34 = vld [vmem:[#allocation32_spill] sm:$0xff] }
 0x180   :  { %v706_v10 = vadd.f32 %v705_v17, %v704_v27  ;;  %v1336_v35 = vsel %vm1306_vm6, %v1335_v60, %v1334_v48  ;;  %v748_v8 = vadd.f32 %v747_v9, %v746_v29  ;;  %v855_v43 = vpack.c.bf16 %v804_v46, %v804_v46  ;;  %2920 = vmatpush1.bf16.msra.mxu0 %v5725_v15  ;;  %v5737_v17 = vld [vmem:[#allocation7 + $0x690] ss:$24 sps:$4 sm:$0xff]   ;;  %v5745_v15 = vld [vmem:[#allocation7 + $0x664] ss:$24 sps:$4 sm:$0xff]   ;;  %v5743_v9 = vld [vmem:[#allocation7 + $0x660] ss:$24 sps:$4 sm:$0xff]  }
 0x181   :  { %v1338_v6 = vsel %vm1309_vm7, %v1337_v62, %v1336_v35  ;;  %v861_v56 = vpack.c.bf16 %v811_v4, %v811_v4  ;;  %v1247_v23 = vunpack.c.l.b16 %v831_v26  ;;  %v7236_v32 = vpack.c.bf16 %v7235_v40, %v7235_v40  ;;  %2921 = vmatprep.subr.bf16.mxu0 %v5733_v38  ;;  %v7238_v46 = vld [vmem:[#allocation29_spill] sm:$0xff]  ;;  %v7240_v35 = vld [vmem:[#allocation39_spill] sm:$0xff] }
 0x182   :  { %v818_v24 = vmul.f32 %v6799_v21, %v706_v10  ;;  %v7025_v12 = vpack.c.b16 %v1338_v6, %v1338_v6  ;;  %v825_v13 = vmul.f32 %v6801_v51, %v748_v8  ;;  %v1259_v33 = vunpack.c.l.b16 %v843_v44  ;;  %v5736_v10 = vld [vmem:[#allocation7 + $0xcc] ss:$24 sps:$4 sm:$0xff]   ;;  %v7241_v6 = vld [vmem:[#allocation36_spill] sm:$0xff]  ;;  %v5749_v40 = vld [vmem:[#allocation7 + $0x630] ss:$24 sps:$4 sm:$0xff]  }
 0x183   :  { %v1253_v53 = vunpack.c.l.b16 %v7236_v32  ;;  %v1265_v50 = vunpack.c.l.b16 %v849_v19  ;;  %v1271_v3 = vunpack.c.l.b16 %v855_v43  ;;  %v1277_v14 = vunpack.c.l.b16 %v861_v56  ;;  %v5734_v56 = vld [vmem:[#allocation7 + $0xc8] ss:$24 sps:$4 sm:$0xff]  }
 0x184   :  { %v867_v42 = vpack.c.bf16 %v818_v24, %v818_v24  ;;  %2907 = vmatmul.mubr.bf16.vlgmr.msra.gmra.mxu1 %v7025_v12  ;;  %v699_v60 = vadd.f32 %v698_v61, %v6872_v1  ;;  %v873_v2 = vpack.c.bf16 %v825_v13, %v825_v13  ;;  %v1369_v20 = vrot.slane %v1259_v33, 6  ;;  %2922 = vmatpush1.bf16.msra.mxu0 %v5731_v18 }
 0x185   :  { %v1367_v45 = vrot.slane %v1253_v53, 7  ;;  %2957 = vmatpush1.bf16.msra.mxu1 %v5716_v11  ;;  %v1371_v16 = vrot.slane %v1265_v50, 5  ;;  %2988 = vmatprep.mubr.bf16.mxu1 %v6929_v52  ;;  %v1373_v28 = vrot.slane %v1271_v3, 4  ;;  %v1375_v54 = vrot.slane %v1277_v14, 3  ;;  %v7239_v11 = vld [vmem:[#allocation41_spill] sm:$0xff] }
 0x186   :  { %v1283_v27 = vunpack.c.l.b16 %v867_v42  ;;  %2958 = vmatprep.subr.bf16.mxu1 %v5724_v0  ;;  %v739_v61 = vadd.f32 %v738_v58, %v6884_v25  ;;  %v1289_v1 = vunpack.c.l.b16 %v873_v2  ;;  %2923 = vmatprep.subr.bf16.mxu0 %v5739_v47  ;;  %v775_v62 = vmul.f32 %v6768_v41, %v7237_v34  ;;  %v5757_v42 = vld [vmem:[#allocation7 + $0x604] ss:$24 sps:$4 sm:$0xff]  }
 0x187   :  { %v1368_v36 = vsel %vm1291_vm1, %v1367_v45, %v1247_v23  ;;  %v789_v38 = vmul.f32 %v6787_v49, %v7238_v46  ;;  %v803_v48 = vmul.f32 %v6795_v63, %v7239_v11  ;;  %v810_v4 = vmul.f32 %v6797_v5, %v6858_v31  ;;  %v5751_v49 = vld [vmem:[#allocation7 + $0x634] ss:$24 sps:$4 sm:$0xff]  }
 0x188   :  { %v1370_v29 = vsel %vm1294_vm2, %v1369_v20, %v1368_v36  ;;  %v1377_v57 = vrot.slane %v1283_v27, 2  ;;  %v740_v22 = vrot.slane %v739_v61, 1  ;;  %v1379_v58 = vrot.slane %v1289_v1, 1  ;;  %2924 = vmatpush1.bf16.msra.mxu0 %v5737_v17  ;;  %v5742_v23 = vld [vmem:[#allocation7 + $0x9c] ss:$24 sps:$4 sm:$0xff]  }
 0x189   :  { %v1372_v30 = vsel %vm1297_vm3, %v1371_v16, %v1370_v29  ;;  %2959 = vmatpush1.bf16.msra.mxu1 %v5722_v55  ;;  %v817_v41 = vmul.f32 %v6799_v21, %v699_v60  ;;  %v1353_v26 = vrot.slane %v7240_v35, 7  ;;  %v830_v63 = vpack.c.bf16 %v775_v62, %v775_v62  ;;  %2925 = vmatprep.subr.bf16.mxu0 %v5745_v15  ;;  %v5748_v55 = vld [vmem:[#allocation7 + $0x6c] ss:$24 sps:$4 sm:$0xff]   ;;  %v5755_v36 = vld [vmem:[#allocation7 + $0x600] ss:$24 sps:$4 sm:$0xff]  }
 0x18a   :  { %v1374_v25 = vsel %vm1300_vm4, %v1373_v28, %v1372_v30  ;;  %2960 = vmatprep.subr.bf16.mxu1 %v5730_v39  ;;  %v741_v19 = vadd.f32 %v740_v22, %v739_v61  ;;  %v842_v18 = vpack.c.bf16 %v789_v38, %v789_v38  ;;  %v848_v8 = vpack.c.bf16 %v7241_v6, %v7241_v6  ;;  %v5763_v39 = vld [vmem:[#allocation7 + $0x8d4] ss:$24 sps:$4 sm:$0xff]   ;;  %v5761_v15 = vld [vmem:[#allocation7 + $0x8d0] ss:$24 sps:$4 sm:$0xff]   ;;  %v5769_v62 = vld [vmem:[#allocation7 + $0x8a4] ss:$24 sps:$4 sm:$0xff]  }
 0x18b   :  { %v1376_v44 = vsel %vm1303_vm5, %v1375_v54, %v1374_v25  ;;  %v854_v24 = vpack.c.bf16 %v803_v48, %v803_v48  ;;  %v860_v31 = vpack.c.bf16 %v810_v4, %v810_v4  ;;  %v866_v43 = vpack.c.bf16 %v817_v41, %v817_v41  ;;  %v5752_v22 = vld [vmem:[#allocation7 + $0x38] ss:$24 sps:$4 sm:$0xff]   ;;  %v5760_v46 = vld [vmem:[#allocation7 + $0xc] ss:$24 sps:$4 sm:$0xff]   ;;  %v5758_v48 = vld [vmem:[#allocation7 + $0x8] ss:$24 sps:$4 sm:$0xff]  }
 0x18c   :  { %v1378_v0 = vsel %vm1306_vm6, %v1377_v57, %v1376_v44  ;;  %v824_v21 = vmul.f32 %v6801_v51, %v741_v19  ;;  %v1246_v32 = vunpack.c.l.b16 %v830_v63  ;;  %v1258_v53 = vunpack.c.l.b16 %v842_v18  ;;  %2926 = vmatpush1.bf16.msra.mxu0 %v5743_v9  ;;  %v5740_v51 = vld [vmem:[#allocation7 + $0x98] ss:$24 sps:$4 sm:$0xff]   ;;  %v5746_v57 = vld [vmem:[#allocation7 + $0x68] ss:$24 sps:$4 sm:$0xff]   ;;  %v5775_v11 = vld [vmem:[#allocation7 + $0x874] ss:$24 sps:$4 sm:$0xff]  }
 0x18d   :  { %v1380_v5 = vsel %vm1309_vm7, %v1379_v58, %v1378_v0  ;;  %2961 = vmatpush1.bf16.msra.mxu1 %v5728_v7  ;;  %v1264_v13 = vunpack.c.l.b16 %v848_v8  ;;  %v1270_v50 = vunpack.c.l.b16 %v854_v24  ;;  %v1276_v3 = vunpack.c.l.b16 %v860_v31  ;;  %2927 = vmatprep.subr.bf16.mxu0 %v5751_v49  ;;  %v5754_v7 = vld [vmem:[#allocation7 + $0x3c] ss:$24 sps:$4 sm:$0xff]   ;;  %v5767_v38 = vld [vmem:[#allocation7 + $0x8a0] ss:$24 sps:$4 sm:$0xff]   ;;  %v5773_v58 = vld [vmem:[#allocation7 + $0x870] ss:$24 sps:$4 sm:$0xff]  }
 0x18e   :  { %v7059_v47 = vpack.c.b16 %v1380_v5, %v1380_v5  ;;  %2962 = vmatprep.subr.bf16.mxu1 %v5736_v10  ;;  %v872_v33 = vpack.c.bf16 %v824_v21, %v824_v21  ;;  %v1282_v14 = vunpack.c.l.b16 %v866_v43  ;;  %v1354_v45 = vsel %vm1291_vm1, %v1353_v26, %v1246_v32  ;;  %v5766_v25 = vld [vmem:[#allocation7 + $0x2dc] ss:$24 sps:$4 sm:$0xff]   ;;  %v5764_v9 = vld [vmem:[#allocation7 + $0x2d8] ss:$24 sps:$4 sm:$0xff]   ;;  %v5772_v4 = vld [vmem:[#allocation7 + $0x2ac] ss:$24 sps:$4 sm:$0xff]  }
 0x18f   :  { %v1355_v60 = vrot.slane %v1258_v53, 6  ;;  %v1357_v27 = vrot.slane %v1264_v13, 5  ;;  %v1359_v20 = vrot.slane %v1270_v50, 4  ;;  %v1361_v16 = vrot.slane %v1276_v3, 3  ;;  %v5781_v10 = vld [vmem:[#allocation7 + $0x844] ss:$24 sps:$4 sm:$0xff]  }
 0x190   :  { %2947 = vmatprep.mubr.bf16.mxu0 %v7059_v47  ;;  %v1288_v2 = vunpack.c.l.b16 %v872_v33  ;;  %v1363_v54 = vrot.slane %v1282_v14, 2  ;;  %2928 = vmatpush1.bf16.msra.mxu0 %v5749_v40  ;;  %v5779_v41 = vld [vmem:[#allocation7 + $0x840] ss:$24 sps:$4 sm:$0xff]   ;;  %v5787_v35 = vld [vmem:[#allocation7 + $0x814] ss:$24 sps:$4 sm:$0xff]  }
 0x191   :  { %2963 = vmatpush1.bf16.msra.mxu1 %v5734_v56  ;;  %v1356_v28 = vsel %vm1294_vm2, %v1355_v60, %v1354_v45  ;;  %2929 = vmatprep.subr.bf16.mxu0 %v5757_v42  ;;  %v5770_v26 = vld [vmem:[#allocation7 + $0x2a8] ss:$24 sps:$4 sm:$0xff]   ;;  %v5778_v44 = vld [vmem:[#allocation7 + $0x27c] ss:$24 sps:$4 sm:$0xff]   ;;  %v5776_v63 = vld [vmem:[#allocation7 + $0x278] ss:$24 sps:$4 sm:$0xff]  }
 0x192   :  { %2964 = vmatprep.subr.bf16.mxu1 %v5742_v23  ;;  %v1358_v17 = vsel %vm1297_vm3, %v1357_v27, %v1356_v28  ;;  %v1365_v61 = vrot.slane %v1288_v2, 1  ;;  %v5785_v49 = vld [vmem:[#allocation7 + $0x810] ss:$24 sps:$4 sm:$0xff]   ;;  %v5793_v19 = vld [vmem:[#allocation7 + $0x7e4] ss:$24 sps:$4 sm:$0xff]  }
 0x193   :  { %v1360_v1 = vsel %vm1300_vm4, %v1359_v20, %v1358_v17  ;;  %v5784_v0 = vld [vmem:[#allocation7 + $0x24c] ss:$24 sps:$4 sm:$0xff]   ;;  %v5791_v18 = vld [vmem:[#allocation7 + $0x7e0] ss:$24 sps:$4 sm:$0xff]   ;;  %v5790_v24 = vld [vmem:[#allocation7 + $0x21c] ss:$24 sps:$4 sm:$0xff]  }
 0x194   :  { %v1362_v29 = vsel %vm1303_vm5, %v1361_v16, %v1360_v1  ;;  %2930 = vmatpush1.bf16.msra.mxu0 %v5755_v36  ;;  %v5799_v6 = vld [vmem:[#allocation7 + $0x7b4] ss:$24 sps:$4 sm:$0xff]   ;;  %v5782_v8 = vld [vmem:[#allocation7 + $0x248] ss:$24 sps:$4 sm:$0xff]   ;;  %v5805_v21 = vld [vmem:[#allocation7 + $0x784] ss:$24 sps:$4 sm:$0xff]  }
 0x195   :  { %2965 = vmatpush1.bf16.msra.mxu1 %v5740_v51  ;;  %v1364_v34 = vsel %vm1306_vm6, %v1363_v54, %v1362_v29  ;;  %2931 = vmatprep.subr.bf16.mxu0 %v5763_v39  ;;  %v5797_v5 = vld [vmem:[#allocation7 + $0x7b0] ss:$24 sps:$4 sm:$0xff]   ;;  %v5796_v43 = vld [vmem:[#allocation7 + $0x1ec] ss:$24 sps:$4 sm:$0xff]   ;;  %v5803_v56 = vld [vmem:[#allocation7 + $0x780] ss:$24 sps:$4 sm:$0xff]  }
 0x196   :  { %2966 = vmatprep.subr.bf16.mxu1 %v5748_v55  ;;  %v7069_v30 = vsel %vm1309_vm7, %v1365_v61, %v1364_v34  ;;  %v5788_v31 = vld [vmem:[#allocation7 + $0x218] ss:$24 sps:$4 sm:$0xff]   ;;  %v5811_v23 = vld [vmem:[#allocation7 + $0x45c] ss:$24 sps:$4 sm:$0xff]   ;;  %v5794_v40 = vld [vmem:[#allocation7 + $0x1e8] ss:$24 sps:$4 sm:$0xff]  }
 0x197   :  { %v5802_v32 = vld [vmem:[#allocation7 + $0x1bc] ss:$24 sps:$4 sm:$0xff]   ;;  %v5809_v53 = vld [vmem:[#allocation7 + $0x458] ss:$24 sps:$4 sm:$0xff]   ;;  %v7073_v13 = vpack.c.b16 %v7069_v30, %v7069_v30  ;;  %v5817_v42 = vld [vmem:[#allocation7 + $0x42c] ss:$24 sps:$4 sm:$0xff]  }
 0x198   :  { %2932 = vmatpush2.bf16.msra.mxu0 %v5761_v15  ;;  %v5800_v33 = vld [vmem:[#allocation7 + $0x1b8] ss:$24 sps:$4 sm:$0xff]   ;;  %v5808_v50 = vld [vmem:[#allocation7 + $0x18c] ss:$24 sps:$4 sm:$0xff]   ;;  %v5815_v3 = vld [vmem:[#allocation7 + $0x428] ss:$24 sps:$4 sm:$0xff]  }
 0x199   :  { %2967 = vmatpush1.bf16.msra.mxu1 %v5746_v57  ;;  %2933 = vmatprep.subr.bf16.mxu0 %v5769_v62  ;;  %v5823_v14 = vld [vmem:[#allocation7 + $0x3fc] ss:$24 sps:$4 sm:$0xff]   ;;  %v5806_v51 = vld [vmem:[#allocation7 + $0x188] ss:$24 sps:$4 sm:$0xff]   ;;  %v5821_v60 = vld [vmem:[#allocation7 + $0x3f8] ss:$24 sps:$4 sm:$0xff]  }
 0x19a   :  { %2968 = vmatprep.subr.bf16.mxu1 %v5754_v7  ;;  %v5814_v45 = vld [vmem:[#allocation7 + $0x75c] ss:$24 sps:$4 sm:$0xff]   ;;  %v5829_v2 = vld [vmem:[#allocation7 + $0x3cc] ss:$24 sps:$4 sm:$0xff]   ;;  %v5812_v27 = vld [vmem:[#allocation7 + $0x758] ss:$24 sps:$4 sm:$0xff]  }
 0x19b   :  { %v5820_v20 = vld [vmem:[#allocation7 + $0x72c] ss:$24 sps:$4 sm:$0xff]   ;;  %v5827_v16 = vld [vmem:[#allocation7 + $0x3c8] ss:$24 sps:$4 sm:$0xff]   ;;  %v5835_v55 = vld [vmem:[#allocation7 + $0x39c] ss:$24 sps:$4 sm:$0xff]  }
 0x19c   :  { %2934 = vmatpush2.bf16.msra.mxu0 %v5767_v38  ;;  %v5818_v36 = vld [vmem:[#allocation7 + $0x728] ss:$24 sps:$4 sm:$0xff]   ;;  %v5826_v28 = vld [vmem:[#allocation7 + $0x6fc] ss:$24 sps:$4 sm:$0xff]   ;;  %v5833_v54 = vld [vmem:[#allocation7 + $0x398] ss:$24 sps:$4 sm:$0xff]  }
 0x19d   :  { %2969 = vmatpush1.bf16.msra.mxu1 %v5752_v22  ;;  %2935 = vmatprep.subr.bf16.mxu0 %v5775_v11  ;;  %v5841_v39 = vld [vmem:[#allocation7 + $0x36c] ss:$24 sps:$4 sm:$0xff]   ;;  %v5824_v17 = vld [vmem:[#allocation7 + $0x6f8] ss:$24 sps:$4 sm:$0xff]   ;;  %v5839_v1 = vld [vmem:[#allocation7 + $0x368] ss:$24 sps:$4 sm:$0xff]  }
 0x19e   :  { %2970 = vmatprep.subr.bf16.mxu1 %v5760_v46  ;;  %v5832_v61 = vld [vmem:[#allocation7 + $0x6cc] ss:$24 sps:$4 sm:$0xff]   ;;  %v5847_v29 = vld [vmem:[#allocation7 + $0x33c] ss:$24 sps:$4 sm:$0xff]   ;;  %v5830_v57 = vld [vmem:[#allocation7 + $0x6c8] ss:$24 sps:$4 sm:$0xff]  }
 0x19f   :  { %v5838_v7 = vld [vmem:[#allocation7 + $0x69c] ss:$24 sps:$4 sm:$0xff]   ;;  %v5845_v15 = vld [vmem:[#allocation7 + $0x338] ss:$24 sps:$4 sm:$0xff]   ;;  %v5853_v34 = vld [vmem:[#allocation7 + $0x30c] ss:$24 sps:$4 sm:$0xff]  }
 0x1a0   :  { %2936 = vmatpush2.bf16.msra.mxu0 %v5773_v58  ;;  %v5836_v62 = vld [vmem:[#allocation7 + $0x698] ss:$24 sps:$4 sm:$0xff]   ;;  %v5844_v30 = vld [vmem:[#allocation7 + $0x66c] ss:$24 sps:$4 sm:$0xff]   ;;  %v5851_v22 = vld [vmem:[#allocation7 + $0x308] ss:$24 sps:$4 sm:$0xff]  }
 0x1a1   :  { %2971 = vmatpush1.bf16.msra.mxu1 %v5758_v48  ;;  %2937 = vmatprep.subr.bf16.mxu0 %v5781_v10  ;;  %v5859_v46 = vld [vmem:[#allocation7 + $0x5dc] ss:$24 sps:$4 sm:$0xff]   ;;  %v5842_v38 = vld [vmem:[#allocation7 + $0x668] ss:$24 sps:$4 sm:$0xff]   ;;  %v5857_v48 = vld [vmem:[#allocation7 + $0x5d8] ss:$24 sps:$4 sm:$0xff]  }
 0x1a2   :  { %2972 = vmatprep.subr.bf16.mxu1 %v5766_v25  ;;  %v5850_v11 = vld [vmem:[#allocation7 + $0x63c] ss:$24 sps:$4 sm:$0xff]   ;;  %v5865_v25 = vld [vmem:[#allocation7 + $0x5ac] ss:$24 sps:$4 sm:$0xff]   ;;  %v5848_v58 = vld [vmem:[#allocation7 + $0x638] ss:$24 sps:$4 sm:$0xff]  }
 0x1a3   :  { %v5856_v10 = vld [vmem:[#allocation7 + $0x60c] ss:$24 sps:$4 sm:$0xff]  }
 0x1a4   :  { %2938 = vmatpush2.bf16.msra.mxu0 %v5779_v41  ;;  %v5854_v41 = vld [vmem:[#allocation7 + $0x608] ss:$24 sps:$4 sm:$0xff]  }
 0x1a5   :  { %2973 = vmatpush2.bf16.msra.mxu1 %v5764_v9  ;;  %2939 = vmatprep.subr.bf16.mxu0 %v5787_v35  ;;  %v5863_v9 = vld [vmem:[#allocation7 + $0x5a8] ss:$24 sps:$4 sm:$0xff]   ;;  %v5862_v35 = vld [vmem:[#allocation7 + $0x8dc] ss:$24 sps:$4 sm:$0xff]  }
 0x1a6   :  { %2974 = vmatprep.subr.bf16.mxu1 %v5772_v4  ;;  %v5871_v4 = vld [vmem:[#allocation7 + $0x57c] ss:$24 sps:$4 sm:$0xff]  }
 0x1a8   :  { %2940 = vmatpush2.bf16.msra.mxu0 %v5785_v49  ;;  %v5860_v49 = vld [vmem:[#allocation7 + $0x8d8] ss:$24 sps:$4 sm:$0xff]  }
 0x1a9   :  { %2975 = vmatpush2.bf16.msra.mxu1 %v5770_v26  ;;  %2941 = vmatprep.subr.bf16.mxu0 %v5793_v19  ;;  %v5869_v26 = vld [vmem:[#allocation7 + $0x578] ss:$24 sps:$4 sm:$0xff]   ;;  %v5868_v19 = vld [vmem:[#allocation7 + $0x8ac] ss:$24 sps:$4 sm:$0xff]  }
 0x1aa   :  { %2976 = vmatprep.subr.bf16.mxu1 %v5778_v44  ;;  %v5877_v44 = vld [vmem:[#allocation7 + $0x54c] ss:$24 sps:$4 sm:$0xff]  }
 0x1ac   :  { %2942 = vmatpush2.bf16.msra.mxu0 %v5791_v18  ;;  %v5866_v18 = vld [vmem:[#allocation7 + $0x8a8] ss:$24 sps:$4 sm:$0xff]  }
 0x1ad   :  { %2977 = vmatpush2.bf16.msra.mxu1 %v5776_v63  ;;  %2943 = vmatprep.subr.bf16.mxu0 %v5799_v6  ;;  %v5875_v63 = vld [vmem:[#allocation7 + $0x548] ss:$24 sps:$4 sm:$0xff]   ;;  %v5874_v6 = vld [vmem:[#allocation7 + $0x87c] ss:$24 sps:$4 sm:$0xff]  }
 0x1ae   :  { %2978 = vmatprep.subr.bf16.mxu1 %v5784_v0  ;;  %v5883_v0 = vld [vmem:[#allocation7 + $0x51c] ss:$24 sps:$4 sm:$0xff]  }
 0x1b0   :  { %2944 = vmatpush2.bf16.msra.mxu0 %v5797_v5  ;;  %v5872_v5 = vld [vmem:[#allocation7 + $0x878] ss:$24 sps:$4 sm:$0xff]  }
 0x1b1   :  { %2979 = vmatpush2.bf16.msra.mxu1 %v5782_v8  ;;  %2945 = vmatprep.subr.bf16.mxu0 %v5805_v21  ;;  %v5881_v8 = vld [vmem:[#allocation7 + $0x518] ss:$24 sps:$4 sm:$0xff]   ;;  %v5880_v21 = vld [vmem:[#allocation7 + $0x84c] ss:$24 sps:$4 sm:$0xff]  }
 0x1b2   :  { %2980 = vmatprep.subr.bf16.mxu1 %v5790_v24  ;;  %v5889_v24 = vld [vmem:[#allocation7 + $0x4ec] ss:$24 sps:$4 sm:$0xff]  }
 0x1b4   :  { %2946 = vmatpush2.bf16.msra.mxu0 %v5803_v56  ;;  %v5878_v56 = vld [vmem:[#allocation7 + $0x848] ss:$24 sps:$4 sm:$0xff]  }
 0x1b5   :  { %2981 = vmatpush2.bf16.msra.mxu1 %v5788_v31  ;;  %2997 = vmatprep.subr.bf16.mxu0 %v5811_v23  ;;  %v5887_v31 = vld [vmem:[#allocation7 + $0x4e8] ss:$24 sps:$4 sm:$0xff]   ;;  %v5886_v23 = vld [vmem:[#allocation7 + $0x81c] ss:$24 sps:$4 sm:$0xff]  }
 0x1b6   :  { %2982 = vmatprep.subr.bf16.mxu1 %v5796_v43  ;;  %v5895_v43 = vld [vmem:[#allocation7 + $0x4bc] ss:$24 sps:$4 sm:$0xff]  }
 0x1b7   :  { %2948 = vmatmul.mubr.bf16.vlgmr.msra.gmra.mxu0 %v7073_v13 }
 0x1b8   :  { %2998 = vmatpush1.bf16.msra.mxu0 %v5809_v53  ;;  %3029 = vmatprep.mubr.bf16.mxu0 %v6959_v59  ;;  %v5884_v53 = vld [vmem:[#allocation7 + $0x818] ss:$24 sps:$4 sm:$0xff]  }
 0x1b9   :  { %2983 = vmatpush2.bf16.msra.mxu1 %v5794_v40  ;;  %2999 = vmatprep.subr.bf16.mxu0 %v5817_v42  ;;  %v5893_v40 = vld [vmem:[#allocation7 + $0x4b8] ss:$24 sps:$4 sm:$0xff]   ;;  %v5892_v42 = vld [vmem:[#allocation7 + $0x7ec] ss:$24 sps:$4 sm:$0xff]  }
 0x1ba   :  { %2984 = vmatprep.subr.bf16.mxu1 %v5802_v32  ;;  %v5901_v32 = vld [vmem:[#allocation7 + $0x48c] ss:$24 sps:$4 sm:$0xff]  }
 0x1bc   :  { %3000 = vmatpush1.bf16.msra.mxu0 %v5815_v3  ;;  %v5890_v3 = vld [vmem:[#allocation7 + $0x7e8] ss:$24 sps:$4 sm:$0xff]  }
 0x1bd   :  { %2985 = vmatpush2.bf16.msra.mxu1 %v5800_v33  ;;  %3001 = vmatprep.subr.bf16.mxu0 %v5823_v14  ;;  %v5899_v33 = vld [vmem:[#allocation7 + $0x488] ss:$24 sps:$4 sm:$0xff]   ;;  %v5898_v14 = vld [vmem:[#allocation7 + $0x7bc] ss:$24 sps:$4 sm:$0xff]  }
 0x1be   :  { %2986 = vmatprep.subr.bf16.mxu1 %v5808_v50  ;;  %v5907_v50 = vld [vmem:[#allocation7 + $0x164] ss:$24 sps:$4 sm:$0xff]  }
 0x1c0   :  { %3002 = vmatpush1.bf16.msra.mxu0 %v5821_v60  ;;  %v5896_v60 = vld [vmem:[#allocation7 + $0x7b8] ss:$24 sps:$4 sm:$0xff]  }
 0x1c1   :  { %2987 = vmatpush2.bf16.msra.mxu1 %v5806_v51  ;;  %3003 = vmatprep.subr.bf16.mxu0 %v5829_v2  ;;  %v5905_v51 = vld [vmem:[#allocation7 + $0x160] ss:$24 sps:$4 sm:$0xff]   ;;  %v5904_v2 = vld [vmem:[#allocation7 + $0x78c] ss:$24 sps:$4 sm:$0xff]  }
 0x1c2   :  { %3038 = vmatprep.subr.bf16.mxu1 %v5814_v45  ;;  %v5913_v45 = vld [vmem:[#allocation7 + $0x134] ss:$24 sps:$4 sm:$0xff]  }
 0x1c4   :  { %2989 = vmatmul.mubr.bf16.vlgmr.msra.gmra.mxu1 %v6992_v37  ;;  %3004 = vmatpush1.bf16.msra.mxu0 %v5827_v16  ;;  %v5902_v16 = vld [vmem:[#allocation7 + $0x788] ss:$24 sps:$4 sm:$0xff]  }
 0x1c5   :  { %3039 = vmatpush1.bf16.msra.mxu1 %v5812_v27  ;;  %3070 = vmatprep.mubr.bf16.mxu1 %v7059_v47  ;;  %v5911_v27 = vld [vmem:[#allocation7 + $0x130] ss:$24 sps:$4 sm:$0xff]  }
 0x1c6   :  { %3040 = vmatprep.subr.bf16.mxu1 %v5820_v20  ;;  %3005 = vmatprep.subr.bf16.mxu0 %v5835_v55  ;;  %v5919_v20 = vld [vmem:[#allocation7 + $0x104] ss:$24 sps:$4 sm:$0xff]  }
 0x1c7   :  { %v5910_v55 = vld [vmem:[#allocation7 + $0x464] ss:$24 sps:$4 sm:$0xff]  }
 0x1c8   :  { %3006 = vmatpush1.bf16.msra.mxu0 %v5833_v54  ;;  %v5908_v54 = vld [vmem:[#allocation7 + $0x460] ss:$24 sps:$4 sm:$0xff]  }
 0x1c9   :  { %3041 = vmatpush1.bf16.msra.mxu1 %v5818_v36  ;;  %3007 = vmatprep.subr.bf16.mxu0 %v5841_v39  ;;  %v5917_v36 = vld [vmem:[#allocation7 + $0x100] ss:$24 sps:$4 sm:$0xff]   ;;  %v5916_v39 = vld [vmem:[#allocation7 + $0x434] ss:$24 sps:$4 sm:$0xff]  }
 0x1ca   :  { %3042 = vmatprep.subr.bf16.mxu1 %v5826_v28  ;;  %v5925_v28 = vld [vmem:[#allocation7 + $0xd4] ss:$24 sps:$4 sm:$0xff]  }
 0x1cc   :  { %3008 = vmatpush1.bf16.msra.mxu0 %v5839_v1  ;;  %v5922_v1 = vld [vmem:[#allocation7 + $0x404] ss:$24 sps:$4 sm:$0xff]  }
 0x1cd   :  { %3043 = vmatpush1.bf16.msra.mxu1 %v5824_v17  ;;  %3009 = vmatprep.subr.bf16.mxu0 %v5847_v29  ;;  %v5923_v17 = vld [vmem:[#allocation7 + $0xd0] ss:$24 sps:$4 sm:$0xff]   ;;  %v5929_v29 = vld [vmem:[#allocation7 + $0xa0] ss:$24 sps:$4 sm:$0xff]  }
 0x1ce   :  { %3044 = vmatprep.subr.bf16.mxu1 %v5832_v61  ;;  %v5931_v61 = vld [vmem:[#allocation7 + $0xa4] ss:$24 sps:$4 sm:$0xff]  }
 0x1d0   :  { %3010 = vmatpush1.bf16.msra.mxu0 %v5845_v15  ;;  %v5928_v15 = vld [vmem:[#allocation7 + $0x3d4] ss:$24 sps:$4 sm:$0xff]  }
 0x1d1   :  { %3045 = vmatpush1.bf16.msra.mxu1 %v5830_v57  ;;  %3011 = vmatprep.subr.bf16.mxu0 %v5853_v34  ;;  %v5937_v57 = vld [vmem:[#allocation7 + $0x74] ss:$24 sps:$4 sm:$0xff]   ;;  %v5935_v34 = vld [vmem:[#allocation7 + $0x70] ss:$24 sps:$4 sm:$0xff]  }
 0x1d2   :  { %3046 = vmatprep.subr.bf16.mxu1 %v5838_v7  ;;  %v5920_v7 = vld [vmem:[#allocation7 + $0x400] ss:$24 sps:$4 sm:$0xff]  }
 0x1d4   :  { %3012 = vmatpush1.bf16.msra.mxu0 %v5851_v22  ;;  %v5934_v22 = vld [vmem:[#allocation7 + $0x3a4] ss:$24 sps:$4 sm:$0xff]  }
 0x1d5   :  { %3047 = vmatpush1.bf16.msra.mxu1 %v5836_v62  ;;  %3013 = vmatprep.subr.bf16.mxu0 %v5859_v46  ;;  %v5943_v62 = vld [vmem:[#allocation7 + $0x44] ss:$24 sps:$4 sm:$0xff]   ;;  %v5949_v46 = vld [vmem:[#allocation7 + $0x14] ss:$24 sps:$4 sm:$0xff]  }
 0x1d6   :  { %3048 = vmatprep.subr.bf16.mxu1 %v5844_v30  ;;  %v5926_v30 = vld [vmem:[#allocation7 + $0x3d0] ss:$24 sps:$4 sm:$0xff]  }
 0x1d8   :  { %3014 = vmatpush2.bf16.msra.mxu0 %v5857_v48  ;;  %v5947_v48 = vld [vmem:[#allocation7 + $0x10] ss:$24 sps:$4 sm:$0xff]  }
 0x1d9   :  { %3049 = vmatpush1.bf16.msra.mxu1 %v5842_v38  ;;  %3015 = vmatprep.subr.bf16.mxu0 %v5865_v25  ;;  %v5932_v38 = vld [vmem:[#allocation7 + $0x3a0] ss:$24 sps:$4 sm:$0xff]   ;;  %v5955_v25 = vld [vmem:[#allocation7 + $0x2e4] ss:$24 sps:$4 sm:$0xff]  }
 0x1da   :  { %3050 = vmatprep.subr.bf16.mxu1 %v5850_v11  ;;  %v5940_v11 = vld [vmem:[#allocation7 + $0x374] ss:$24 sps:$4 sm:$0xff]  }
 0x1dc   :  { %3016 = vmatpush2.bf16.msra.mxu0 %v5863_v9  ;;  %v5953_v9 = vld [vmem:[#allocation7 + $0x2e0] ss:$24 sps:$4 sm:$0xff]  }
 0x1dd   :  { %3051 = vmatpush1.bf16.msra.mxu1 %v5848_v58  ;;  %3017 = vmatprep.subr.bf16.mxu0 %v5871_v4  ;;  %v5938_v58 = vld [vmem:[#allocation7 + $0x370] ss:$24 sps:$4 sm:$0xff]   ;;  %v5961_v4 = vld [vmem:[#allocation7 + $0x2b4] ss:$24 sps:$4 sm:$0xff]  }
 0x1de   :  { %3052 = vmatprep.subr.bf16.mxu1 %v5856_v10  ;;  %v5946_v10 = vld [vmem:[#allocation7 + $0x344] ss:$24 sps:$4 sm:$0xff]  }
 0x1e0   :  { %3018 = vmatpush2.bf16.msra.mxu0 %v5869_v26  ;;  %v5959_v26 = vld [vmem:[#allocation7 + $0x2b0] ss:$24 sps:$4 sm:$0xff]  }
 0x1e1   :  { %3053 = vmatpush1.bf16.msra.mxu1 %v5854_v41  ;;  %3019 = vmatprep.subr.bf16.mxu0 %v5877_v44  ;;  %v5944_v41 = vld [vmem:[#allocation7 + $0x340] ss:$24 sps:$4 sm:$0xff]   ;;  %v5967_v44 = vld [vmem:[#allocation7 + $0x284] ss:$24 sps:$4 sm:$0xff]  }
 0x1e2   :  { %3054 = vmatprep.subr.bf16.mxu1 %v5862_v35  ;;  %v5952_v35 = vld [vmem:[#allocation7 + $0x314] ss:$24 sps:$4 sm:$0xff]  }
 0x1e4   :  { %3020 = vmatpush2.bf16.msra.mxu0 %v5875_v63  ;;  %v5965_v63 = vld [vmem:[#allocation7 + $0x280] ss:$24 sps:$4 sm:$0xff]  }
 0x1e5   :  { %3055 = vmatpush2.bf16.msra.mxu1 %v5860_v49  ;;  %3021 = vmatprep.subr.bf16.mxu0 %v5883_v0  ;;  %v5950_v49 = vld [vmem:[#allocation7 + $0x310] ss:$24 sps:$4 sm:$0xff]   ;;  %v5973_v0 = vld [vmem:[#allocation7 + $0x254] ss:$24 sps:$4 sm:$0xff]  }
 0x1e6   :  { %3056 = vmatprep.subr.bf16.mxu1 %v5868_v19  ;;  %v5958_v19 = vld [vmem:[#allocation7 + $0x5e4] ss:$24 sps:$4 sm:$0xff]  }
 0x1e8   :  { %3022 = vmatpush2.bf16.msra.mxu0 %v5881_v8  ;;  %v5971_v8 = vld [vmem:[#allocation7 + $0x250] ss:$24 sps:$4 sm:$0xff]  }
 0x1e9   :  { %3057 = vmatpush2.bf16.msra.mxu1 %v5866_v18  ;;  %3023 = vmatprep.subr.bf16.mxu0 %v5889_v24  ;;  %v5956_v18 = vld [vmem:[#allocation7 + $0x5e0] ss:$24 sps:$4 sm:$0xff]   ;;  %v5979_v24 = vld [vmem:[#allocation7 + $0x224] ss:$24 sps:$4 sm:$0xff]  }
 0x1ea   :  { %3058 = vmatprep.subr.bf16.mxu1 %v5874_v6  ;;  %v5964_v6 = vld [vmem:[#allocation7 + $0x5b4] ss:$24 sps:$4 sm:$0xff]  }
 0x1ec   :  { %3024 = vmatpush2.bf16.msra.mxu0 %v5887_v31  ;;  %v5977_v31 = vld [vmem:[#allocation7 + $0x220] ss:$24 sps:$4 sm:$0xff]  }
 0x1ed   :  { %3059 = vmatpush2.bf16.msra.mxu1 %v5872_v5  ;;  %3025 = vmatprep.subr.bf16.mxu0 %v5895_v43  ;;  %v5962_v5 = vld [vmem:[#allocation7 + $0x5b0] ss:$24 sps:$4 sm:$0xff]   ;;  %v5985_v43 = vld [vmem:[#allocation7 + $0x1f4] ss:$24 sps:$4 sm:$0xff]  }
 0x1ee   :  { %3060 = vmatprep.subr.bf16.mxu1 %v5880_v21  ;;  %v5970_v21 = vld [vmem:[#allocation7 + $0x584] ss:$24 sps:$4 sm:$0xff]  }
 0x1f0   :  { %3026 = vmatpush2.bf16.msra.mxu0 %v5893_v40  ;;  %v5983_v40 = vld [vmem:[#allocation7 + $0x1f0] ss:$24 sps:$4 sm:$0xff]  }
 0x1f1   :  { %3061 = vmatpush2.bf16.msra.mxu1 %v5878_v56  ;;  %3027 = vmatprep.subr.bf16.mxu0 %v5901_v32  ;;  %v5968_v56 = vld [vmem:[#allocation7 + $0x580] ss:$24 sps:$4 sm:$0xff]   ;;  %v5991_v32 = vld [vmem:[#allocation7 + $0x1c4] ss:$24 sps:$4 sm:$0xff]  }
 0x1f2   :  { %3062 = vmatprep.subr.bf16.mxu1 %v5886_v23  ;;  %v5976_v23 = vld [vmem:[#allocation7 + $0x554] ss:$24 sps:$4 sm:$0xff]  }
 0x1f4   :  { %3028 = vmatpush2.bf16.msra.mxu0 %v5899_v33  ;;  %v5989_v33 = vld [vmem:[#allocation7 + $0x1c0] ss:$24 sps:$4 sm:$0xff]  }
 0x1f5   :  { %3063 = vmatpush2.bf16.msra.mxu1 %v5884_v53  ;;  %3079 = vmatprep.subr.bf16.mxu0 %v5907_v50  ;;  %v5974_v53 = vld [vmem:[#allocation7 + $0x550] ss:$24 sps:$4 sm:$0xff]   ;;  %v5997_v50 = vld [vmem:[#allocation7 + $0x194] ss:$24 sps:$4 sm:$0xff]  }
 0x1f6   :  { %3064 = vmatprep.subr.bf16.mxu1 %v5892_v42  ;;  %v5982_v42 = vld [vmem:[#allocation7 + $0x524] ss:$24 sps:$4 sm:$0xff]  }
 0x1f7   :  { %3030 = vmatmul.mubr.bf16.vlgmr.msra.gmra.mxu0 %v7025_v12 }
 0x1f8   :  { %3080 = vmatpush1.bf16.msra.mxu0 %v5905_v51  ;;  %3111 = vmatprep.mubr.bf16.mxu0 %v6929_v52  ;;  %v5914_v52 = vld [vmem:[#allocation7 + $0x430] ss:$24 sps:$4 sm:$0xff]  }
 0x1f9   :  { %3065 = vmatpush2.bf16.msra.mxu1 %v5890_v3  ;;  %3081 = vmatprep.subr.bf16.mxu0 %v5913_v45  ;;  %v5980_v3 = vld [vmem:[#allocation7 + $0x520] ss:$24 sps:$4 sm:$0xff]   ;;  %v5995_v51 = vld [vmem:[#allocation7 + $0x190] ss:$24 sps:$4 sm:$0xff]   ;;  %v6003_v45 = vld [vmem:[#allocation7 + $0x764] ss:$24 sps:$4 sm:$0xff]  }
 0x1fa   :  { %3066 = vmatprep.subr.bf16.mxu1 %v5898_v14  ;;  %v5988_v14 = vld [vmem:[#allocation7 + $0x4f4] ss:$24 sps:$4 sm:$0xff]  }
 0x1fc   :  { %3082 = vmatpush1.bf16.msra.mxu0 %v5911_v27  ;;  %v6001_v27 = vld [vmem:[#allocation7 + $0x760] ss:$24 sps:$4 sm:$0xff]  }
 0x1fd   :  { %3067 = vmatpush2.bf16.msra.mxu1 %v5896_v60  ;;  %3083 = vmatprep.subr.bf16.mxu0 %v5919_v20  ;;  %v5986_v60 = vld [vmem:[#allocation7 + $0x4f0] ss:$24 sps:$4 sm:$0xff]   ;;  %v6006_v20 = vld [vmem:[#allocation7 + $0x734] ss:$24 sps:$4 sm:$0xff]  }
 0x1fe   :  { %3068 = vmatprep.subr.bf16.mxu1 %v5904_v2  ;;  %v5994_v2 = vld [vmem:[#allocation7 + $0x4c4] ss:$24 sps:$4 sm:$0xff]  }
 0x200   :  { %3084 = vmatpush1.bf16.msra.mxu0 %v5917_v36  ;;  %v6000_v36 = vld [vmem:[#allocation7 + $0x494] ss:$24 sps:$4 sm:$0xff]  }
 0x201   :  { %3069 = vmatpush2.bf16.msra.mxu1 %v5902_v16  ;;  %3085 = vmatprep.subr.bf16.mxu0 %v5925_v28 }
 0x202   :  { %3120 = vmatprep.subr.bf16.mxu1 %v5910_v55  ;;  %v5992_v55 = vld [vmem:[#allocation7 + $0x4c0] ss:$24 sps:$4 sm:$0xff]  }
 0x204   :  { %3071 = vmatmul.mubr.bf16.vlgmr.msra.gmra.mxu1 %v7073_v13  ;;  %3086 = vmatpush1.bf16.msra.mxu0 %v5923_v17 }
 0x205   :  { %3121 = vmatpush1.bf16.msra.mxu1 %v5908_v54  ;;  %3152 = vmatprep.mubr.bf16.mxu1 %v6959_v59  ;;  %v5941_v59 = vld [vmem:[#allocation7 + $0x40] ss:$24 sps:$4 sm:$0xff]   ;;  %v6004_v54 = vld [vmem:[#allocation7 + $0x730] ss:$24 sps:$4 sm:$0xff]  }
 0x206   :  { %3122 = vmatprep.subr.bf16.mxu1 %v5916_v39  ;;  %3087 = vmatprep.subr.bf16.mxu0 %v5931_v61  ;;  %v6009_v39 = vld [vmem:[#allocation7 + $0x704] ss:$24 sps:$4 sm:$0xff]   ;;  %v5998_v61 = vld [vmem:[#allocation7 + $0x490] ss:$24 sps:$4 sm:$0xff]  }
 0x208   :  { %3088 = vmatpush1.bf16.msra.mxu0 %v5929_v29  ;;  %v6021_v29 = vld [vmem:[#allocation10 + $0xe4] ss:$16 sps:$4 sm:$0xff]  }
 0x209   :  { %3123 = vmatpush1.bf16.msra.mxu1 %v5914_v52  ;;  %3089 = vmatprep.subr.bf16.mxu0 %v5937_v57  ;;  %v6019_v57 = vld [vmem:[#allocation10 + $0xe0] ss:$16 sps:$4 sm:$0xff]  }
 0x20a   :  { %3124 = vmatprep.subr.bf16.mxu1 %v5922_v1  ;;  %v6007_v1 = vld [vmem:[#allocation7 + $0x700] ss:$24 sps:$4 sm:$0xff]  }
 0x20c   :  { %3090 = vmatpush1.bf16.msra.mxu0 %v5935_v34 }
 0x20d   :  { %3125 = vmatpush1.bf16.msra.mxu1 %v5920_v7  ;;  %3091 = vmatprep.subr.bf16.mxu0 %v5943_v62  ;;  %v6010_v7 = vld [vmem:[#allocation7 + $0x6d0] ss:$24 sps:$4 sm:$0xff]  }
 0x20e   :  { %3126 = vmatprep.subr.bf16.mxu1 %v5928_v15  ;;  %v6027_v15 = vld [vmem:[#allocation10 + $0xc4] ss:$16 sps:$4 sm:$0xff]   ;;  %v6025_v62 = vld [vmem:[#allocation10 + $0xc0] ss:$16 sps:$4 sm:$0xff]  }
 0x210   :  { %3092 = vmatpush1.bf16.msra.mxu0 %v5941_v59  ;;  %v6033_v59 = vld [vmem:[#allocation10 + $0xa4] ss:$16 sps:$4 sm:$0xff]  }
 0x211   :  { %3127 = vmatpush1.bf16.msra.mxu1 %v5926_v30  ;;  %3093 = vmatprep.subr.bf16.mxu0 %v5949_v46  ;;  %v6018_v46 = vld [vmem:[#allocation7 + $0x674] ss:$24 sps:$4 sm:$0xff]  }
 0x212   :  { %3128 = vmatprep.subr.bf16.mxu1 %v5934_v22  ;;  %v6013_v22 = vld [vmem:[#allocation7 + $0x6a0] ss:$24 sps:$4 sm:$0xff]  }
 0x214   :  { %3094 = vmatpush1.bf16.msra.mxu0 %v5947_v48 }
 0x215   :  { %3129 = vmatpush1.bf16.msra.mxu1 %v5932_v38  ;;  %3095 = vmatprep.subr.bf16.mxu0 %v5955_v25  ;;  %v6016_v25 = vld [vmem:[#allocation7 + $0x670] ss:$24 sps:$4 sm:$0xff]  }
 0x216   :  { %3130 = vmatprep.subr.bf16.mxu1 %v5940_v11  ;;  %v6031_v11 = vld [vmem:[#allocation10 + $0xa0] ss:$16 sps:$4 sm:$0xff]  }
 0x218   :  { %3096 = vmatpush2.bf16.msra.mxu0 %v5953_v9  ;;  %v6022_v9 = vld [vmem:[#allocation7 + $0x640] ss:$24 sps:$4 sm:$0xff]  }
 0x219   :  { %3131 = vmatpush1.bf16.msra.mxu1 %v5938_v58  ;;  %3097 = vmatprep.subr.bf16.mxu0 %v5961_v4  ;;  %v6024_v58 = vld [vmem:[#allocation7 + $0x644] ss:$24 sps:$4 sm:$0xff]  }
 0x21a   :  { %3132 = vmatprep.subr.bf16.mxu1 %v5946_v10  ;;  %v6037_v10 = vld [vmem:[#allocation10 + $0x80] ss:$16 sps:$4 sm:$0xff]   ;;  %v6045_v4 = vld [vmem:[#allocation10 + $0x64] ss:$16 sps:$4 sm:$0xff]  }
 0x21c   :  { %3098 = vmatpush2.bf16.msra.mxu0 %v5959_v26  ;;  %v6028_v26 = vld [vmem:[#allocation7 + $0x610] ss:$24 sps:$4 sm:$0xff]  }
 0x21d   :  { %3133 = vmatpush1.bf16.msra.mxu1 %v5944_v41  ;;  %3099 = vmatprep.subr.bf16.mxu0 %v5967_v44  ;;  %v6030_v41 = vld [vmem:[#allocation7 + $0x614] ss:$24 sps:$4 sm:$0xff]  }
 0x21e   :  { %3134 = vmatprep.subr.bf16.mxu1 %v5952_v35  ;;  %v6043_v35 = vld [vmem:[#allocation10 + $0x60] ss:$16 sps:$4 sm:$0xff]   ;;  %v6051_v44 = vld [vmem:[#allocation10 + $0x44] ss:$16 sps:$4 sm:$0xff]  }
 0x220   :  { %3100 = vmatpush2.bf16.msra.mxu0 %v5965_v63  ;;  %v6034_v63 = vld [vmem:[#allocation7 + $0x8e0] ss:$24 sps:$4 sm:$0xff]  }
 0x221   :  { %3135 = vmatpush1.bf16.msra.mxu1 %v5950_v49  ;;  %3101 = vmatprep.subr.bf16.mxu0 %v5973_v0  ;;  %v6036_v49 = vld [vmem:[#allocation7 + $0x8e4] ss:$24 sps:$4 sm:$0xff]  }
 0x222   :  { %3136 = vmatprep.subr.bf16.mxu1 %v5958_v19  ;;  %v6049_v19 = vld [vmem:[#allocation10 + $0x40] ss:$16 sps:$4 sm:$0xff]   ;;  %v6057_v0 = vld [vmem:[#allocation10 + $0x24] ss:$16 sps:$4 sm:$0xff]  }
 0x224   :  { %3102 = vmatpush2.bf16.msra.mxu0 %v5971_v8  ;;  %v6040_v8 = vld [vmem:[#allocation7 + $0x8b0] ss:$24 sps:$4 sm:$0xff]  }
 0x225   :  { %3137 = vmatpush2.bf16.msra.mxu1 %v5956_v18  ;;  %3103 = vmatprep.subr.bf16.mxu0 %v5979_v24  ;;  %v6042_v18 = vld [vmem:[#allocation7 + $0x8b4] ss:$24 sps:$4 sm:$0xff]  }
 0x226   :  { %3138 = vmatprep.subr.bf16.mxu1 %v5964_v6  ;;  %v6055_v6 = vld [vmem:[#allocation10 + $0x20] ss:$16 sps:$4 sm:$0xff]   ;;  %v6063_v24 = vld [vmem:[#allocation10 + $0x4] ss:$16 sps:$4 sm:$0xff]  }
 0x228   :  { %3104 = vmatpush2.bf16.msra.mxu0 %v5977_v31  ;;  %v6046_v31 = vld [vmem:[#allocation7 + $0x880] ss:$24 sps:$4 sm:$0xff]  }
 0x229   :  { %3139 = vmatpush2.bf16.msra.mxu1 %v5962_v5  ;;  %3105 = vmatprep.subr.bf16.mxu0 %v5985_v43  ;;  %v6048_v5 = vld [vmem:[#allocation7 + $0x884] ss:$24 sps:$4 sm:$0xff]  }
 0x22a   :  { %3140 = vmatprep.subr.bf16.mxu1 %v5970_v21  ;;  %v6061_v21 = vld [vmem:[#allocation10] ss:$16 sps:$4 sm:$0xff]   ;;  %v6069_v43 = vld [vmem:[#allocation10 + $0x1e4] ss:$16 sps:$4 sm:$0xff]  }
 0x22c   :  { %3106 = vmatpush2.bf16.msra.mxu0 %v5983_v40  ;;  %v6052_v40 = vld [vmem:[#allocation7 + $0x850] ss:$24 sps:$4 sm:$0xff]  }
 0x22d   :  { %3141 = vmatpush2.bf16.msra.mxu1 %v5968_v56  ;;  %3107 = vmatprep.subr.bf16.mxu0 %v5991_v32  ;;  %v6054_v56 = vld [vmem:[#allocation7 + $0x854] ss:$24 sps:$4 sm:$0xff]  }
 0x22e   :  { %3142 = vmatprep.subr.bf16.mxu1 %v5976_v23  ;;  %v6067_v23 = vld [vmem:[#allocation10 + $0x1e0] ss:$16 sps:$4 sm:$0xff]   ;;  %v6075_v32 = vld [vmem:[#allocation10 + $0x1c4] ss:$16 sps:$4 sm:$0xff]  }
 0x230   :  { %3108 = vmatpush2.bf16.msra.mxu0 %v5989_v33  ;;  %v6058_v33 = vld [vmem:[#allocation7 + $0x820] ss:$24 sps:$4 sm:$0xff]  }
 0x231   :  { %3143 = vmatpush2.bf16.msra.mxu1 %v5974_v53  ;;  %3109 = vmatprep.subr.bf16.mxu0 %v5997_v50  ;;  %v6060_v53 = vld [vmem:[#allocation7 + $0x824] ss:$24 sps:$4 sm:$0xff]  }
 0x232   :  { %3144 = vmatprep.subr.bf16.mxu1 %v5982_v42  ;;  %v6073_v42 = vld [vmem:[#allocation10 + $0x1c0] ss:$16 sps:$4 sm:$0xff]   ;;  %v6081_v50 = vld [vmem:[#allocation10 + $0x1a4] ss:$16 sps:$4 sm:$0xff]  }
 0x234   :  { %3110 = vmatpush2.bf16.msra.mxu0 %v5995_v51  ;;  %v6064_v51 = vld [vmem:[#allocation7 + $0x7f0] ss:$24 sps:$4 sm:$0xff]  }
 0x235   :  { %3145 = vmatpush2.bf16.msra.mxu1 %v5980_v3  ;;  %3161 = vmatprep.subr.bf16.mxu0 %v6003_v45  ;;  %v6066_v3 = vld [vmem:[#allocation7 + $0x7f4] ss:$24 sps:$4 sm:$0xff]  }
 0x236   :  { %3146 = vmatprep.subr.bf16.mxu1 %v5988_v14  ;;  %v6079_v14 = vld [vmem:[#allocation10 + $0x1a0] ss:$16 sps:$4 sm:$0xff]   ;;  %v6084_v45 = vld [vmem:[#allocation10 + $0x184] ss:$16 sps:$4 sm:$0xff]  }
 0x237   :  { %v7083_v16 = vpop.f32.mrf.mxu0  ;;  %3112 = vmatmul.mubr.bf16.vlgmr.msra.gmra.mxu0 %v6992_v37  ;;  %v6012_v37 = vld [vmem:[#allocation7 + $0x6d4] ss:$24 sps:$4 sm:$0xff]  }
 0x238   :  { %3162 = vmatpush1.bf16.msra.mxu0 %v6001_v27  ;;  %3193 = vmatprep.mubr.bf16.mxu0 %v7059_v47  ;;  %v6015_v47 = vld [vmem:[#allocation7 + $0x6a4] ss:$24 sps:$4 sm:$0xff]  }
 0x239   :  { %3147 = vmatpush2.bf16.msra.mxu1 %v5986_v60  ;;  %v7086_v28 = vpop.f32.mrf.mxu0  ;;  %3163 = vmatprep.subr.bf16.mxu0 %v6006_v20  ;;  %v6072_v60 = vld [vmem:[#allocation7 + $0x7c4] ss:$24 sps:$4 sm:$0xff]   ;;  %v6070_v20 = vld [vmem:[#allocation7 + $0x7c0] ss:$24 sps:$4 sm:$0xff]  }
 0x23a   :  { %3148 = vmatprep.subr.bf16.mxu1 %v5994_v2  ;;  %v7094_v2 = vld [vmem:[#allocation8] sm:$0x3f]  ;;  %v6082_v27 = vld [vmem:[#allocation10 + $0x180] ss:$16 sps:$4 sm:$0xff]  }
 0x23b   :  { %v2871_v17 = vpop.f32.mrf.mxu0 }
 0x23c   :  { %3164 = vmatpush1.bf16.msra.mxu0 %v6004_v54  ;;  %v7242_v54 = vld [vmem:[#allocation26_spill] sm:$0xff]  ;;  %v6085_v17 = vld [vmem:[#allocation10 + $0x160] ss:$16 sps:$4 sm:$0xff]  }
 0x23d   :  { %3149 = vmatpush2.bf16.msra.mxu1 %v5992_v55  ;;  %v2872_v52 = vpop.f32.mrf.mxu0  ;;  %3165 = vmatprep.subr.bf16.mxu0 %v6009_v39  ;;  %v6087_v55 = vld [vmem:[#allocation10 + $0x164] ss:$16 sps:$4 sm:$0xff]   ;;  %v1167_v39 = vrot.slane %v7094_v2, %v7242_v54 }
 0x23e   :  { %3150 = vmatprep.subr.bf16.mxu1 %v6000_v36  ;;  %v6078_v36 = vld [vmem:[#allocation7 + $0x794] ss:$24 sps:$4 sm:$0xff]  }
 0x240   :  { %3166 = vmatpush1.bf16.msra.mxu0 %v6007_v1  ;;  %v6076_v1 = vld [vmem:[#allocation7 + $0x790] ss:$24 sps:$4 sm:$0xff]  }
 0x241   :  { %3151 = vmatpush2.bf16.msra.mxu1 %v5998_v61  ;;  %3167 = vmatprep.subr.bf16.mxu0 %v6012_v37  ;;  %v7243_v61 = vld [vmem:[#allocation24_spill] sm:$0xff] }
 0x242   :  { %4388 = vmatprep.subr.bf16.mxu1 %v6021_v29  ;;  %v1171_v52 = vrot.slane %v7094_v2, %v7243_v61  ;;  %v6090_v29 = vld [vmem:[#allocation10 + $0x144] ss:$16 sps:$4 sm:$0xff]  }
 0x243   :  { %v6099_v37 = vld [vmem:[#allocation10 + $0x2e4] ss:$16 sps:$4 sm:$0xff]  }
 0x244   :  { %3153 = vmatmul.mubr.bf16.vlgmr.msra.gmra.mxu1 %v7025_v12  ;;  %v7090_v34 = vpop.f32.mrf.mxu1  ;;  %3168 = vmatpush1.bf16.msra.mxu0 %v6010_v7  ;;  %v6039_v12 = vld [vmem:[#allocation10 + $0x84] ss:$16 sps:$4 sm:$0xff]   ;;  %v6088_v7 = vld [vmem:[#allocation10 + $0x140] ss:$16 sps:$4 sm:$0xff]  }
 0x245   :  { %4389 = vmatpush1.bf16.msra.mxu1 %v6019_v57  ;;  %3169 = vmatprep.subr.bf16.mxu0 %v6015_v47  ;;  %v2868_v57 = vadd.f32 %v7083_v16, %v1167_v39  ;;  %v6093_v47 = vld [vmem:[#allocation10 + $0x124] ss:$16 sps:$4 sm:$0xff]   ;;  %v6133_v39 = vld [vmem:[#allocation10 + $0x360] ss:$16 sps:$4 sm:$0xff]  }
 0x246   :  { %v7092_v30 = vpop.f32.mrf.mxu1  ;;  %4390 = vmatprep.subr.bf16.mxu1 %v6027_v15  ;;  %v2870_v15 = vadd.f32 %v7086_v28, %v1171_v52  ;;  %v6100_v28 = vld [vmem:[#allocation10 + $0x2c0] ss:$16 sps:$4 sm:$0xff]  }
 0x247   :  { %v6217_v52 = vld [vmem:[#allocation10 + $0x460] ss:$16 sps:$4 sm:$0xff]  }
 0x248   :  { %v2912_v38 = vpop.f32.mrf.mxu1  ;;  %3170 = vmatpush1.bf16.msra.mxu0 %v6013_v22  ;;  %v6102_v22 = vld [vmem:[#allocation10 + $0x2c4] ss:$16 sps:$4 sm:$0xff]  }
 0x249   :  { %4391 = vmatpush1.bf16.msra.mxu1 %v6025_v62  ;;  %3171 = vmatprep.subr.bf16.mxu0 %v6018_v46  ;;  %v6097_v62 = vld [vmem:[#allocation10 + $0x2e0] ss:$16 sps:$4 sm:$0xff]  }
 0x24a   :  { %v2913_v48 = vpop.f32.mrf.mxu1  ;;  %4392 = vmatprep.subr.bf16.mxu1 %v6033_v59  ;;  %v2909_v59 = vadd.f32 %v7090_v34, %v2868_v57  ;;  %v6091_v38 = vld [vmem:[#allocation10 + $0x120] ss:$16 sps:$4 sm:$0xff]  }
 0x24b   :  { %v6096_v48 = vld [vmem:[#allocation10 + $0x104] ss:$16 sps:$4 sm:$0xff]   ;;  %v6094_v34 = vld [vmem:[#allocation10 + $0x100] ss:$16 sps:$4 sm:$0xff]  }
 0x24c   :  { %3172 = vmatpush1.bf16.msra.mxu0 %v6016_v25  ;;  %v6223_v57 = vld [vmem:[#allocation10 + $0x440] ss:$16 sps:$4 sm:$0xff]  }
 0x24d   :  { %4393 = vmatpush1.bf16.msra.mxu1 %v6031_v11  ;;  %3173 = vmatprep.subr.bf16.mxu0 %v6024_v58  ;;  %v2911_v11 = vadd.f32 %v7092_v30, %v2870_v15  ;;  %v6108_v30 = vld [vmem:[#allocation10 + $0x284] ss:$16 sps:$4 sm:$0xff]   ;;  %v6139_v15 = vld [vmem:[#allocation10 + $0x320] ss:$16 sps:$4 sm:$0xff]  }
 0x24e   :  { %4394 = vmatprep.subr.bf16.mxu1 %v6039_v12  ;;  %v6105_v12 = vld [vmem:[#allocation10 + $0x2a4] ss:$16 sps:$4 sm:$0xff]  }
 0x250   :  { %3174 = vmatpush1.bf16.msra.mxu0 %v6022_v9 }
 0x251   :  { %4395 = vmatpush1.bf16.msra.mxu1 %v6037_v10  ;;  %3175 = vmatprep.subr.bf16.mxu0 %v6030_v41  ;;  %v6111_v41 = vld [vmem:[#allocation10 + $0x264] ss:$16 sps:$4 sm:$0xff]  }
 0x252   :  { %4396 = vmatprep.subr.bf16.mxu1 %v6045_v4  ;;  %v6106_v4 = vld [vmem:[#allocation10 + $0x280] ss:$16 sps:$4 sm:$0xff]  }
 0x254   :  { %3176 = vmatpush1.bf16.msra.mxu0 %v6028_v26 }
 0x255   :  { %4397 = vmatpush1.bf16.msra.mxu1 %v6043_v35  ;;  %3177 = vmatprep.subr.bf16.mxu0 %v6036_v49  ;;  %v6114_v49 = vld [vmem:[#allocation10 + $0x244] ss:$16 sps:$4 sm:$0xff]  }
 0x256   :  { %4398 = vmatprep.subr.bf16.mxu1 %v6051_v44  ;;  %v6109_v44 = vld [vmem:[#allocation10 + $0x260] ss:$16 sps:$4 sm:$0xff]  }
 0x258   :  { %3178 = vmatpush2.bf16.msra.mxu0 %v6034_v63 }
 0x259   :  { %4399 = vmatpush1.bf16.msra.mxu1 %v6049_v19  ;;  %3179 = vmatprep.subr.bf16.mxu0 %v6042_v18  ;;  %v6112_v18 = vld [vmem:[#allocation10 + $0x240] ss:$16 sps:$4 sm:$0xff]  }
 0x25a   :  { %4400 = vmatprep.subr.bf16.mxu1 %v6057_v0 }
 0x25c   :  { %3180 = vmatpush2.bf16.msra.mxu0 %v6040_v8  ;;  %v6117_v8 = vld [vmem:[#allocation10 + $0x224] ss:$16 sps:$4 sm:$0xff]  }
 0x25d   :  { %4401 = vmatpush1.bf16.msra.mxu1 %v6055_v6  ;;  %3181 = vmatprep.subr.bf16.mxu0 %v6048_v5 }
 0x25e   :  { %4402 = vmatprep.subr.bf16.mxu1 %v6063_v24 }
 0x260   :  { %3182 = vmatpush2.bf16.msra.mxu0 %v6046_v31  ;;  %v6120_v31 = vld [vmem:[#allocation10 + $0x204] ss:$16 sps:$4 sm:$0xff]  }
 0x261   :  { %4403 = vmatpush1.bf16.msra.mxu1 %v6061_v21  ;;  %3183 = vmatprep.subr.bf16.mxu0 %v6054_v56  ;;  %v6115_v21 = vld [vmem:[#allocation10 + $0x220] ss:$16 sps:$4 sm:$0xff]   ;;  %v6123_v56 = vld [vmem:[#allocation10 + $0x3e4] ss:$16 sps:$4 sm:$0xff]  }
 0x262   :  { %4404 = vmatprep.subr.bf16.mxu1 %v6069_v43  ;;  %v6118_v43 = vld [vmem:[#allocation10 + $0x200] ss:$16 sps:$4 sm:$0xff]  }
 0x264   :  { %3184 = vmatpush2.bf16.msra.mxu0 %v6052_v40  ;;  %v6126_v40 = vld [vmem:[#allocation10 + $0x3c4] ss:$16 sps:$4 sm:$0xff]  }
 0x265   :  { %4405 = vmatpush2.bf16.msra.mxu1 %v6067_v23  ;;  %3185 = vmatprep.subr.bf16.mxu0 %v6060_v53  ;;  %v6121_v23 = vld [vmem:[#allocation10 + $0x3e0] ss:$16 sps:$4 sm:$0xff]   ;;  %v6195_v53 = vld [vmem:[#allocation10 + $0x4e4] ss:$16 sps:$4 sm:$0xff]  }
 0x266   :  { %4406 = vmatprep.subr.bf16.mxu1 %v6075_v32  ;;  %v6193_v32 = vld [vmem:[#allocation10 + $0x4e0] ss:$16 sps:$4 sm:$0xff]  }
 0x268   :  { %3186 = vmatpush2.bf16.msra.mxu0 %v6058_v33  ;;  %v6129_v33 = vld [vmem:[#allocation10 + $0x3a4] ss:$16 sps:$4 sm:$0xff]  }
 0x269   :  { %4407 = vmatpush2.bf16.msra.mxu1 %v6073_v42  ;;  %3187 = vmatprep.subr.bf16.mxu0 %v6066_v3  ;;  %v6124_v42 = vld [vmem:[#allocation10 + $0x3c0] ss:$16 sps:$4 sm:$0xff]   ;;  %v6201_v3 = vld [vmem:[#allocation10 + $0x4c4] ss:$16 sps:$4 sm:$0xff]  }
 0x26a   :  { %4408 = vmatprep.subr.bf16.mxu1 %v6081_v50  ;;  %v6199_v50 = vld [vmem:[#allocation10 + $0x4c0] ss:$16 sps:$4 sm:$0xff]  }
 0x26c   :  { %3188 = vmatpush2.bf16.msra.mxu0 %v6064_v51  ;;  %v6132_v51 = vld [vmem:[#allocation10 + $0x384] ss:$16 sps:$4 sm:$0xff]  }
 0x26d   :  { %4409 = vmatpush2.bf16.msra.mxu1 %v6079_v14  ;;  %3189 = vmatprep.subr.bf16.mxu0 %v6072_v60  ;;  %v6127_v14 = vld [vmem:[#allocation10 + $0x3a0] ss:$16 sps:$4 sm:$0xff]   ;;  %v6207_v60 = vld [vmem:[#allocation10 + $0x4a4] ss:$16 sps:$4 sm:$0xff]  }
 0x26e   :  { %4410 = vmatprep.subr.bf16.mxu1 %v6084_v45  ;;  %v6205_v45 = vld [vmem:[#allocation10 + $0x4a0] ss:$16 sps:$4 sm:$0xff]  }
 0x270   :  { %3190 = vmatpush2.bf16.msra.mxu0 %v6070_v20  ;;  %v6135_v20 = vld [vmem:[#allocation10 + $0x364] ss:$16 sps:$4 sm:$0xff]  }
 0x271   :  { %4411 = vmatpush2.bf16.msra.mxu1 %v6082_v27  ;;  %3191 = vmatprep.subr.bf16.mxu0 %v6078_v36  ;;  %v6130_v27 = vld [vmem:[#allocation10 + $0x380] ss:$16 sps:$4 sm:$0xff]   ;;  %v6213_v36 = vld [vmem:[#allocation10 + $0x484] ss:$16 sps:$4 sm:$0xff]  }
 0x272   :  { %4412 = vmatprep.subr.bf16.mxu1 %v6087_v55  ;;  %v6211_v55 = vld [vmem:[#allocation10 + $0x480] ss:$16 sps:$4 sm:$0xff]  }
 0x274   :  { %3192 = vmatpush2.bf16.msra.mxu0 %v6076_v1  ;;  %v6219_v1 = vld [vmem:[#allocation10 + $0x464] ss:$16 sps:$4 sm:$0xff]  }
 0x275   :  { %4413 = vmatpush2.bf16.msra.mxu1 %v6085_v17  ;;  %4429 = vmatprep.subr.bf16.mxu0 %v6099_v37  ;;  %v6138_v17 = vld [vmem:[#allocation10 + $0x344] ss:$16 sps:$4 sm:$0xff]  }
 0x276   :  { %4414 = vmatprep.subr.bf16.mxu1 %v6090_v29  ;;  %v6136_v29 = vld [vmem:[#allocation10 + $0x340] ss:$16 sps:$4 sm:$0xff]   ;;  %v6141_v37 = vld [vmem:[#allocation10 + $0x324] ss:$16 sps:$4 sm:$0xff]  }
 0x277   :  { %v2949_v46 = vpop.f32.mrf.mxu0  ;;  %3194 = vmatmul.mubr.bf16.vlgmr.msra.gmra.mxu0 %v7073_v13  ;;  %v6103_v13 = vld [vmem:[#allocation10 + $0x2a0] ss:$16 sps:$4 sm:$0xff]  }
 0x278   :  { %v2950_v16 = vadd.f32 %v2949_v46, %v2909_v59  ;;  %4430 = vmatpush1.bf16.msra.mxu0 %v6097_v62  ;;  %v6229_v62 = vld [vmem:[#allocation10 + $0x420] ss:$16 sps:$4 sm:$0xff]   ;;  %v6147_v46 = vld [vmem:[#allocation10 + $0xec] ss:$16 sps:$4 sm:$0xff]  }
 0x279   :  { %4415 = vmatpush2.bf16.msra.mxu1 %v6088_v7  ;;  %v2951_v25 = vpop.f32.mrf.mxu0  ;;  %4431 = vmatprep.subr.bf16.mxu0 %v6102_v22  ;;  %v6225_v7 = vld [vmem:[#allocation10 + $0x444] ss:$16 sps:$4 sm:$0xff]   ;;  %v6142_v59 = vld [vmem:[#allocation10 + $0x300] ss:$16 sps:$4 sm:$0xff]  }
 0x27a   :  { %4416 = vmatprep.subr.bf16.mxu1 %v6093_v47  ;;  %v2952_v58 = vadd.f32 %v2951_v25, %v2911_v11  ;;  %6385 = vtanh.f32 %v2950_v16  ;;  %v6144_v47 = vld [vmem:[#allocation10 + $0x304] ss:$16 sps:$4 sm:$0xff]   ;;  %v6241_v16 = vld [vmem:[#allocation10 + $0x5e0] ss:$16 sps:$4 sm:$0xff]  }
 0x27b   :  { %v2953_v10 = vpop.f32.mrf.mxu0  ;;  %v6231_v22 = vld [vmem:[#allocation10 + $0x424] ss:$16 sps:$4 sm:$0xff]  }
 0x27c   :  { %6387 = vtanh.f32 %v2952_v58  ;;  %4432 = vmatpush1.bf16.msra.mxu0 %v6100_v28  ;;  %v6237_v11 = vld [vmem:[#allocation10 + $0x404] ss:$16 sps:$4 sm:$0xff]   ;;  %v6247_v10 = vld [vmem:[#allocation10 + $0x5c0] ss:$16 sps:$4 sm:$0xff]  }
 0x27d   :  { %4417 = vmatpush2.bf16.msra.mxu1 %v6091_v38  ;;  %v2954_v9 = vpop.f32.mrf.mxu0  ;;  %4433 = vmatprep.subr.bf16.mxu0 %v6105_v12  ;;  %v6235_v38 = vld [vmem:[#allocation10 + $0x400] ss:$16 sps:$4 sm:$0xff]  }
 0x27e   :  { %4418 = vmatprep.subr.bf16.mxu1 %v6096_v48  ;;  %v6243_v48 = vld [vmem:[#allocation10 + $0x5e4] ss:$16 sps:$4 sm:$0xff]  }
 0x27f   :  { %v7244_v25 = vld [vmem:[#allocation25_spill] sm:$0xff] }
 0x280   :  { %4434 = vmatpush1.bf16.msra.mxu0 %v6103_v13  ;;  %v1175_v12 = vrot.slane %v7094_v2, %v7244_v25  ;;  %v7245_v13 = vld [vmem:[#allocation27_spill] sm:$0xff] }
 0x281   :  { %4419 = vmatpush2.bf16.msra.mxu1 %v6094_v34  ;;  %4435 = vmatprep.subr.bf16.mxu0 %v6108_v30  ;;  %v6249_v34 = vld [vmem:[#allocation10 + $0x5c4] ss:$16 sps:$4 sm:$0xff]   ;;  %v1179_v9 = vrot.slane %v7094_v2, %v7245_v13 }
 0x282   :  { %4470 = vmatprep.subr.bf16.mxu1 %v6195_v53  ;;  %v6279_v53 = vld [vmem:[#allocation10 + $0x524] ss:$16 sps:$4 sm:$0xff]  }
 0x284   :  { %v7105_v35 = vpop.f32.mrf.mxu1  ;;  %4436 = vmatpush1.bf16.msra.mxu0 %v6106_v4 }
 0x285   :  { %4437 = vmatprep.subr.bf16.mxu0 %v6111_v41  ;;  %v2991_v4 = vadd.f32 %v7105_v35, %v1175_v12  ;;  %v6267_v35 = vld [vmem:[#allocation10 + $0x564] ss:$16 sps:$4 sm:$0xff]  }
 0x286   :  { %v7107_v26 = vpop.f32.mrf.mxu1 }
 0x287   :  { %v6386_v63 = vpop.eup %6385 }
 0x288   :  { %v2994_v19 = vpop.f32.mrf.mxu1  ;;  %4438 = vmatpush1.bf16.msra.mxu0 %v6109_v44  ;;  %v7111_v5 = vpack.c.bf16 %v6386_v63, %v6386_v63  ;;  %v6253_v44 = vld [vmem:[#allocation10 + $0x5a0] ss:$16 sps:$4 sm:$0xff]  }
 0x289   :  { %v6388_v6 = vpop.eup %6387  ;;  %4439 = vmatprep.subr.bf16.mxu0 %v6114_v49  ;;  %v6255_v49 = vld [vmem:[#allocation10 + $0x5a4] ss:$16 sps:$4 sm:$0xff]   ;;  %v2993_v19 = vadd.f32 %v7107_v26, %v1179_v9  ;;  %v6183_v9 = vld [vmem:[#allocation10 + $0x16c] ss:$16 sps:$4 sm:$0xff]  }
 0x28a   :  { %v2995_v0 = vpop.f32.mrf.mxu1  ;;  %v7109_v24 = vpack.c.bf16 %v6388_v6, %v6388_v6  ;;  %v6273_v26 = vld [vmem:[#allocation10 + $0x544] ss:$16 sps:$4 sm:$0xff]  }
 0x28c   :  { %4420 = vmatprep.mubr.bf16.mxu1 %v7109_v24  ;;  %4440 = vmatpush1.bf16.msra.mxu0 %v6112_v18 }
 0x28d   :  { %4421 = vmatmul.mubr.bf16.vlgmr.msra.gmra.mxu1 %v7111_v5  ;;  %4441 = vmatprep.subr.bf16.mxu0 %v6117_v8 }
 0x28e   :  { %4471 = vmatpush1.bf16.msra.mxu1 %v6193_v32  ;;  %v6271_v32 = vld [vmem:[#allocation10 + $0x540] ss:$16 sps:$4 sm:$0xff]  }
 0x28f   :  { %4472 = vmatprep.subr.bf16.mxu1 %v6201_v3  ;;  %v6285_v3 = vld [vmem:[#allocation10 + $0x504] ss:$16 sps:$4 sm:$0xff]  }
 0x290   :  { %4442 = vmatpush1.bf16.msra.mxu0 %v6115_v21 }
 0x291   :  { %4443 = vmatprep.subr.bf16.mxu0 %v6120_v31 }
 0x292   :  { %4473 = vmatpush1.bf16.msra.mxu1 %v6199_v50 }
 0x293   :  { %4474 = vmatprep.subr.bf16.mxu1 %v6207_v60  ;;  %v6150_v60 = vld [vmem:[#allocation10 + $0xcc] ss:$16 sps:$4 sm:$0xff]  }
 0x294   :  { %4444 = vmatpush1.bf16.msra.mxu0 %v6118_v43 }
 0x295   :  { %4445 = vmatprep.subr.bf16.mxu0 %v6123_v56  ;;  %v6259_v56 = vld [vmem:[#allocation10 + $0x580] ss:$16 sps:$4 sm:$0xff]  }
 0x296   :  { %4475 = vmatpush1.bf16.msra.mxu1 %v6205_v45 }
 0x297   :  { %4476 = vmatprep.subr.bf16.mxu1 %v6213_v36  ;;  %v6153_v36 = vld [vmem:[#allocation10 + $0xac] ss:$16 sps:$4 sm:$0xff]  }
 0x298   :  { %4446 = vmatpush2.bf16.msra.mxu0 %v6121_v23  ;;  %v6261_v23 = vld [vmem:[#allocation10 + $0x584] ss:$16 sps:$4 sm:$0xff]  }
 0x299   :  { %4447 = vmatprep.subr.bf16.mxu0 %v6126_v40  ;;  %v6265_v40 = vld [vmem:[#allocation10 + $0x560] ss:$16 sps:$4 sm:$0xff]  }
 0x29a   :  { %4477 = vmatpush1.bf16.msra.mxu1 %v6211_v55  ;;  %v6148_v55 = vld [vmem:[#allocation10 + $0xc8] ss:$16 sps:$4 sm:$0xff]  }
 0x29b   :  { %4478 = vmatprep.subr.bf16.mxu1 %v6219_v1  ;;  %v6159_v1 = vld [vmem:[#allocation10 + $0x6c] ss:$16 sps:$4 sm:$0xff]  }
 0x29c   :  { %4448 = vmatpush2.bf16.msra.mxu0 %v6124_v42 }
 0x29d   :  { %4449 = vmatprep.subr.bf16.mxu0 %v6129_v33  ;;  %v6277_v33 = vld [vmem:[#allocation10 + $0x520] ss:$16 sps:$4 sm:$0xff]  }
 0x29e   :  { %4479 = vmatpush1.bf16.msra.mxu1 %v6217_v52  ;;  %v6154_v52 = vld [vmem:[#allocation10 + $0x88] ss:$16 sps:$4 sm:$0xff]  }
 0x29f   :  { %4480 = vmatprep.subr.bf16.mxu1 %v6225_v7  ;;  %v6163_v7 = vld [vmem:[#allocation10 + $0x28] ss:$16 sps:$4 sm:$0xff]  }
 0x2a0   :  { %4450 = vmatpush2.bf16.msra.mxu0 %v6127_v14 }
 0x2a1   :  { %4451 = vmatprep.subr.bf16.mxu0 %v6132_v51  ;;  %v6145_v51 = vld [vmem:[#allocation10 + $0xe8] ss:$16 sps:$4 sm:$0xff]  }
 0x2a2   :  { %4481 = vmatpush1.bf16.msra.mxu1 %v6223_v57  ;;  %v6160_v57 = vld [vmem:[#allocation10 + $0x48] ss:$16 sps:$4 sm:$0xff]  }
 0x2a3   :  { %4482 = vmatprep.subr.bf16.mxu1 %v6231_v22  ;;  %v6169_v22 = vld [vmem:[#allocation10 + $0x1e8] ss:$16 sps:$4 sm:$0xff]  }
 0x2a4   :  { %4452 = vmatpush2.bf16.msra.mxu0 %v6130_v27  ;;  %v6283_v27 = vld [vmem:[#allocation10 + $0x500] ss:$16 sps:$4 sm:$0xff]  }
 0x2a5   :  { %4453 = vmatprep.subr.bf16.mxu0 %v6135_v20  ;;  %v6291_v20 = vld [vmem:[#allocation10 + $0x2ec] ss:$16 sps:$4 sm:$0xff]  }
 0x2a6   :  { %4483 = vmatpush1.bf16.msra.mxu1 %v6229_v62  ;;  %v6171_v62 = vld [vmem:[#allocation10 + $0x1ec] ss:$16 sps:$4 sm:$0xff]  }
 0x2a7   :  { %4484 = vmatprep.subr.bf16.mxu1 %v6237_v11 }
 0x2a8   :  { %4454 = vmatpush2.bf16.msra.mxu0 %v6133_v39  ;;  %v6151_v39 = vld [vmem:[#allocation10 + $0xa8] ss:$16 sps:$4 sm:$0xff]  }
 0x2a9   :  { %4455 = vmatprep.subr.bf16.mxu0 %v6138_v17  ;;  %v6156_v17 = vld [vmem:[#allocation10 + $0x8c] ss:$16 sps:$4 sm:$0xff]  }
 0x2aa   :  { %4485 = vmatpush1.bf16.msra.mxu1 %v6235_v38  ;;  %v6172_v38 = vld [vmem:[#allocation10 + $0x1c8] ss:$16 sps:$4 sm:$0xff]  }
 0x2ab   :  { %4486 = vmatprep.subr.bf16.mxu1 %v6243_v48 }
 0x2ac   :  { %4456 = vmatpush2.bf16.msra.mxu0 %v6136_v29  ;;  %v6157_v29 = vld [vmem:[#allocation10 + $0x68] ss:$16 sps:$4 sm:$0xff]  }
 0x2ad   :  { %4457 = vmatprep.subr.bf16.mxu0 %v6141_v37  ;;  %v6162_v37 = vld [vmem:[#allocation10 + $0x4c] ss:$16 sps:$4 sm:$0xff]  }
 0x2ae   :  { %4487 = vmatpush2.bf16.msra.mxu1 %v6241_v16  ;;  %v6177_v16 = vld [vmem:[#allocation10 + $0x1ac] ss:$16 sps:$4 sm:$0xff]  }
 0x2af   :  { %4488 = vmatprep.subr.bf16.mxu1 %v6249_v34 }
 0x2b0   :  { %4458 = vmatpush2.bf16.msra.mxu0 %v6139_v15  ;;  %v6168_v15 = vld [vmem:[#allocation10 + $0xc] ss:$16 sps:$4 sm:$0xff]  }
 0x2b1   :  { %4459 = vmatprep.subr.bf16.mxu0 %v6144_v47  ;;  %v6166_v47 = vld [vmem:[#allocation10 + $0x8] ss:$16 sps:$4 sm:$0xff]  }
 0x2b2   :  { %4489 = vmatpush2.bf16.msra.mxu1 %v6247_v10  ;;  %v6178_v10 = vld [vmem:[#allocation10 + $0x188] ss:$16 sps:$4 sm:$0xff]  }
 0x2b3   :  { %4490 = vmatprep.subr.bf16.mxu1 %v6255_v49 }
 0x2b4   :  { %4460 = vmatpush2.bf16.msra.mxu0 %v6142_v59  ;;  %v6174_v59 = vld [vmem:[#allocation10 + $0x1cc] ss:$16 sps:$4 sm:$0xff]  }
 0x2b5   :  { %4511 = vmatprep.subr.bf16.mxu0 %v6147_v46 }
 0x2b6   :  { %4491 = vmatpush2.bf16.msra.mxu1 %v6253_v44  ;;  %v6186_v44 = vld [vmem:[#allocation10 + $0x14c] ss:$16 sps:$4 sm:$0xff]  }
 0x2b7   :  { %v3031_v28 = vpop.f32.mrf.mxu0  ;;  %4492 = vmatprep.subr.bf16.mxu1 %v6261_v23  ;;  %v6208_v23 = vld [vmem:[#allocation10 + $0x4a8] ss:$16 sps:$4 sm:$0xff]  }
 0x2b8   :  { %v3032_v63 = vadd.f32 %v3031_v28, %v2991_v4  ;;  %v6175_v28 = vld [vmem:[#allocation10 + $0x1a8] ss:$16 sps:$4 sm:$0xff]  }
 0x2b9   :  { %v3033_v58 = vpop.f32.mrf.mxu0  ;;  %v6181_v4 = vld [vmem:[#allocation10 + $0x168] ss:$16 sps:$4 sm:$0xff]  }
 0x2ba   :  { %v3034_v0 = vadd.f32 %v3033_v58, %v2993_v19  ;;  %4493 = vmatpush2.bf16.msra.mxu1 %v6259_v56  ;;  %v6180_v58 = vld [vmem:[#allocation10 + $0x18c] ss:$16 sps:$4 sm:$0xff]   ;;  %v6184_v19 = vld [vmem:[#allocation10 + $0x148] ss:$16 sps:$4 sm:$0xff]  }
 0x2bb   :  { %v3035_v30 = vpop.f32.mrf.mxu0  ;;  %4494 = vmatprep.subr.bf16.mxu1 %v6267_v35  ;;  %v6210_v56 = vld [vmem:[#allocation10 + $0x4ac] ss:$16 sps:$4 sm:$0xff]  }
 0x2bc   :  { %v6216_v35 = vld [vmem:[#allocation10 + $0x48c] ss:$16 sps:$4 sm:$0xff]  }
 0x2bd   :  { %v3036_v41 = vpop.f32.mrf.mxu0 }
 0x2be   :  { %4495 = vmatpush2.bf16.msra.mxu1 %v6265_v40  ;;  %v6214_v40 = vld [vmem:[#allocation10 + $0x488] ss:$16 sps:$4 sm:$0xff]  }
 0x2bf   :  { %4496 = vmatprep.subr.bf16.mxu1 %v6273_v26  ;;  %v6222_v26 = vld [vmem:[#allocation10 + $0x46c] ss:$16 sps:$4 sm:$0xff]  }
 0x2c2   :  { %4497 = vmatpush2.bf16.msra.mxu1 %v6271_v32  ;;  %v6220_v32 = vld [vmem:[#allocation10 + $0x468] ss:$16 sps:$4 sm:$0xff]  }
 0x2c3   :  { %4498 = vmatprep.subr.bf16.mxu1 %v6279_v53  ;;  %v6228_v53 = vld [vmem:[#allocation10 + $0x44c] ss:$16 sps:$4 sm:$0xff]  }
 0x2c4   :  { %v3072_v18 = vpop.f32.mrf.mxu1 }
 0x2c5   :  { %v3073_v6 = vadd.f32 %v3072_v18, %v3032_v63  ;;  %v6189_v63 = vld [vmem:[#allocation10 + $0x12c] ss:$16 sps:$4 sm:$0xff]  }
 0x2c6   :  { %v3074_v8 = vpop.f32.mrf.mxu1  ;;  %4499 = vmatpush2.bf16.msra.mxu1 %v6277_v33  ;;  %v6192_v18 = vld [vmem:[#allocation10 + $0x10c] ss:$16 sps:$4 sm:$0xff]   ;;  %v6232_v33 = vld [vmem:[#allocation10 + $0x428] ss:$16 sps:$4 sm:$0xff]  }
 0x2c7   :  { %v3075_v21 = vadd.f32 %v3074_v8, %v3034_v0  ;;  %6389 = vtanh.f32 %v3073_v6  ;;  %4500 = vmatprep.subr.bf16.mxu1 %v6285_v3  ;;  %v6187_v0 = vld [vmem:[#allocation10 + $0x128] ss:$16 sps:$4 sm:$0xff]   ;;  %v6198_v8 = vld [vmem:[#allocation10 + $0x4ec] ss:$16 sps:$4 sm:$0xff]  }
 0x2c8   :  { %v3076_v31 = vpop.f32.mrf.mxu1  ;;  %v6190_v6 = vld [vmem:[#allocation10 + $0x108] ss:$16 sps:$4 sm:$0xff]  }
 0x2c9   :  { %6391 = vtanh.f32 %v3075_v21  ;;  %v6196_v21 = vld [vmem:[#allocation10 + $0x4e8] ss:$16 sps:$4 sm:$0xff]   ;;  %v6204_v31 = vld [vmem:[#allocation10 + $0x4cc] ss:$16 sps:$4 sm:$0xff]  }
 0x2ca   :  { %v3077_v43 = vpop.f32.mrf.mxu1  ;;  %4501 = vmatpush2.bf16.msra.mxu1 %v6283_v27 }
 0x2cb   :  { %4552 = vmatprep.subr.bf16.mxu1 %v6291_v20  ;;  %v6202_v43 = vld [vmem:[#allocation10 + $0x4c8] ss:$16 sps:$4 sm:$0xff]  }
 0x2d4   :  { %v6390_v42 = vpop.eup %6389 }
 0x2d5   :  { %v7123_v45 = vpack.c.bf16 %v6390_v42, %v6390_v42  ;;  %v6226_v42 = vld [vmem:[#allocation10 + $0x448] ss:$16 sps:$4 sm:$0xff]  }
 0x2d6   :  { %v6392_v50 = vpop.eup %6391 }
 0x2d7   :  { %v7121_v14 = vpack.c.bf16 %v6392_v50, %v6392_v50  ;;  %v7246_v50 = vld [vmem:[#allocation23_spill] sm:$0xff] }
 0x2d8   :  { %v7247_v3 = vsub.s32 4, %v7246_v50  ;;  %v7248_v27 = vsub.s32 5, %v7246_v50  ;;  %v6316_v50 = vld [vmem:[#allocation10 + $0x3c8] ss:$16 sps:$4 sm:$0xff]  }
 0x2d9   :  { %4461 = vmatprep.mubr.bf16.mxu0 %v7121_v14 }
 0x2da   :  { %4462 = vmatmul.mubr.bf16.vlgmr.msra.gmra.mxu0 %v7123_v45  ;;  %v1187_v20 = vrot.slane %v7094_v2, %v7248_v27  ;;  %v6322_v27 = vld [vmem:[#allocation10 + $0x388] ss:$16 sps:$4 sm:$0xff]  }
 0x2db   :  { %4512 = vmatpush1.bf16.msra.mxu0 %v6145_v51  ;;  %4543 = vmatprep.mubr.bf16.mxu0 %v7109_v24  ;;  %v6165_v24 = vld [vmem:[#allocation10 + $0x2c] ss:$16 sps:$4 sm:$0xff]   ;;  %v1183_v51 = vrot.slane %v7094_v2, %v7247_v3 }
 0x2dc   :  { %4513 = vmatprep.subr.bf16.mxu0 %v6150_v60  ;;  %v6240_v60 = vld [vmem:[#allocation10 + $0x40c] ss:$16 sps:$4 sm:$0xff]  }
 0x2dd   :  { %v6258_v2 = vld [vmem:[#allocation10 + $0x5ac] ss:$16 sps:$4 sm:$0xff]  }
 0x2de   :  { %v6321_v3 = vld [vmem:[#allocation10 + $0x3ac] ss:$16 sps:$4 sm:$0xff]  }
 0x2df   :  { %4514 = vmatpush1.bf16.msra.mxu0 %v6148_v55  ;;  %v6238_v55 = vld [vmem:[#allocation10 + $0x408] ss:$16 sps:$4 sm:$0xff]  }
 0x2e0   :  { %4515 = vmatprep.subr.bf16.mxu0 %v6153_v36 }
 0x2e3   :  { %4516 = vmatpush1.bf16.msra.mxu0 %v6151_v39  ;;  %v6246_v39 = vld [vmem:[#allocation10 + $0x5ec] ss:$16 sps:$4 sm:$0xff]  }
 0x2e4   :  { %4517 = vmatprep.subr.bf16.mxu0 %v6156_v17 }
 0x2e7   :  { %4518 = vmatpush1.bf16.msra.mxu0 %v6154_v52  ;;  %v6244_v52 = vld [vmem:[#allocation10 + $0x5e8] ss:$16 sps:$4 sm:$0xff]  }
 0x2e8   :  { %4519 = vmatprep.subr.bf16.mxu0 %v6159_v1 }
 0x2eb   :  { %4520 = vmatpush1.bf16.msra.mxu0 %v6157_v29  ;;  %v6252_v29 = vld [vmem:[#allocation10 + $0x5cc] ss:$16 sps:$4 sm:$0xff]  }
 0x2ec   :  { %4521 = vmatprep.subr.bf16.mxu0 %v6162_v37 }
 0x2ef   :  { %4522 = vmatpush1.bf16.msra.mxu0 %v6160_v57 }
 0x2f0   :  { %4523 = vmatprep.subr.bf16.mxu0 %v6165_v24 }
 0x2f3   :  { %4524 = vmatpush1.bf16.msra.mxu0 %v6163_v7  ;;  %v6250_v7 = vld [vmem:[#allocation10 + $0x5c8] ss:$16 sps:$4 sm:$0xff]  }
 0x2f4   :  { %4525 = vmatprep.subr.bf16.mxu0 %v6168_v15 }
 0x2f7   :  { %4526 = vmatpush1.bf16.msra.mxu0 %v6166_v47  ;;  %v7128_v46 = vpop.f32.mrf.mxu0 }
 0x2f8   :  { %4527 = vmatprep.subr.bf16.mxu0 %v6171_v62  ;;  %v3114_v36 = vadd.f32 %v7128_v46, %v1183_v51  ;;  %v6264_v46 = vld [vmem:[#allocation10 + $0x58c] ss:$16 sps:$4 sm:$0xff]   ;;  %v6319_v51 = vld [vmem:[#allocation10 + $0x3a8] ss:$16 sps:$4 sm:$0xff]  }
 0x2f9   :  { %v7130_v11 = vpop.f32.mrf.mxu0 }
 0x2fa   :  { %v3116_v17 = vadd.f32 %v7130_v11, %v1187_v20  ;;  %v6270_v11 = vld [vmem:[#allocation10 + $0x56c] ss:$16 sps:$4 sm:$0xff]  }
 0x2fb   :  { %4528 = vmatpush2.bf16.msra.mxu0 %v6169_v22  ;;  %v3117_v48 = vpop.f32.mrf.mxu0  ;;  %v6256_v22 = vld [vmem:[#allocation10 + $0x5a8] ss:$16 sps:$4 sm:$0xff]   ;;  %v6327_v20 = vld [vmem:[#allocation10 + $0x36c] ss:$16 sps:$4 sm:$0xff]  }
 0x2fc   :  { %4529 = vmatprep.subr.bf16.mxu0 %v6174_v59  ;;  %v6276_v48 = vld [vmem:[#allocation10 + $0x54c] ss:$16 sps:$4 sm:$0xff]  }
 0x2fd   :  { %v3118_v12 = vpop.f32.mrf.mxu0 }
 0x2ff   :  { %4530 = vmatpush2.bf16.msra.mxu0 %v6172_v38  ;;  %v6262_v38 = vld [vmem:[#allocation10 + $0x588] ss:$16 sps:$4 sm:$0xff]  }
 0x300   :  { %4531 = vmatprep.subr.bf16.mxu0 %v6177_v16  ;;  %v6268_v16 = vld [vmem:[#allocation10 + $0x568] ss:$16 sps:$4 sm:$0xff]  }
 0x303   :  { %4532 = vmatpush2.bf16.msra.mxu0 %v6175_v28 }
 0x304   :  { %v3154_v34 = vpop.f32.mrf.mxu1  ;;  %4533 = vmatprep.subr.bf16.mxu0 %v6180_v58  ;;  %v6274_v58 = vld [vmem:[#allocation10 + $0x548] ss:$16 sps:$4 sm:$0xff]  }
 0x305   :  { %v3155_v1 = vadd.f32 %v3154_v34, %v3114_v36  ;;  %v6330_v36 = vld [vmem:[#allocation10 + $0x34c] ss:$16 sps:$4 sm:$0xff]  }
 0x306   :  { %v3156_v30 = vpop.f32.mrf.mxu1 }
 0x307   :  { %4534 = vmatpush2.bf16.msra.mxu0 %v6178_v10  ;;  %v3157_v57 = vadd.f32 %v3156_v30, %v3116_v17  ;;  %v6282_v10 = vld [vmem:[#allocation10 + $0x52c] ss:$16 sps:$4 sm:$0xff]  }
 0x308   :  { %v3158_v41 = vpop.f32.mrf.mxu1  ;;  %4535 = vmatprep.subr.bf16.mxu0 %v6183_v9  ;;  %v6289_v9 = vld [vmem:[#allocation10 + $0x2e8] ss:$16 sps:$4 sm:$0xff]   ;;  %v6333_v17 = vld [vmem:[#allocation10 + $0x32c] ss:$16 sps:$4 sm:$0xff]  }
 0x309   :  { %v6280_v41 = vld [vmem:[#allocation10 + $0x528] ss:$16 sps:$4 sm:$0xff]  }
 0x30a   :  { %v3159_v49 = vpop.f32.mrf.mxu1 }
 0x30b   :  { %4536 = vmatpush2.bf16.msra.mxu0 %v6181_v4  ;;  %v6294_v4 = vld [vmem:[#allocation10 + $0x2cc] ss:$16 sps:$4 sm:$0xff]  }
 0x30c   :  { %4537 = vmatprep.subr.bf16.mxu0 %v6186_v44  ;;  %v6288_v49 = vld [vmem:[#allocation10 + $0x50c] ss:$16 sps:$4 sm:$0xff]  }
 0x30f   :  { %4538 = vmatpush2.bf16.msra.mxu0 %v6184_v19  ;;  %v6292_v19 = vld [vmem:[#allocation10 + $0x2c8] ss:$16 sps:$4 sm:$0xff]  }
 0x310   :  { %4539 = vmatprep.subr.bf16.mxu0 %v6189_v63 }
 0x313   :  { %4540 = vmatpush2.bf16.msra.mxu0 %v6187_v0  ;;  %v6297_v0 = vld [vmem:[#allocation10 + $0x2ac] ss:$16 sps:$4 sm:$0xff]  }
 0x314   :  { %4541 = vmatprep.subr.bf16.mxu0 %v6192_v18  ;;  %v6286_v18 = vld [vmem:[#allocation10 + $0x508] ss:$16 sps:$4 sm:$0xff]  }
 0x317   :  { %4542 = vmatpush2.bf16.msra.mxu0 %v6190_v6 }
 0x318   :  { %4593 = vmatprep.subr.bf16.mxu0 %v6198_v8  ;;  %v6295_v8 = vld [vmem:[#allocation10 + $0x2a8] ss:$16 sps:$4 sm:$0xff]  }
 0x31a   :  { %4544 = vmatmul.mubr.bf16.vlgmr.msra.gmra.mxu0 %v7111_v5  ;;  %v6234_v5 = vld [vmem:[#allocation10 + $0x42c] ss:$16 sps:$4 sm:$0xff]  }
 0x31b   :  { %4594 = vmatpush1.bf16.msra.mxu0 %v6196_v21 }
 0x31c   :  { %4595 = vmatprep.subr.bf16.mxu0 %v6204_v31  ;;  %v6300_v31 = vld [vmem:[#allocation10 + $0x28c] ss:$16 sps:$4 sm:$0xff]  }
 0x31f   :  { %4596 = vmatpush1.bf16.msra.mxu0 %v6202_v43  ;;  %v6298_v43 = vld [vmem:[#allocation10 + $0x288] ss:$16 sps:$4 sm:$0xff]  }
 0x320   :  { %4597 = vmatprep.subr.bf16.mxu0 %v6210_v56  ;;  %v6303_v56 = vld [vmem:[#allocation10 + $0x26c] ss:$16 sps:$4 sm:$0xff]  }
 0x323   :  { %4598 = vmatpush1.bf16.msra.mxu0 %v6208_v23  ;;  %v6306_v23 = vld [vmem:[#allocation10 + $0x24c] ss:$16 sps:$4 sm:$0xff]  }
 0x324   :  { %4599 = vmatprep.subr.bf16.mxu0 %v6216_v35  ;;  %v6304_v35 = vld [vmem:[#allocation10 + $0x248] ss:$16 sps:$4 sm:$0xff]  }
 0x327   :  { %4600 = vmatpush1.bf16.msra.mxu0 %v6214_v40  ;;  %v6309_v40 = vld [vmem:[#allocation10 + $0x22c] ss:$16 sps:$4 sm:$0xff]  }
 0x328   :  { %4601 = vmatprep.subr.bf16.mxu0 %v6222_v26  ;;  %v6307_v26 = vld [vmem:[#allocation10 + $0x228] ss:$16 sps:$4 sm:$0xff]  }
 0x32b   :  { %4602 = vmatpush1.bf16.msra.mxu0 %v6220_v32  ;;  %v6312_v32 = vld [vmem:[#allocation10 + $0x20c] ss:$16 sps:$4 sm:$0xff]  }
 0x32c   :  { %4603 = vmatprep.subr.bf16.mxu0 %v6228_v53  ;;  %v6310_v53 = vld [vmem:[#allocation10 + $0x208] ss:$16 sps:$4 sm:$0xff]  }
 0x32f   :  { %4604 = vmatpush1.bf16.msra.mxu0 %v6226_v42  ;;  %v6315_v42 = vld [vmem:[#allocation10 + $0x3ec] ss:$16 sps:$4 sm:$0xff]  }
 0x330   :  { %4605 = vmatprep.subr.bf16.mxu0 %v6234_v5  ;;  %v6313_v5 = vld [vmem:[#allocation10 + $0x3e8] ss:$16 sps:$4 sm:$0xff]  }
 0x333   :  { %4606 = vmatpush1.bf16.msra.mxu0 %v6232_v33  ;;  %v6318_v33 = vld [vmem:[#allocation10 + $0x3cc] ss:$16 sps:$4 sm:$0xff]  }
 0x334   :  { %4607 = vmatprep.subr.bf16.mxu0 %v6240_v60  ;;  %v6324_v60 = vld [vmem:[#allocation10 + $0x38c] ss:$16 sps:$4 sm:$0xff]  }
 0x337   :  { %4608 = vmatpush1.bf16.msra.mxu0 %v6238_v55  ;;  %v3195_v37 = vpop.f32.mrf.mxu0  ;;  %v6325_v55 = vld [vmem:[#allocation10 + $0x368] ss:$16 sps:$4 sm:$0xff]  }
 0x338   :  { %4609 = vmatprep.subr.bf16.mxu0 %v6246_v39  ;;  %v3196_v24 = vadd.f32 %v3195_v37, %v3155_v1  ;;  %v6328_v39 = vld [vmem:[#allocation10 + $0x348] ss:$16 sps:$4 sm:$0xff]   ;;  %v6336_v1 = vld [vmem:[#allocation10 + $0x30c] ss:$16 sps:$4 sm:$0xff]  }
 0x339   :  { %v3197_v15 = vpop.f32.mrf.mxu0  ;;  %v6337_v37 = vld [vmem:[#allocation13 + $0x78] sm:$0xff]  }
 0x33a   :  { %v3198_v47 = vadd.f32 %v3197_v15, %v3157_v57  ;;  %6393 = vtanh.f32 %v3196_v24  ;;  %v6338_v57 = vld [vmem:[#allocation13 + $0x38] sm:$0xff]   ;;  %v6339_v24 = vld [vmem:[#allocation13 + $0x70] sm:$0xff]   ;;  %v6341_v15 = vld [vmem:[#allocation13 + $0x68] sm:$0xff]  }
 0x33b   :  { %4610 = vmatpush2.bf16.msra.mxu0 %v6244_v52  ;;  %v3199_v62 = vpop.f32.mrf.mxu0  ;;  %v6331_v52 = vld [vmem:[#allocation10 + $0x328] ss:$16 sps:$4 sm:$0xff]  }
 0x33c   :  { %4611 = vmatprep.subr.bf16.mxu0 %v6252_v29  ;;  %6395 = vtanh.f32 %v3198_v47  ;;  %v6334_v29 = vld [vmem:[#allocation10 + $0x308] ss:$16 sps:$4 sm:$0xff]   ;;  %v6342_v47 = vld [vmem:[#allocation13 + $0x28] sm:$0xff]  }
 0x33d   :  { %v3200_v59 = vpop.f32.mrf.mxu0 }
 0x33f   :  { %4612 = vmatpush2.bf16.msra.mxu0 %v6250_v7  ;;  %v6340_v7 = vld [vmem:[#allocation13 + $0x30] sm:$0xff]  }
 0x340   :  { %4613 = vmatprep.subr.bf16.mxu0 %v6258_v2  ;;  %v7147_v2 = vld [vmem:[#allocation11] sm:$0xf] }
 0x341   :  { %v3411_v62 = vrot.slane %v7147_v2, %v7242_v54  ;;  %v3415_v59 = vrot.slane %v7147_v2, %v7243_v61  ;;  %v6347_v54 = vld [vmem:[#allocation13 + $0x50] sm:$0xff]  }
 0x342   :  { %v6348_v61 = vld [vmem:[#allocation13 + $0x10] sm:$0xff]  }
 0x343   :  { %4614 = vmatpush2.bf16.msra.mxu0 %v6256_v22  ;;  %v6343_v22 = vld [vmem:[#allocation13 + $0x60] sm:$0xff]  }
 0x344   :  { %4615 = vmatprep.subr.bf16.mxu0 %v6264_v46  ;;  %v6344_v46 = vld [vmem:[#allocation13 + $0x20] sm:$0xff]  }
 0x347   :  { %4616 = vmatpush2.bf16.msra.mxu0 %v6262_v38  ;;  %v6394_v28 = vpop.eup %6393  ;;  %v6345_v38 = vld [vmem:[#allocation13 + $0x58] sm:$0xff]  }
 0x348   :  { %4617 = vmatprep.subr.bf16.mxu0 %v6270_v11  ;;  %v3212_v30 = vpack.c.bf16 %v6394_v28, %v6394_v28 }
 0x349   :  { %v6396_v12 = vpop.eup %6395 }
 0x34a   :  { %v3213_v34 = vpack.c.bf16 %v6396_v12, %v6396_v12  ;;  %v6346_v12 = vld [vmem:[#allocation13 + $0x18] sm:$0xff]  }
 0x34b   :  { %4618 = vmatpush2.bf16.msra.mxu0 %v6268_v16 }
 0x34c   :  { %4619 = vmatprep.subr.bf16.mxu0 %v6276_v48  ;;  %4502 = vmatprep.mubr.bf16.mxu1 %v3213_v34 }
 0x34d   :  { %4625 = vmatprep.mubr.bf16.mxu0 %v3213_v34  ;;  %v7141_v44 = vpop.f32.mrf.mxu1  ;;  %4503 = vmatmul.mubr.bf16.vlgmr.msra.gmra.mxu1 %v3212_v30 }
 0x34e   :  { %4553 = vmatpush1.bf16.msra.mxu1 %v6289_v9  ;;  %4584 = vmatprep.mubr.bf16.mxu1 %v7121_v14  ;;  %v6301_v14 = vld [vmem:[#allocation10 + $0x268] ss:$16 sps:$4 sm:$0xff]   ;;  %v6349_v9 = vld [vmem:[#allocation13 + $0x48] sm:$0xff]  }
 0x34f   :  { %4620 = vmatpush2.bf16.msra.mxu0 %v6274_v58  ;;  %v7144_v63 = vpop.f32.mrf.mxu1  ;;  %4554 = vmatprep.subr.bf16.mxu1 %v6294_v4  ;;  %v6351_v4 = vld [vmem:[#allocation13 + $0x40] sm:$0xff]  }
 0x350   :  { %4621 = vmatprep.subr.bf16.mxu0 %v6282_v10  ;;  %v4425_v16 = vadd.f32 %v7144_v63, %v3415_v59 }
 0x351   :  { %v4426_v6 = vpop.f32.mrf.mxu1 }
 0x352   :  { %4555 = vmatpush1.bf16.msra.mxu1 %v6292_v19 }
 0x353   :  { %4622 = vmatpush2.bf16.msra.mxu0 %v6280_v41  ;;  %v4427_v21 = vpop.f32.mrf.mxu1  ;;  %4556 = vmatprep.subr.bf16.mxu1 %v6297_v0  ;;  %v6352_v41 = vld [vmem:[#allocation13] sm:$0xff]  }
 0x354   :  { %4623 = vmatprep.subr.bf16.mxu0 %v6288_v49 }
 0x356   :  { %4557 = vmatpush1.bf16.msra.mxu1 %v6295_v8 }
 0x357   :  { %4624 = vmatpush2.bf16.msra.mxu0 %v6286_v18  ;;  %4558 = vmatprep.subr.bf16.mxu1 %v6300_v31 }
 0x35a   :  { %4626 = vmatmul.mubr.bf16.vlgmr.msra.gmra.mxu0 %v3212_v30  ;;  %4559 = vmatpush1.bf16.msra.mxu1 %v6298_v43  ;;  %v6350_v30 = vld [vmem:[#allocation13 + $0x8] sm:$0xff]  }
 0x35b   :  { %4560 = vmatprep.subr.bf16.mxu1 %v6303_v56 }
 0x35e   :  { %4561 = vmatpush1.bf16.msra.mxu1 %v6301_v14 }
 0x35f   :  { %4562 = vmatprep.subr.bf16.mxu1 %v6306_v23 }
 0x362   :  { %4563 = vmatpush1.bf16.msra.mxu1 %v6304_v35  ;;  %v6354_v35 = vld [vmem:[#allocation13 + $0xb8] sm:$0xff]  }
 0x363   :  { %4564 = vmatprep.subr.bf16.mxu1 %v6309_v40 }
 0x366   :  { %4565 = vmatpush1.bf16.msra.mxu1 %v6307_v26  ;;  %v6355_v26 = vld [vmem:[#allocation13 + $0xf0] sm:$0xff]  }
 0x367   :  { %4566 = vmatprep.subr.bf16.mxu1 %v6312_v32 }
 0x36a   :  { %4567 = vmatpush1.bf16.msra.mxu1 %v6310_v53  ;;  %v6356_v53 = vld [vmem:[#allocation13 + $0xb0] sm:$0xff]  }
 0x36b   :  { %4568 = vmatprep.subr.bf16.mxu1 %v6315_v42  ;;  %v6357_v42 = vld [vmem:[#allocation13 + $0xe8] sm:$0xff]  }
 0x36e   :  { %4569 = vmatpush2.bf16.msra.mxu1 %v6313_v5 }
 0x36f   :  { %4570 = vmatprep.subr.bf16.mxu1 %v6318_v33 }
 0x372   :  { %4571 = vmatpush2.bf16.msra.mxu1 %v6316_v50  ;;  %v6358_v50 = vld [vmem:[#allocation13 + $0xa8] sm:$0xff]  }
 0x373   :  { %4572 = vmatprep.subr.bf16.mxu1 %v6321_v3  ;;  %v6359_v3 = vld [vmem:[#allocation13 + $0xe0] sm:$0xff]  }
 0x376   :  { %4573 = vmatpush2.bf16.msra.mxu1 %v6319_v51 }
 0x377   :  { %4574 = vmatprep.subr.bf16.mxu1 %v6324_v60  ;;  %v6360_v60 = vld [vmem:[#allocation13 + $0xa0] sm:$0xff]  }
 0x37a   :  { %4575 = vmatpush2.bf16.msra.mxu1 %v6322_v27  ;;  %v6361_v27 = vld [vmem:[#allocation13 + $0xd8] sm:$0xff]  }
 0x37b   :  { %4576 = vmatprep.subr.bf16.mxu1 %v6327_v20  ;;  %v6362_v20 = vld [vmem:[#allocation13 + $0x98] sm:$0xff]  }
 0x37e   :  { %4577 = vmatpush2.bf16.msra.mxu1 %v6325_v55  ;;  %v6363_v55 = vld [vmem:[#allocation13 + $0xd0] sm:$0xff]  }
 0x37f   :  { %4578 = vmatprep.subr.bf16.mxu1 %v6330_v36  ;;  %v6364_v36 = vld [vmem:[#allocation13 + $0x90] sm:$0xff]  }
 0x382   :  { %4579 = vmatpush2.bf16.msra.mxu1 %v6328_v39  ;;  %v6365_v39 = vld [vmem:[#allocation13 + $0xc8] sm:$0xff]  }
 0x383   :  { %4580 = vmatprep.subr.bf16.mxu1 %v6333_v17  ;;  %v6366_v17 = vld [vmem:[#allocation13 + $0x88] sm:$0xff]  }
 0x386   :  { %4581 = vmatpush2.bf16.msra.mxu1 %v6331_v52  ;;  %v6367_v52 = vld [vmem:[#allocation13 + $0xc0] sm:$0xff]  }
 0x387   :  { %4582 = vmatprep.subr.bf16.mxu1 %v6336_v1  ;;  %v6368_v1 = vld [vmem:[#allocation13 + $0x80] sm:$0xff]  }
 0x38a   :  { %4583 = vmatpush2.bf16.msra.mxu1 %v6334_v29  ;;  %v3419_v29 = vrot.slane %v7147_v2, %v7244_v25 }
 0x38b   :  { %5551 = vmatprep.subr.bf16.mxu1 %v6337_v37  ;;  %v3423_v37 = vrot.slane %v7147_v2, %v7245_v13 }
 0x38d   :  { %4585 = vmatmul.mubr.bf16.vlgmr.msra.gmra.mxu1 %v7123_v45  ;;  %v4423_v45 = vadd.f32 %v7141_v44, %v3411_v62  ;;  %v6353_v44 = vld [vmem:[#allocation13 + $0xf8] sm:$0xff]  }
 0x38e   :  { %5552 = vmatpush3.bf16.msra.mxu1 %v6338_v57 }
 0x38f   :  { %5553 = vmatprep.subr.bf16.mxu1 %v6339_v24 }
 0x392   :  { %5554 = vmatpush3.bf16.msra.mxu1 %v6340_v7 }
 0x393   :  { %5555 = vmatprep.subr.bf16.mxu1 %v6341_v15 }
 0x396   :  { %5556 = vmatpush3.bf16.msra.mxu1 %v6342_v47 }
 0x397   :  { %5557 = vmatprep.subr.bf16.mxu1 %v6343_v22 }
 0x39a   :  { %v4463_v11 = vpop.f32.mrf.mxu0  ;;  %5558 = vmatpush3.bf16.msra.mxu1 %v6344_v46 }
 0x39b   :  { %v4464_v48 = vadd.f32 %v4463_v11, %v4423_v45  ;;  %5559 = vmatprep.subr.bf16.mxu1 %v6345_v38 }
 0x39c   :  { %v4465_v28 = vpop.f32.mrf.mxu0 }
 0x39d   :  { %v4466_v58 = vadd.f32 %v4465_v28, %v4425_v16 }
 0x39e   :  { %v4467_v10 = vpop.f32.mrf.mxu0  ;;  %5560 = vmatpush3.bf16.msra.mxu1 %v6346_v12 }
 0x39f   :  { %5561 = vmatprep.subr.bf16.mxu1 %v6347_v54 }
 0x3a0   :  { %v4468_v34 = vpop.f32.mrf.mxu0 }
 0x3a2   :  { %5562 = vmatpush3.bf16.msra.mxu1 %v6348_v61 }
 0x3a3   :  { %5563 = vmatprep.subr.bf16.mxu1 %v6349_v9 }
 0x3a6   :  { %5564 = vmatpush3.bf16.msra.mxu1 %v6350_v30 }
 0x3a7   :  { %5565 = vmatprep.subr.bf16.mxu1 %v6351_v4 }
 0x3aa   :  { %5566 = vmatpush3.bf16.msra.mxu1 %v6352_v41 }
 0x3ab   :  { %5573 = vmatprep.subr.bf16.mxu1 %v6353_v44 }
 0x3da   :  { %v4545_v49 = vpop.f32.mrf.mxu0 }
 0x3db   :  { %v4546_v57 = vadd.f32 %v4545_v49, %v3419_v29 }
 0x3dc   :  { %v4547_v19 = vpop.f32.mrf.mxu0 }
 0x3dd   :  { %v4548_v7 = vadd.f32 %v4547_v19, %v3423_v37 }
 0x3de   :  { %v4549_v63 = vpop.f32.mrf.mxu0 }
 0x3e0   :  { %v4550_v0 = vpop.f32.mrf.mxu0 }
 0x40d   :  { %v4504_v18 = vpop.f32.mrf.mxu1 }
 0x40e   :  { %v4505_v6 = vadd.f32 %v4504_v18, %v4464_v48 }
 0x40f   :  { %v4506_v8 = vpop.f32.mrf.mxu1 }
 0x410   :  { %v4507_v21 = vadd.f32 %v4506_v8, %v4466_v58  ;;  %v4634_v31 = vmax.f32 %v4505_v6, 0.0  ;;  %v5518_v58 = vld [vmem:[#allocation14] ss:$0 sm:$0xff]  ;;  %v6611_v6 = vmov 0  }
 0x411   :  { %v4508_v43 = vpop.f32.mrf.mxu1  ;;  %5615 = vset.pattern.permute.xlu1 %v6611_v6  ;;  %5616 = vset.pattern.permute.xlu0 %v6611_v6 }
 0x412   :  { %v4635_v56 = vmax.f32 %v4507_v21, 0.0  ;;  %v4638_v40 = vpack.c.bf16 %v4634_v31, %v4634_v31 }
 0x413   :  { %v4509_v14 = vpop.f32.mrf.mxu1 }
 0x414   :  { %v4639_v23 = vpack.c.bf16 %v4635_v56, %v4635_v56 }
 0x416   :  { %4937 = vmatprep.mubr.bf16.mxu1 %v4639_v23 }
 0x417   :  { %4938 = vmatmul.mubr.bf16.vlgmr.msra.gmra.mxu1 %v4638_v40 }
 0x418   :  { %5574 = vmatpush3.bf16.msra.mxu1 %v6354_v35 }
 0x419   :  { %5575 = vmatprep.subr.bf16.mxu1 %v6355_v26 }
 0x41a   :  { %v4627_v32 = vpop.f32.mrf.mxu0 }
 0x41c   :  { %v4629_v5 = vpop.f32.mrf.mxu0  ;;  %5576 = vmatpush3.bf16.msra.mxu1 %v6356_v53 }
 0x41d   :  { %5577 = vmatprep.subr.bf16.mxu1 %v6357_v42 }
 0x41e   :  { %v4631_v33 = vpop.f32.mrf.mxu0 }
 0x420   :  { %v4632_v51 = vpop.f32.mrf.mxu0  ;;  %5578 = vmatpush3.bf16.msra.mxu1 %v6358_v50 }
 0x421   :  { %5579 = vmatprep.subr.bf16.mxu1 %v6359_v3 }
 0x424   :  { %5580 = vmatpush3.bf16.msra.mxu1 %v6360_v60 }
 0x425   :  { %5581 = vmatprep.subr.bf16.mxu1 %v6361_v27 }
 0x428   :  { %5582 = vmatpush3.bf16.msra.mxu1 %v6362_v20 }
 0x429   :  { %5583 = vmatprep.subr.bf16.mxu1 %v6363_v55 }
 0x42c   :  { %5584 = vmatpush3.bf16.msra.mxu1 %v6364_v36 }
 0x42d   :  { %5585 = vmatprep.subr.bf16.mxu1 %v6365_v39 }
 0x430   :  { %5586 = vmatpush3.bf16.msra.mxu1 %v6366_v17 }
 0x431   :  { %5587 = vmatprep.subr.bf16.mxu1 %v6367_v52 }
 0x434   :  { %5588 = vmatpush3.bf16.msra.mxu1 %v6368_v1 }
 0x44d   :  { %v4586_v24 = vpop.f32.mrf.mxu1 }
 0x44e   :  { %v4587_v15 = vadd.f32 %v4586_v24, %v4546_v57 }
 0x44f   :  { %v4588_v47 = vpop.f32.mrf.mxu1 }
 0x450   :  { %v4628_v62 = vadd.f32 %v4627_v32, %v4587_v15  ;;  %v4589_v22 = vadd.f32 %v4588_v47, %v4548_v7 }
 0x451   :  { %v4590_v59 = vpop.f32.mrf.mxu1 }
 0x452   :  { %v4630_v46 = vadd.f32 %v4629_v5, %v4589_v22  ;;  %v4636_v45 = vmax.f32 %v4628_v62, 0.0 }
 0x453   :  { %v4591_v38 = vpop.f32.mrf.mxu1 }
 0x454   :  { %v4637_v11 = vmax.f32 %v4630_v46, 0.0  ;;  %v4640_v48 = vpack.c.bf16 %v4636_v45, %v4636_v45 }
 0x456   :  { %v4641_v16 = vpack.c.bf16 %v4637_v11, %v4637_v11 }
 0x458   :  { %4977 = vmatprep.mubr.bf16.mxu1 %v4641_v16 }
 0x459   :  { %4978 = vmatmul.mubr.bf16.vlgmr.msra.gmra.mxu1 %v4640_v48 }
 0x4d7   :  { %v5567_v25 = vpop.f32.mrf.mxu1 }
 0x4d9   :  { %v5568_v28 = vpop.f32.mrf.mxu1 }
 0x4da   :  { %v5569_v12 = vadd.f32 %v5568_v28, %v5567_v25 }
 0x4db   :  { %v5570_v13 = vpop.f32.mrf.mxu1 }
 0x4dc   :  { %v4940_v34 = vadd.f32 %v5569_v12, %v5518_v58 }
 0x4dd   :  { %v5571_v2 = vpop.f32.mrf.mxu1 }
 0x519   :  { %v5589_v54 = vpop.f32.mrf.mxu1 }
 0x51b   :  { %v5590_v10 = vpop.f32.mrf.mxu1 }
 0x51c   :  { %v5591_v61 = vadd.f32 %v5590_v10, %v5589_v54 }
 0x51d   :  { %v5592_v9 = vpop.f32.mrf.mxu1 }
 0x51e   :  { %v4980_v30 = vadd.f32 %v5591_v61, %v4940_v34 }
 0x51f   :  { %v5593_v4 = vpop.f32.mrf.mxu1 }
 0x520   :  { %4986 = vrot.lane.b32.xlu1 %v4980_v30, %s6609_s6  ;;  %4990 = vrot.lane.b32.xlu0 %v4980_v30, %s6610_s7 }
 0x592   :  { %v4991_v41 = vpop.permute.xlu0 %4990  ;;  %v4987_v35 = vpop.permute.xlu1 %4986 }
 0x593   :  { %v4993_v44 = vsub.f32 %v4980_v30, %v4991_v41  ;;  %v4989_v40 = vmax.f32 %v4980_v30, %v4987_v35 }
 0x595   :  { %v4994_v49 = vand.u32 2147483647, %v4993_v44 }
 0x597   :  { %v4995_v19 = vsub.f32 0.0, %v4994_v49 }
 0x599   :  { %v4996_v63 = vmul.f32 1.442695, %v4995_v19 }
 0x59b   :  { %6397 = vpow2.f32 %v4996_v63 }
 0x5a8   :  { %v6398_v0 = vpop.eup %6397 }
 0x5a9   :  { %v4998_v18 = vadd.f32 1.0, %v6398_v0  ;;  %v5001_v8 = vmul.f32 -0.5, %v6398_v0  ;;  %v5004_v31 = vand.u32 2147483647, %v6398_v0 }
 0x5ab   :  { %6399 = vlog2.f32 %v4998_v18  ;;  %v5002_v21 = vadd.f32 1.0, %v5001_v8  ;;  %vm5005_vm8 = vcmp.lt.f32.partialorder %v5004_v31, 0.0004427343 }
 0x5ad   :  { %v5003_v14 = vmul.f32 %v6398_v0, %v5002_v21 }
 0x5b8   :  { %v6400_v43 = vpop.eup %6399 }
 0x5b9   :  { %v5000_v56 = vmul.f32 0.6931472, %v6400_v43 }
 0x5bb   :  { %v5006_v23 = vsel %vm5005_vm8, %v5003_v14, %v5000_v56 }
 0x5bc   :  { %5008 = vrot.lane.b32.xlu0 %v5006_v23, %s6609_s6 }
 0x62e   :  { %v5009_v26 = vpop.permute.xlu0 %5008 }
 0x62f   :  { %v5011_v32 = vadd.f32 %v5009_v26, %v4989_v40 }
 0x631   :  { %5014 = vperm.xlu1 %5615, %v5011_v32  }
 0x6ac   :  { %v5015_v53 = vpop.permute.xlu1 %5014 }
 0x6ad   :  { %v5017_v42 = vsub.f32 %v4980_v30, %v5015_v53 }
 0x6af   :  { %5018 = vst [vmem:[#allocation16] sm:$0xff] %v5017_v42 }
 0x6b0   :  { %6572 = shalt.err (!%p6569_p2)
}
 0x6b1   :  { %5028 = dma.vmem_to_hbm [thread:$0]  %s5026_s25, 128, %s7170_s8, [#allocation4]  }
 0x6b2   :  { %6591 = dma.done.wait [#allocation4], 128  }
 0x6b3   :  { %6592 = vsyncadd [#allocation4], 4294967168 }
 0x6b4   :  { %5032 = vsyncpa [#allocation3], 1 }
 0x6b5   :  { %5033 = vsyncpa [#allocation6], 1 }
 0x6b6   :  { %5034 = vsyncpa [#allocation9], 1 }
 0x6b7   :  { %5035 = vsyncpa [#allocation12], 1 }
 0x6b8   :  { %5036 = vsyncpa [#allocation15], 1 }
 0x6b9   :  { %5037 = vsyncpa [#allocation4], 1 }

</bundles_post_ra>
